<compile_context>
chip_gen: v5e
topology: v5e:2x2
jax: 0.10.0
libtpu: 0.0.40
codegen_flags: <defaults>
</compile_context>

<pallas_src>
import functools

import jax
import jax.numpy as jnp
from jax.experimental import pallas as pl
from jax.experimental.pallas import tpu as pltpu


# ----------------------------------------------------------------------------
# Fused recurrence kernel (grid-free): encoder GRU -> last_state select ->
# dec_start Linear -> decoder GRUCell loop.  Emits the (Td*Bp, H) hidden slab.
# ----------------------------------------------------------------------------
def recurrence_kernel(lengths_ref, x_enc_ref,
                      enc_w_ih_ref, enc_w_hh_ref, enc_b_ih_ref, enc_b_hh_ref,
                      dec_start_w_ref, dec_start_b_ref,
                      dec_w_ih_ref, dec_w_hh_ref, dec_b_ih_ref, dec_b_hh_ref,
                      x_dec_hbm,
                      h_states_ref,
                      x_dec_vmem, gi_enc_ref, gi_dec_ref, dma_sem):
    Bp = lengths_ref.shape[0]
    T = x_enc_ref.shape[0] // Bp
    Td = x_dec_vmem.shape[0] // Bp
    H = enc_w_hh_ref.shape[0]

    # Start the x_dec HBM->VMEM copy now; it overlaps the encoder recurrence.
    x_dec_cp = pltpu.make_async_copy(x_dec_hbm, x_dec_vmem, dma_sem)
    x_dec_cp.start()

    def bdot(a, b):
        # bf16 MXU operands, f32 accumulation (single MXU pass on all chips).
        return jnp.dot(a.astype(jnp.bfloat16), b.astype(jnp.bfloat16),
                       preferred_element_type=jnp.float32)

    def gru_step(gi_ref, t, h, w_hh_ref, b_hh):
        # gi_ref already holds x @ W_ih + b_ih; read only this step's Bp rows.
        gi = gi_ref[pl.ds(t * Bp, Bp), :]                       # (Bp, 3H)
        gh = bdot(h, w_hh_ref[...]) + b_hh                      # (Bp, 3H)
        r = jax.nn.sigmoid(gi[:, 0:H] + gh[:, 0:H])
        z = jax.nn.sigmoid(gi[:, H:2 * H] + gh[:, H:2 * H])
        n = jnp.tanh(gi[:, 2 * H:3 * H] + r * gh[:, 2 * H:3 * H])
        return (1.0 - z) * n + z * h                            # f32 VPU math

    # Encoder input projection hoisted into one MXU matmul, staged in VMEM so
    # the full (T*Bp, 3H) slab never lives in vregs.
    gi_enc_ref[...] = bdot(x_enc_ref[...], enc_w_ih_ref[...]) + enc_b_ih_ref[...]

    enc_b_hh = jnp.broadcast_to(enc_b_hh_ref[...], (Bp, 3 * H))  # 3-vreg hoist
    lengths = lengths_ref[...]                                   # (Bp, 1) int32

    h = jnp.zeros((Bp, H), jnp.float32)
    last_state = jnp.zeros((Bp, H), jnp.float32)
    for t in range(T):                      # static trip count; refs read inside
        h = gru_step(gi_enc_ref, t, h, enc_w_hh_ref, enc_b_hh)
        sel = (lengths == t).astype(jnp.float32)                 # (Bp, 1)
        last_state = sel * h + (1.0 - sel) * last_state          # exact select

    # dec_start Linear on the VMEM-resident last_state -> decoder h0.
    h = bdot(last_state, dec_start_w_ref[...]) + dec_start_b_ref[...]

    # Decoder input projection needs x_dec: wait on the overlapped DMA here.
    x_dec_cp.wait()
    gi_dec_ref[...] = bdot(x_dec_vmem[...], dec_w_ih_ref[...]) + dec_b_ih_ref[...]

    dec_b_hh = jnp.broadcast_to(dec_b_hh_ref[...], (Bp, 3 * H))
    for t in range(Td):
        h = gru_step(gi_dec_ref, t, h, dec_w_hh_ref, dec_b_hh)
        h_states_ref[pl.ds(t * Bp, Bp), :] = h


def run_recurrence(lengths, x_enc, x_dec,
                   enc_w_ih, enc_w_hh, enc_b_ih, enc_b_hh,
                   dec_start_w, dec_start_b,
                   dec_w_ih, dec_w_hh, dec_b_ih, dec_b_hh):
    Bp = lengths.shape[0]
    E = x_enc.shape[1]
    T = x_enc.shape[0] // Bp
    Td = x_dec.shape[0] // Bp
    H = enc_w_hh.shape[0]

    vmem = pl.BlockSpec(memory_space=pltpu.MemorySpace.VMEM)
    any_spec = pl.BlockSpec(memory_space=pl.ANY)   # x_dec: manual, overlapped DMA

    return pl.pallas_call(
        recurrence_kernel,
        out_shape=jax.ShapeDtypeStruct((Td * Bp, H), jnp.float32),
        in_specs=[vmem] * 12 + [any_spec],
        out_specs=vmem,
        scratch_shapes=[
            pltpu.VMEM((Td * Bp, E), x_dec.dtype),       # x_dec landing buffer
            pltpu.VMEM((T * Bp, 3 * H), jnp.float32),    # gi_enc
            pltpu.VMEM((Td * Bp, 3 * H), jnp.float32),   # gi_dec
            pltpu.SemaphoreType.DMA(()),
        ],
    )(lengths, x_enc,
      enc_w_ih, enc_w_hh, enc_b_ih, enc_b_hh,
      dec_start_w, dec_start_b,
      dec_w_ih, dec_w_hh, dec_b_ih, dec_b_hh,
      x_dec)


# ----------------------------------------------------------------------------
# Gridded logits projection: (R, H) @ (H, Vp) + b, tiled over rows and vocab.
# Lane-dense Vp output tiles; both grid axes marked "parallel" (v7x 2-TC).
# ----------------------------------------------------------------------------
def logits_kernel(h_ref, w_ref, b_ref, o_ref):
    o_ref[...] = (jnp.dot(h_ref[...].astype(jnp.bfloat16),
                          w_ref[...].astype(jnp.bfloat16),
                          preferred_element_type=jnp.float32)
                  + b_ref[...])


def _pick_row_tile(rows, cap=512):
    if rows <= cap:
        return rows
    for c in range(cap, 7, -8):
        if rows % c == 0:
            return c
    return 8


def _pick_col_tile(cols, cap=2048):
    if cols <= cap:
        return cols
    for c in range(cap, 127, -128):
        if cols % c == 0:
            return c
    return 128


def run_logits(h_states, logits_w, logits_b):
    R, H = h_states.shape
    Vp = logits_w.shape[1]
    TM = _pick_row_tile(R)
    TN = _pick_col_tile(Vp)
    grid = (R // TM, Vp // TN)

    return pl.pallas_call(
        logits_kernel,
        out_shape=jax.ShapeDtypeStruct((R, Vp), jnp.float32),
        grid_spec=pltpu.PrefetchScalarGridSpec(
            num_scalar_prefetch=0, grid=grid,
            in_specs=[pl.BlockSpec((TM, H), lambda i, j: (i, 0)),
                      pl.BlockSpec((H, TN), lambda i, j: (0, j)),
                      pl.BlockSpec((1, TN), lambda i, j: (0, j))],
            out_specs=pl.BlockSpec((TM, TN), lambda i, j: (i, j))),
        compiler_params=pltpu.CompilerParams(
            dimension_semantics=("parallel", "parallel"),
            vmem_limit_bytes=32 * 1024 * 1024),
    )(h_states, logits_w, logits_b)


def _round_up(x, m):
    return ((x + m - 1) // m) * m


# ----------------------------------------------------------------------------
# Full model forward (= BasicModel.forward: encode then teacher-forced decode).
# ----------------------------------------------------------------------------
@functools.partial(jax.jit, static_argnames=("eos_ix", "bos_ix"))
def basic_model_forward(params, inp, out, *, eos_ix, bos_ix):
    B, T_in = inp.shape
    Td = out.shape[1] - 1
    V = params["logits_w"].shape[1]
    E = params["emb_inp"].shape[1]
    Bp = _round_up(B, 8)        # whole padded batch stays as MXU M-dim
    Vp = _round_up(V, 128)      # lane-dense logits slab

    bf = lambda a: a.astype(jnp.bfloat16)

    # ---- glue (embedding gathers, lengths, pads) in plain JAX ----
    inp_emb = jnp.take(params["emb_inp"], inp, axis=0)             # [B, T, E]
    x_enc = jnp.transpose(inp_emb, (1, 0, 2))                      # [T, B, E]
    x_enc = jnp.pad(x_enc, ((0, 0), (0, Bp - B), (0, 0)))
    x_enc = bf(x_enc.reshape(T_in * Bp, E))

    out_emb = jnp.take(params["emb_out"], out[:, :-1], axis=0)     # [B, Td, E]
    x_dec = jnp.transpose(out_emb, (1, 0, 2))                      # [Td, B, E]
    x_dec = jnp.pad(x_dec, ((0, 0), (0, Bp - B), (0, 0)))
    x_dec = bf(x_dec.reshape(Td * Bp, E))

    lengths = jnp.minimum(jnp.sum((inp != eos_ix).astype(jnp.int32), axis=1),
                          T_in - 1)                                # [B]
    lengths = jnp.pad(lengths, (0, Bp - B)).reshape(Bp, 1).astype(jnp.int32)

    # ---- fused encoder + decoder recurrence kernel -> hidden slab ----
    h_states = run_recurrence(
        lengths, x_enc, x_dec,
        bf(params["enc_w_ih"]), bf(params["enc_w_hh"]),
        params["enc_b_ih"], params["enc_b_hh"],
        bf(params["dec_start_w"]), params["dec_start_b"],
        bf(params["dec_w_ih"]), bf(params["dec_w_hh"]),
        params["dec_b_ih"], params["dec_b_hh"])                    # [Td*Bp, H]

    # ---- gridded logits projection ----
    logits_w_p = jnp.pad(bf(params["logits_w"]), ((0, 0), (0, Vp - V)))
    logits_b_p = jnp.pad(params["logits_b"], ((0, 0), (0, Vp - V)))
    logits_flat = run_logits(h_states, logits_w_p, logits_b_p)     # [Td*Bp, Vp]

    dec_logits = logits_flat.reshape(Td, Bp, Vp)[:, :B, :V]
    dec_logits = jnp.transpose(dec_logits, (1, 0, 2))              # [B, Td, V]

    onehot_bos = jax.nn.one_hot(jnp.full((B,), bos_ix, dtype=jnp.int32),
                                V, dtype=jnp.float32)
    first_logits = jnp.log(onehot_bos + 1e-9)                      # [B, V]
    return jnp.concatenate([first_logits[:, None, :], dec_logits], axis=1)


# ----------------------------------------------------------------------------
# Pure-JAX reference (lax.scan, gather-based last_state).  Uses the same bf16
# dot-operand casting / f32 accumulation as the kernels so the structural check
# stays tight.
# ----------------------------------------------------------------------------
def reference_forward(params, inp, out, *, eos_ix, bos_ix):
    H = params["dec_start_w"].shape[0]

    def bdot(a, b):
        return jnp.dot(a.astype(jnp.bfloat16), b.astype(jnp.bfloat16),
                       preferred_element_type=jnp.float32)

    def gru_step(h, x, w_ih, w_hh, b_ih, b_hh):
        gi = bdot(x, w_ih) + b_ih
        gh = bdot(h, w_hh) + b_hh
        r = jax.nn.sigmoid(gi[:, 0:H] + gh[:, 0:H])
        z = jax.nn.sigmoid(gi[:, H:2 * H] + gh[:, H:2 * H])
        n = jnp.tanh(gi[:, 2 * H:3 * H] + r * gh[:, 2 * H:3 * H])
        return (1.0 - z) * n + z * h

    B, T_in = inp.shape
    inp_emb = jnp.take(params["emb_inp"], inp, axis=0)
    h = jnp.zeros((B, H), jnp.float32)

    def enc_scan(h, x):
        h2 = gru_step(h, x, params["enc_w_ih"], params["enc_w_hh"],
                      params["enc_b_ih"], params["enc_b_hh"])
        return h2, h2

    _, enc_seq = jax.lax.scan(enc_scan, h, jnp.transpose(inp_emb, (1, 0, 2)))
    lengths = jnp.minimum(jnp.sum((inp != eos_ix).astype(jnp.int32), axis=1),
                          T_in - 1)
    last_state = enc_seq[lengths, jnp.arange(B)]
    dec_h = bdot(last_state, params["dec_start_w"]) + params["dec_start_b"]

    V = params["logits_w"].shape[1]
    first_logits = jnp.log(jax.nn.one_hot(jnp.full((B,), bos_ix), V) + 1e-9)
    out_emb = jnp.take(params["emb_out"], out[:, :-1], axis=0)

    def dec_scan(h, x):
        h2 = gru_step(h, x, params["dec_w_ih"], params["dec_w_hh"],
                      params["dec_b_ih"], params["dec_b_hh"])
        return h2, bdot(h2, params["logits_w"]) + params["logits_b"]

    _, logits = jax.lax.scan(dec_scan, dec_h, jnp.transpose(out_emb, (1, 0, 2)))
    return jnp.concatenate([first_logits[:, None, :],
                            jnp.transpose(logits, (1, 0, 2))], axis=1)


def init_params(key, inp_voc_size, out_voc_size, emb_size, hid_size):
    ks = jax.random.split(key, 12)
    s = 0.1
    return {
        "emb_inp":     jax.random.normal(ks[0], (inp_voc_size, emb_size), jnp.float32) * s,
        "emb_out":     jax.random.normal(ks[1], (out_voc_size, emb_size), jnp.float32) * s,
        "enc_w_ih":    jax.random.normal(ks[2], (emb_size, 3 * hid_size), jnp.float32) * s,
        "enc_w_hh":    jax.random.normal(ks[3], (hid_size, 3 * hid_size), jnp.float32) * s,
        "enc_b_ih":    jax.random.normal(ks[4], (1, 3 * hid_size), jnp.float32) * s,
        "enc_b_hh":    jax.random.normal(ks[5], (1, 3 * hid_size), jnp.float32) * s,
        "dec_start_w": jax.random.normal(ks[6], (hid_size, hid_size), jnp.float32) * s,
        "dec_start_b": jnp.zeros((1, hid_size), jnp.float32),
        "dec_w_ih":    jax.random.normal(ks[7], (emb_size, 3 * hid_size), jnp.float32) * s,
        "dec_w_hh":    jax.random.normal(ks[8], (hid_size, 3 * hid_size), jnp.float32) * s,
        "dec_b_ih":    jax.random.normal(ks[9], (1, 3 * hid_size), jnp.float32) * s,
        "dec_b_hh":    jax.random.normal(ks[10], (1, 3 * hid_size), jnp.float32) * s,
        "logits_w":    jax.random.normal(ks[11], (hid_size, out_voc_size), jnp.float32) * s,
        "logits_b":    jnp.zeros((1, out_voc_size), jnp.float32),
    }


if __name__ == "__main__":
    # Small shapes consistent with the module's forward pass.
    B, T_IN, T_OUT = 2, 8, 8
    EMB, HID = 64, 128
    V_IN, V_OUT = 32, 32
    BOS_IX, EOS_IX = 1, 2

    key = jax.random.PRNGKey(0)
    kp, ki, ko = jax.random.split(key, 3)
    params = init_params(kp, V_IN, V_OUT, EMB, HID)

    inp = jax.random.randint(ki, (B, T_IN), 0, V_IN, dtype=jnp.int32)
    out = jax.random.randint(ko, (B, T_OUT), 0, V_OUT, dtype=jnp.int32)

    logits = basic_model_forward(params, inp, out, eos_ix=EOS_IX, bos_ix=BOS_IX)
    logits = jax.block_until_ready(logits)
    assert logits.shape == (B, T_OUT, V_OUT), logits.shape

    ref = reference_forward(params, inp, out, eos_ix=EOS_IX, bos_ix=BOS_IX)
    ref = jax.block_until_ready(ref)
    err = float(jnp.max(jnp.abs(logits - ref)))
    # bf16 operands / f32 accumulation on both sides; slack covers transcendental
    # implementation differences amplified through the 15-step recurrence.
    assert err < 5e-3, err

    print("KERNEL_OK")
</pallas_src>

<mosaic_0001>
module attributes {stable_mosaic.version = 11 : i64} {
  func.func @recurrence_kernel(%arg0: memref<8x1xi32, #tpu.memory_space<vmem>>, %arg1: memref<64x64xbf16, #tpu.memory_space<vmem>>, %arg2: memref<64x384xbf16, #tpu.memory_space<vmem>>, %arg3: memref<128x384xbf16, #tpu.memory_space<vmem>>, %arg4: memref<1x384xf32, #tpu.memory_space<vmem>>, %arg5: memref<1x384xf32, #tpu.memory_space<vmem>>, %arg6: memref<128x128xbf16, #tpu.memory_space<vmem>>, %arg7: memref<1x128xf32, #tpu.memory_space<vmem>>, %arg8: memref<64x384xbf16, #tpu.memory_space<vmem>>, %arg9: memref<128x384xbf16, #tpu.memory_space<vmem>>, %arg10: memref<1x384xf32, #tpu.memory_space<vmem>>, %arg11: memref<1x384xf32, #tpu.memory_space<vmem>>, %arg12: memref<56x64xbf16, #tpu.memory_space<any>>, %arg13: memref<56x128xf32, #tpu.memory_space<vmem>>, %arg14: memref<56x64xbf16, #tpu.memory_space<vmem>>, %arg15: memref<64x384xf32, #tpu.memory_space<vmem>>, %arg16: memref<56x384xf32, #tpu.memory_space<vmem>>, %arg17: memref<!tpu.dma_semaphore, #tpu.memory_space<semaphore_mem>>) attributes {dimension_semantics = [], scalar_prefetch = 0 : i64, scratch_operands = 4 : i64, tpu.core_type = #tpu.core_type<tc>} {
    tpu.enqueue_dma source(%arg12 : memref<56x64xbf16, #tpu.memory_space<any>>) target(%arg14 : memref<56x64xbf16, #tpu.memory_space<vmem>>) target_semaphore(%arg17 : memref<!tpu.dma_semaphore, #tpu.memory_space<semaphore_mem>>)
    %c0 = arith.constant 0 : index
    %c0_0 = arith.constant 0 : index
    %0 = vector.load %arg1[%c0, %c0_0] : memref<64x64xbf16, #tpu.memory_space<vmem>>, vector<64x64xbf16>
    %c0_1 = arith.constant 0 : index
    %c0_2 = arith.constant 0 : index
    %1 = vector.load %arg2[%c0_1, %c0_2] : memref<64x384xbf16, #tpu.memory_space<vmem>>, vector<64x384xbf16>
    %cst = arith.constant dense<0.000000e+00> : vector<64x384xf32>
    %2 = tpu.matmul %0, %1, %cst {dimension_numbers = #tpu.dot_dimension_numbers<[1], [0], [0], [1], [0, 0, 1, 1], [], []>} : vector<64x64xbf16>, vector<64x384xbf16>, vector<64x384xf32> -> vector<64x384xf32>
    %c0_3 = arith.constant 0 : index
    %c0_4 = arith.constant 0 : index
    %3 = vector.load %arg4[%c0_3, %c0_4] : memref<1x384xf32, #tpu.memory_space<vmem>>, vector<1x384xf32>
    %4 = vector.broadcast %3 : vector<1x384xf32> to vector<64x384xf32>
    %5 = arith.addf %2, %4 : vector<64x384xf32>
    %c0_5 = arith.constant 0 : index
    %c0_6 = arith.constant 0 : index
    %6 = vector.load %arg15[%c0_5, %c0_6] : memref<64x384xf32, #tpu.memory_space<vmem>>, vector<64x384xf32>
    tpu.vector_store %arg15[%c0_5, %c0_6], %5 {strides = array<i32>} : memref<64x384xf32, #tpu.memory_space<vmem>>, vector<64x384xf32>,
    %c0_7 = arith.constant 0 : index
    %c0_8 = arith.constant 0 : index
    %7 = vector.load %arg5[%c0_7, %c0_8] : memref<1x384xf32, #tpu.memory_space<vmem>>, vector<1x384xf32>
    %8 = vector.shape_cast %7 : vector<1x384xf32> to vector<1x384xf32>
    %9 = vector.broadcast %8 : vector<1x384xf32> to vector<8x384xf32>
    %c0_9 = arith.constant 0 : index
    %c0_10 = arith.constant 0 : index
    %10 = vector.load %arg0[%c0_9, %c0_10] : memref<8x1xi32, #tpu.memory_space<vmem>>, vector<8x1xi32>
    %cst_11 = arith.constant 0.000000e+00 : f32
    %11 = vector.broadcast %cst_11 : f32 to vector<8x128xf32>
    %cst_12 = arith.constant 0.000000e+00 : f32
    %12 = vector.broadcast %cst_12 : f32 to vector<8x128xf32>
    %c0_13 = arith.constant 0 : index
    %c0_14 = arith.constant 0 : index
    %13 = vector.load %arg15[%c0_13, %c0_14] : memref<64x384xf32, #tpu.memory_space<vmem>>, vector<8x384xf32>
    %c0_15 = arith.constant 0 : index
    %c0_16 = arith.constant 0 : index
    %14 = vector.load %arg3[%c0_15, %c0_16] : memref<128x384xbf16, #tpu.memory_space<vmem>>, vector<128x384xbf16>
    %15 = arith.truncf %11 : vector<8x128xf32> to vector<8x128xbf16>
    %cst_17 = arith.constant dense<0.000000e+00> : vector<8x384xf32>
    %16 = tpu.matmul %15, %14, %cst_17 {dimension_numbers = #tpu.dot_dimension_numbers<[1], [0], [0], [1], [0, 0, 1, 1], [], []>} : vector<8x128xbf16>, vector<128x384xbf16>, vector<8x384xf32> -> vector<8x384xf32>
    %17 = arith.addf %16, %9 : vector<8x384xf32>
    %18 = vector.extract_strided_slice %13 {offsets = [0, 0], sizes = [8, 128], strides = [1, 1]} : vector<8x384xf32> to vector<8x128xf32>
    %19 = vector.extract_strided_slice %17 {offsets = [0, 0], sizes = [8, 128], strides = [1, 1]} : vector<8x384xf32> to vector<8x128xf32>
    %20 = arith.addf %18, %19 : vector<8x128xf32>
    %21 = arith.negf %20 : vector<8x128xf32>
    %22 = math.exp %21 : vector<8x128xf32>
    %cst_18 = arith.constant 1.000000e+00 : f32
    %23 = vector.broadcast %cst_18 : f32 to vector<8x128xf32>
    %24 = arith.addf %23, %22 : vector<8x128xf32>
    %25 = arith.divf %23, %24 : vector<8x128xf32>
    %26 = vector.extract_strided_slice %13 {offsets = [0, 128], sizes = [8, 128], strides = [1, 1]} : vector<8x384xf32> to vector<8x128xf32>
    %27 = vector.extract_strided_slice %17 {offsets = [0, 128], sizes = [8, 128], strides = [1, 1]} : vector<8x384xf32> to vector<8x128xf32>
    %28 = arith.addf %26, %27 : vector<8x128xf32>
    %29 = arith.negf %28 : vector<8x128xf32>
    %30 = math.exp %29 : vector<8x128xf32>
    %cst_19 = arith.constant 1.000000e+00 : f32
    %31 = vector.broadcast %cst_19 : f32 to vector<8x128xf32>
    %32 = arith.addf %31, %30 : vector<8x128xf32>
    %33 = arith.divf %31, %32 : vector<8x128xf32>
    %34 = vector.extract_strided_slice %13 {offsets = [0, 256], sizes = [8, 128], strides = [1, 1]} : vector<8x384xf32> to vector<8x128xf32>
    %35 = vector.extract_strided_slice %17 {offsets = [0, 256], sizes = [8, 128], strides = [1, 1]} : vector<8x384xf32> to vector<8x128xf32>
    %36 = arith.mulf %25, %35 : vector<8x128xf32>
    %37 = arith.addf %34, %36 : vector<8x128xf32>
    %38 = math.tanh %37 : vector<8x128xf32>
    %cst_20 = arith.constant 1.000000e+00 : f32
    %39 = vector.broadcast %cst_20 : f32 to vector<8x128xf32>
    %40 = arith.subf %39, %33 : vector<8x128xf32>
    %41 = arith.mulf %40, %38 : vector<8x128xf32>
    %42 = arith.mulf %33, %11 : vector<8x128xf32>
    %43 = arith.addf %41, %42 : vector<8x128xf32>
    %c0_i32 = arith.constant 0 : i32
    %44 = vector.broadcast %c0_i32 : i32 to vector<8x1xi32>
    %45 = arith.cmpi eq, %10, %44 : vector<8x1xi32>
    %46 = arith.extui %45 : vector<8x1xi1> to vector<8x1xi32>
    %47 = arith.sitofp %46 : vector<8x1xi32> to vector<8x1xf32>
    %48 = vector.broadcast %47 : vector<8x1xf32> to vector<8x128xf32>
    %49 = arith.mulf %48, %43 : vector<8x128xf32>
    %cst_21 = arith.constant 1.000000e+00 : f32
    %50 = vector.broadcast %cst_21 : f32 to vector<8x1xf32>
    %51 = arith.subf %50, %47 : vector<8x1xf32>
    %52 = vector.broadcast %51 : vector<8x1xf32> to vector<8x128xf32>
    %53 = arith.mulf %52, %12 : vector<8x128xf32>
    %54 = arith.addf %49, %53 : vector<8x128xf32>
    %c8 = arith.constant 8 : index
    %c0_22 = arith.constant 0 : index
    %55 = vector.load %arg15[%c8, %c0_22] : memref<64x384xf32, #tpu.memory_space<vmem>>, vector<8x384xf32>
    %c0_23 = arith.constant 0 : index
    %c0_24 = arith.constant 0 : index
    %56 = vector.load %arg3[%c0_23, %c0_24] : memref<128x384xbf16, #tpu.memory_space<vmem>>, vector<128x384xbf16>
    %57 = arith.truncf %43 : vector<8x128xf32> to vector<8x128xbf16>
    %cst_25 = arith.constant dense<0.000000e+00> : vector<8x384xf32>
    %58 = tpu.matmul %57, %56, %cst_25 {dimension_numbers = #tpu.dot_dimension_numbers<[1], [0], [0], [1], [0, 0, 1, 1], [], []>} : vector<8x128xbf16>, vector<128x384xbf16>, vector<8x384xf32> -> vector<8x384xf32>
    %59 = arith.addf %58, %9 : vector<8x384xf32>
    %60 = vector.extract_strided_slice %55 {offsets = [0, 0], sizes = [8, 128], strides = [1, 1]} : vector<8x384xf32> to vector<8x128xf32>
    %61 = vector.extract_strided_slice %59 {offsets = [0, 0], sizes = [8, 128], strides = [1, 1]} : vector<8x384xf32> to vector<8x128xf32>
    %62 = arith.addf %60, %61 : vector<8x128xf32>
    %63 = arith.negf %62 : vector<8x128xf32>
    %64 = math.exp %63 : vector<8x128xf32>
    %cst_26 = arith.constant 1.000000e+00 : f32
    %65 = vector.broadcast %cst_26 : f32 to vector<8x128xf32>
    %66 = arith.addf %65, %64 : vector<8x128xf32>
    %67 = arith.divf %65, %66 : vector<8x128xf32>
    %68 = vector.extract_strided_slice %55 {offsets = [0, 128], sizes = [8, 128], strides = [1, 1]} : vector<8x384xf32> to vector<8x128xf32>
    %69 = vector.extract_strided_slice %59 {offsets = [0, 128], sizes = [8, 128], strides = [1, 1]} : vector<8x384xf32> to vector<8x128xf32>
    %70 = arith.addf %68, %69 : vector<8x128xf32>
    %71 = arith.negf %70 : vector<8x128xf32>
    %72 = math.exp %71 : vector<8x128xf32>
    %cst_27 = arith.constant 1.000000e+00 : f32
    %73 = vector.broadcast %cst_27 : f32 to vector<8x128xf32>
    %74 = arith.addf %73, %72 : vector<8x128xf32>
    %75 = arith.divf %73, %74 : vector<8x128xf32>
    %76 = vector.extract_strided_slice %55 {offsets = [0, 256], sizes = [8, 128], strides = [1, 1]} : vector<8x384xf32> to vector<8x128xf32>
    %77 = vector.extract_strided_slice %59 {offsets = [0, 256], sizes = [8, 128], strides = [1, 1]} : vector<8x384xf32> to vector<8x128xf32>
    %78 = arith.mulf %67, %77 : vector<8x128xf32>
    %79 = arith.addf %76, %78 : vector<8x128xf32>
    %80 = math.tanh %79 : vector<8x128xf32>
    %cst_28 = arith.constant 1.000000e+00 : f32
    %81 = vector.broadcast %cst_28 : f32 to vector<8x128xf32>
    %82 = arith.subf %81, %75 : vector<8x128xf32>
    %83 = arith.mulf %82, %80 : vector<8x128xf32>
    %84 = arith.mulf %75, %43 : vector<8x128xf32>
    %85 = arith.addf %83, %84 : vector<8x128xf32>
    %c1_i32 = arith.constant 1 : i32
    %86 = vector.broadcast %c1_i32 : i32 to vector<8x1xi32>
    %87 = arith.cmpi eq, %10, %86 : vector<8x1xi32>
    %88 = arith.extui %87 : vector<8x1xi1> to vector<8x1xi32>
    %89 = arith.sitofp %88 : vector<8x1xi32> to vector<8x1xf32>
    %90 = vector.broadcast %89 : vector<8x1xf32> to vector<8x128xf32>
    %91 = arith.mulf %90, %85 : vector<8x128xf32>
    %cst_29 = arith.constant 1.000000e+00 : f32
    %92 = vector.broadcast %cst_29 : f32 to vector<8x1xf32>
    %93 = arith.subf %92, %89 : vector<8x1xf32>
    %94 = vector.broadcast %93 : vector<8x1xf32> to vector<8x128xf32>
    %95 = arith.mulf %94, %54 : vector<8x128xf32>
    %96 = arith.addf %91, %95 : vector<8x128xf32>
    %c16 = arith.constant 16 : index
    %c0_30 = arith.constant 0 : index
    %97 = vector.load %arg15[%c16, %c0_30] : memref<64x384xf32, #tpu.memory_space<vmem>>, vector<8x384xf32>
    %c0_31 = arith.constant 0 : index
    %c0_32 = arith.constant 0 : index
    %98 = vector.load %arg3[%c0_31, %c0_32] : memref<128x384xbf16, #tpu.memory_space<vmem>>, vector<128x384xbf16>
    %99 = arith.truncf %85 : vector<8x128xf32> to vector<8x128xbf16>
    %cst_33 = arith.constant dense<0.000000e+00> : vector<8x384xf32>
    %100 = tpu.matmul %99, %98, %cst_33 {dimension_numbers = #tpu.dot_dimension_numbers<[1], [0], [0], [1], [0, 0, 1, 1], [], []>} : vector<8x128xbf16>, vector<128x384xbf16>, vector<8x384xf32> -> vector<8x384xf32>
    %101 = arith.addf %100, %9 : vector<8x384xf32>
    %102 = vector.extract_strided_slice %97 {offsets = [0, 0], sizes = [8, 128], strides = [1, 1]} : vector<8x384xf32> to vector<8x128xf32>
    %103 = vector.extract_strided_slice %101 {offsets = [0, 0], sizes = [8, 128], strides = [1, 1]} : vector<8x384xf32> to vector<8x128xf32>
    %104 = arith.addf %102, %103 : vector<8x128xf32>
    %105 = arith.negf %104 : vector<8x128xf32>
    %106 = math.exp %105 : vector<8x128xf32>
    %cst_34 = arith.constant 1.000000e+00 : f32
    %107 = vector.broadcast %cst_34 : f32 to vector<8x128xf32>
    %108 = arith.addf %107, %106 : vector<8x128xf32>
    %109 = arith.divf %107, %108 : vector<8x128xf32>
    %110 = vector.extract_strided_slice %97 {offsets = [0, 128], sizes = [8, 128], strides = [1, 1]} : vector<8x384xf32> to vector<8x128xf32>
    %111 = vector.extract_strided_slice %101 {offsets = [0, 128], sizes = [8, 128], strides = [1, 1]} : vector<8x384xf32> to vector<8x128xf32>
    %112 = arith.addf %110, %111 : vector<8x128xf32>
    %113 = arith.negf %112 : vector<8x128xf32>
    %114 = math.exp %113 : vector<8x128xf32>
    %cst_35 = arith.constant 1.000000e+00 : f32
    %115 = vector.broadcast %cst_35 : f32 to vector<8x128xf32>
    %116 = arith.addf %115, %114 : vector<8x128xf32>
    %117 = arith.divf %115, %116 : vector<8x128xf32>
    %118 = vector.extract_strided_slice %97 {offsets = [0, 256], sizes = [8, 128], strides = [1, 1]} : vector<8x384xf32> to vector<8x128xf32>
    %119 = vector.extract_strided_slice %101 {offsets = [0, 256], sizes = [8, 128], strides = [1, 1]} : vector<8x384xf32> to vector<8x128xf32>
    %120 = arith.mulf %109, %119 : vector<8x128xf32>
    %121 = arith.addf %118, %120 : vector<8x128xf32>
    %122 = math.tanh %121 : vector<8x128xf32>
    %cst_36 = arith.constant 1.000000e+00 : f32
    %123 = vector.broadcast %cst_36 : f32 to vector<8x128xf32>
    %124 = arith.subf %123, %117 : vector<8x128xf32>
    %125 = arith.mulf %124, %122 : vector<8x128xf32>
    %126 = arith.mulf %117, %85 : vector<8x128xf32>
    %127 = arith.addf %125, %126 : vector<8x128xf32>
    %c2_i32 = arith.constant 2 : i32
    %128 = vector.broadcast %c2_i32 : i32 to vector<8x1xi32>
    %129 = arith.cmpi eq, %10, %128 : vector<8x1xi32>
    %130 = arith.extui %129 : vector<8x1xi1> to vector<8x1xi32>
    %131 = arith.sitofp %130 : vector<8x1xi32> to vector<8x1xf32>
    %132 = vector.broadcast %131 : vector<8x1xf32> to vector<8x128xf32>
    %133 = arith.mulf %132, %127 : vector<8x128xf32>
    %cst_37 = arith.constant 1.000000e+00 : f32
    %134 = vector.broadcast %cst_37 : f32 to vector<8x1xf32>
    %135 = arith.subf %134, %131 : vector<8x1xf32>
    %136 = vector.broadcast %135 : vector<8x1xf32> to vector<8x128xf32>
    %137 = arith.mulf %136, %96 : vector<8x128xf32>
    %138 = arith.addf %133, %137 : vector<8x128xf32>
    %c24 = arith.constant 24 : index
    %c0_38 = arith.constant 0 : index
    %139 = vector.load %arg15[%c24, %c0_38] : memref<64x384xf32, #tpu.memory_space<vmem>>, vector<8x384xf32>
    %c0_39 = arith.constant 0 : index
    %c0_40 = arith.constant 0 : index
    %140 = vector.load %arg3[%c0_39, %c0_40] : memref<128x384xbf16, #tpu.memory_space<vmem>>, vector<128x384xbf16>
    %141 = arith.truncf %127 : vector<8x128xf32> to vector<8x128xbf16>
    %cst_41 = arith.constant dense<0.000000e+00> : vector<8x384xf32>
    %142 = tpu.matmul %141, %140, %cst_41 {dimension_numbers = #tpu.dot_dimension_numbers<[1], [0], [0], [1], [0, 0, 1, 1], [], []>} : vector<8x128xbf16>, vector<128x384xbf16>, vector<8x384xf32> -> vector<8x384xf32>
    %143 = arith.addf %142, %9 : vector<8x384xf32>
    %144 = vector.extract_strided_slice %139 {offsets = [0, 0], sizes = [8, 128], strides = [1, 1]} : vector<8x384xf32> to vector<8x128xf32>
    %145 = vector.extract_strided_slice %143 {offsets = [0, 0], sizes = [8, 128], strides = [1, 1]} : vector<8x384xf32> to vector<8x128xf32>
    %146 = arith.addf %144, %145 : vector<8x128xf32>
    %147 = arith.negf %146 : vector<8x128xf32>
    %148 = math.exp %147 : vector<8x128xf32>
    %cst_42 = arith.constant 1.000000e+00 : f32
    %149 = vector.broadcast %cst_42 : f32 to vector<8x128xf32>
    %150 = arith.addf %149, %148 : vector<8x128xf32>
    %151 = arith.divf %149, %150 : vector<8x128xf32>
    %152 = vector.extract_strided_slice %139 {offsets = [0, 128], sizes = [8, 128], strides = [1, 1]} : vector<8x384xf32> to vector<8x128xf32>
    %153 = vector.extract_strided_slice %143 {offsets = [0, 128], sizes = [8, 128], strides = [1, 1]} : vector<8x384xf32> to vector<8x128xf32>
    %154 = arith.addf %152, %153 : vector<8x128xf32>
    %155 = arith.negf %154 : vector<8x128xf32>
    %156 = math.exp %155 : vector<8x128xf32>
    %cst_43 = arith.constant 1.000000e+00 : f32
    %157 = vector.broadcast %cst_43 : f32 to vector<8x128xf32>
    %158 = arith.addf %157, %156 : vector<8x128xf32>
    %159 = arith.divf %157, %158 : vector<8x128xf32>
    %160 = vector.extract_strided_slice %139 {offsets = [0, 256], sizes = [8, 128], strides = [1, 1]} : vector<8x384xf32> to vector<8x128xf32>
    %161 = vector.extract_strided_slice %143 {offsets = [0, 256], sizes = [8, 128], strides = [1, 1]} : vector<8x384xf32> to vector<8x128xf32>
    %162 = arith.mulf %151, %161 : vector<8x128xf32>
    %163 = arith.addf %160, %162 : vector<8x128xf32>
    %164 = math.tanh %163 : vector<8x128xf32>
    %cst_44 = arith.constant 1.000000e+00 : f32
    %165 = vector.broadcast %cst_44 : f32 to vector<8x128xf32>
    %166 = arith.subf %165, %159 : vector<8x128xf32>
    %167 = arith.mulf %166, %164 : vector<8x128xf32>
    %168 = arith.mulf %159, %127 : vector<8x128xf32>
    %169 = arith.addf %167, %168 : vector<8x128xf32>
    %c3_i32 = arith.constant 3 : i32
    %170 = vector.broadcast %c3_i32 : i32 to vector<8x1xi32>
    %171 = arith.cmpi eq, %10, %170 : vector<8x1xi32>
    %172 = arith.extui %171 : vector<8x1xi1> to vector<8x1xi32>
    %173 = arith.sitofp %172 : vector<8x1xi32> to vector<8x1xf32>
    %174 = vector.broadcast %173 : vector<8x1xf32> to vector<8x128xf32>
    %175 = arith.mulf %174, %169 : vector<8x128xf32>
    %cst_45 = arith.constant 1.000000e+00 : f32
    %176 = vector.broadcast %cst_45 : f32 to vector<8x1xf32>
    %177 = arith.subf %176, %173 : vector<8x1xf32>
    %178 = vector.broadcast %177 : vector<8x1xf32> to vector<8x128xf32>
    %179 = arith.mulf %178, %138 : vector<8x128xf32>
    %180 = arith.addf %175, %179 : vector<8x128xf32>
    %c32 = arith.constant 32 : index
    %c0_46 = arith.constant 0 : index
    %181 = vector.load %arg15[%c32, %c0_46] : memref<64x384xf32, #tpu.memory_space<vmem>>, vector<8x384xf32>
    %c0_47 = arith.constant 0 : index
    %c0_48 = arith.constant 0 : index
    %182 = vector.load %arg3[%c0_47, %c0_48] : memref<128x384xbf16, #tpu.memory_space<vmem>>, vector<128x384xbf16>
    %183 = arith.truncf %169 : vector<8x128xf32> to vector<8x128xbf16>
    %cst_49 = arith.constant dense<0.000000e+00> : vector<8x384xf32>
    %184 = tpu.matmul %183, %182, %cst_49 {dimension_numbers = #tpu.dot_dimension_numbers<[1], [0], [0], [1], [0, 0, 1, 1], [], []>} : vector<8x128xbf16>, vector<128x384xbf16>, vector<8x384xf32> -> vector<8x384xf32>
    %185 = arith.addf %184, %9 : vector<8x384xf32>
    %186 = vector.extract_strided_slice %181 {offsets = [0, 0], sizes = [8, 128], strides = [1, 1]} : vector<8x384xf32> to vector<8x128xf32>
    %187 = vector.extract_strided_slice %185 {offsets = [0, 0], sizes = [8, 128], strides = [1, 1]} : vector<8x384xf32> to vector<8x128xf32>
    %188 = arith.addf %186, %187 : vector<8x128xf32>
    %189 = arith.negf %188 : vector<8x128xf32>
    %190 = math.exp %189 : vector<8x128xf32>
    %cst_50 = arith.constant 1.000000e+00 : f32
    %191 = vector.broadcast %cst_50 : f32 to vector<8x128xf32>
    %192 = arith.addf %191, %190 : vector<8x128xf32>
    %193 = arith.divf %191, %192 : vector<8x128xf32>
    %194 = vector.extract_strided_slice %181 {offsets = [0, 128], sizes = [8, 128], strides = [1, 1]} : vector<8x384xf32> to vector<8x128xf32>
    %195 = vector.extract_strided_slice %185 {offsets = [0, 128], sizes = [8, 128], strides = [1, 1]} : vector<8x384xf32> to vector<8x128xf32>
    %196 = arith.addf %194, %195 : vector<8x128xf32>
    %197 = arith.negf %196 : vector<8x128xf32>
    %198 = math.exp %197 : vector<8x128xf32>
    %cst_51 = arith.constant 1.000000e+00 : f32
    %199 = vector.broadcast %cst_51 : f32 to vector<8x128xf32>
    %200 = arith.addf %199, %198 : vector<8x128xf32>
    %201 = arith.divf %199, %200 : vector<8x128xf32>
    %202 = vector.extract_strided_slice %181 {offsets = [0, 256], sizes = [8, 128], strides = [1, 1]} : vector<8x384xf32> to vector<8x128xf32>
    %203 = vector.extract_strided_slice %185 {offsets = [0, 256], sizes = [8, 128], strides = [1, 1]} : vector<8x384xf32> to vector<8x128xf32>
    %204 = arith.mulf %193, %203 : vector<8x128xf32>
    %205 = arith.addf %202, %204 : vector<8x128xf32>
    %206 = math.tanh %205 : vector<8x128xf32>
    %cst_52 = arith.constant 1.000000e+00 : f32
    %207 = vector.broadcast %cst_52 : f32 to vector<8x128xf32>
    %208 = arith.subf %207, %201 : vector<8x128xf32>
    %209 = arith.mulf %208, %206 : vector<8x128xf32>
    %210 = arith.mulf %201, %169 : vector<8x128xf32>
    %211 = arith.addf %209, %210 : vector<8x128xf32>
    %c4_i32 = arith.constant 4 : i32
    %212 = vector.broadcast %c4_i32 : i32 to vector<8x1xi32>
    %213 = arith.cmpi eq, %10, %212 : vector<8x1xi32>
    %214 = arith.extui %213 : vector<8x1xi1> to vector<8x1xi32>
    %215 = arith.sitofp %214 : vector<8x1xi32> to vector<8x1xf32>
    %216 = vector.broadcast %215 : vector<8x1xf32> to vector<8x128xf32>
    %217 = arith.mulf %216, %211 : vector<8x128xf32>
    %cst_53 = arith.constant 1.000000e+00 : f32
    %218 = vector.broadcast %cst_53 : f32 to vector<8x1xf32>
    %219 = arith.subf %218, %215 : vector<8x1xf32>
    %220 = vector.broadcast %219 : vector<8x1xf32> to vector<8x128xf32>
    %221 = arith.mulf %220, %180 : vector<8x128xf32>
    %222 = arith.addf %217, %221 : vector<8x128xf32>
    %c40 = arith.constant 40 : index
    %c0_54 = arith.constant 0 : index
    %223 = vector.load %arg15[%c40, %c0_54] : memref<64x384xf32, #tpu.memory_space<vmem>>, vector<8x384xf32>
    %c0_55 = arith.constant 0 : index
    %c0_56 = arith.constant 0 : index
    %224 = vector.load %arg3[%c0_55, %c0_56] : memref<128x384xbf16, #tpu.memory_space<vmem>>, vector<128x384xbf16>
    %225 = arith.truncf %211 : vector<8x128xf32> to vector<8x128xbf16>
    %cst_57 = arith.constant dense<0.000000e+00> : vector<8x384xf32>
    %226 = tpu.matmul %225, %224, %cst_57 {dimension_numbers = #tpu.dot_dimension_numbers<[1], [0], [0], [1], [0, 0, 1, 1], [], []>} : vector<8x128xbf16>, vector<128x384xbf16>, vector<8x384xf32> -> vector<8x384xf32>
    %227 = arith.addf %226, %9 : vector<8x384xf32>
    %228 = vector.extract_strided_slice %223 {offsets = [0, 0], sizes = [8, 128], strides = [1, 1]} : vector<8x384xf32> to vector<8x128xf32>
    %229 = vector.extract_strided_slice %227 {offsets = [0, 0], sizes = [8, 128], strides = [1, 1]} : vector<8x384xf32> to vector<8x128xf32>
    %230 = arith.addf %228, %229 : vector<8x128xf32>
    %231 = arith.negf %230 : vector<8x128xf32>
    %232 = math.exp %231 : vector<8x128xf32>
    %cst_58 = arith.constant 1.000000e+00 : f32
    %233 = vector.broadcast %cst_58 : f32 to vector<8x128xf32>
    %234 = arith.addf %233, %232 : vector<8x128xf32>
    %235 = arith.divf %233, %234 : vector<8x128xf32>
    %236 = vector.extract_strided_slice %223 {offsets = [0, 128], sizes = [8, 128], strides = [1, 1]} : vector<8x384xf32> to vector<8x128xf32>
    %237 = vector.extract_strided_slice %227 {offsets = [0, 128], sizes = [8, 128], strides = [1, 1]} : vector<8x384xf32> to vector<8x128xf32>
    %238 = arith.addf %236, %237 : vector<8x128xf32>
    %239 = arith.negf %238 : vector<8x128xf32>
    %240 = math.exp %239 : vector<8x128xf32>
    %cst_59 = arith.constant 1.000000e+00 : f32
    %241 = vector.broadcast %cst_59 : f32 to vector<8x128xf32>
    %242 = arith.addf %241, %240 : vector<8x128xf32>
    %243 = arith.divf %241, %242 : vector<8x128xf32>
    %244 = vector.extract_strided_slice %223 {offsets = [0, 256], sizes = [8, 128], strides = [1, 1]} : vector<8x384xf32> to vector<8x128xf32>
    %245 = vector.extract_strided_slice %227 {offsets = [0, 256], sizes = [8, 128], strides = [1, 1]} : vector<8x384xf32> to vector<8x128xf32>
    %246 = arith.mulf %235, %245 : vector<8x128xf32>
    %247 = arith.addf %244, %246 : vector<8x128xf32>
    %248 = math.tanh %247 : vector<8x128xf32>
    %cst_60 = arith.constant 1.000000e+00 : f32
    %249 = vector.broadcast %cst_60 : f32 to vector<8x128xf32>
    %250 = arith.subf %249, %243 : vector<8x128xf32>
    %251 = arith.mulf %250, %248 : vector<8x128xf32>
    %252 = arith.mulf %243, %211 : vector<8x128xf32>
    %253 = arith.addf %251, %252 : vector<8x128xf32>
    %c5_i32 = arith.constant 5 : i32
    %254 = vector.broadcast %c5_i32 : i32 to vector<8x1xi32>
    %255 = arith.cmpi eq, %10, %254 : vector<8x1xi32>
    %256 = arith.extui %255 : vector<8x1xi1> to vector<8x1xi32>
    %257 = arith.sitofp %256 : vector<8x1xi32> to vector<8x1xf32>
    %258 = vector.broadcast %257 : vector<8x1xf32> to vector<8x128xf32>
    %259 = arith.mulf %258, %253 : vector<8x128xf32>
    %cst_61 = arith.constant 1.000000e+00 : f32
    %260 = vector.broadcast %cst_61 : f32 to vector<8x1xf32>
    %261 = arith.subf %260, %257 : vector<8x1xf32>
    %262 = vector.broadcast %261 : vector<8x1xf32> to vector<8x128xf32>
    %263 = arith.mulf %262, %222 : vector<8x128xf32>
    %264 = arith.addf %259, %263 : vector<8x128xf32>
    %c48 = arith.constant 48 : index
    %c0_62 = arith.constant 0 : index
    %265 = vector.load %arg15[%c48, %c0_62] : memref<64x384xf32, #tpu.memory_space<vmem>>, vector<8x384xf32>
    %c0_63 = arith.constant 0 : index
    %c0_64 = arith.constant 0 : index
    %266 = vector.load %arg3[%c0_63, %c0_64] : memref<128x384xbf16, #tpu.memory_space<vmem>>, vector<128x384xbf16>
    %267 = arith.truncf %253 : vector<8x128xf32> to vector<8x128xbf16>
    %cst_65 = arith.constant dense<0.000000e+00> : vector<8x384xf32>
    %268 = tpu.matmul %267, %266, %cst_65 {dimension_numbers = #tpu.dot_dimension_numbers<[1], [0], [0], [1], [0, 0, 1, 1], [], []>} : vector<8x128xbf16>, vector<128x384xbf16>, vector<8x384xf32> -> vector<8x384xf32>
    %269 = arith.addf %268, %9 : vector<8x384xf32>
    %270 = vector.extract_strided_slice %265 {offsets = [0, 0], sizes = [8, 128], strides = [1, 1]} : vector<8x384xf32> to vector<8x128xf32>
    %271 = vector.extract_strided_slice %269 {offsets = [0, 0], sizes = [8, 128], strides = [1, 1]} : vector<8x384xf32> to vector<8x128xf32>
    %272 = arith.addf %270, %271 : vector<8x128xf32>
    %273 = arith.negf %272 : vector<8x128xf32>
    %274 = math.exp %273 : vector<8x128xf32>
    %cst_66 = arith.constant 1.000000e+00 : f32
    %275 = vector.broadcast %cst_66 : f32 to vector<8x128xf32>
    %276 = arith.addf %275, %274 : vector<8x128xf32>
    %277 = arith.divf %275, %276 : vector<8x128xf32>
    %278 = vector.extract_strided_slice %265 {offsets = [0, 128], sizes = [8, 128], strides = [1, 1]} : vector<8x384xf32> to vector<8x128xf32>
    %279 = vector.extract_strided_slice %269 {offsets = [0, 128], sizes = [8, 128], strides = [1, 1]} : vector<8x384xf32> to vector<8x128xf32>
    %280 = arith.addf %278, %279 : vector<8x128xf32>
    %281 = arith.negf %280 : vector<8x128xf32>
    %282 = math.exp %281 : vector<8x128xf32>
    %cst_67 = arith.constant 1.000000e+00 : f32
    %283 = vector.broadcast %cst_67 : f32 to vector<8x128xf32>
    %284 = arith.addf %283, %282 : vector<8x128xf32>
    %285 = arith.divf %283, %284 : vector<8x128xf32>
    %286 = vector.extract_strided_slice %265 {offsets = [0, 256], sizes = [8, 128], strides = [1, 1]} : vector<8x384xf32> to vector<8x128xf32>
    %287 = vector.extract_strided_slice %269 {offsets = [0, 256], sizes = [8, 128], strides = [1, 1]} : vector<8x384xf32> to vector<8x128xf32>
    %288 = arith.mulf %277, %287 : vector<8x128xf32>
    %289 = arith.addf %286, %288 : vector<8x128xf32>
    %290 = math.tanh %289 : vector<8x128xf32>
    %cst_68 = arith.constant 1.000000e+00 : f32
    %291 = vector.broadcast %cst_68 : f32 to vector<8x128xf32>
    %292 = arith.subf %291, %285 : vector<8x128xf32>
    %293 = arith.mulf %292, %290 : vector<8x128xf32>
    %294 = arith.mulf %285, %253 : vector<8x128xf32>
    %295 = arith.addf %293, %294 : vector<8x128xf32>
    %c6_i32 = arith.constant 6 : i32
    %296 = vector.broadcast %c6_i32 : i32 to vector<8x1xi32>
    %297 = arith.cmpi eq, %10, %296 : vector<8x1xi32>
    %298 = arith.extui %297 : vector<8x1xi1> to vector<8x1xi32>
    %299 = arith.sitofp %298 : vector<8x1xi32> to vector<8x1xf32>
    %300 = vector.broadcast %299 : vector<8x1xf32> to vector<8x128xf32>
    %301 = arith.mulf %300, %295 : vector<8x128xf32>
    %cst_69 = arith.constant 1.000000e+00 : f32
    %302 = vector.broadcast %cst_69 : f32 to vector<8x1xf32>
    %303 = arith.subf %302, %299 : vector<8x1xf32>
    %304 = vector.broadcast %303 : vector<8x1xf32> to vector<8x128xf32>
    %305 = arith.mulf %304, %264 : vector<8x128xf32>
    %306 = arith.addf %301, %305 : vector<8x128xf32>
    %c56 = arith.constant 56 : index
    %c0_70 = arith.constant 0 : index
    %307 = vector.load %arg15[%c56, %c0_70] : memref<64x384xf32, #tpu.memory_space<vmem>>, vector<8x384xf32>
    %c0_71 = arith.constant 0 : index
    %c0_72 = arith.constant 0 : index
    %308 = vector.load %arg3[%c0_71, %c0_72] : memref<128x384xbf16, #tpu.memory_space<vmem>>, vector<128x384xbf16>
    %309 = arith.truncf %295 : vector<8x128xf32> to vector<8x128xbf16>
    %cst_73 = arith.constant dense<0.000000e+00> : vector<8x384xf32>
    %310 = tpu.matmul %309, %308, %cst_73 {dimension_numbers = #tpu.dot_dimension_numbers<[1], [0], [0], [1], [0, 0, 1, 1], [], []>} : vector<8x128xbf16>, vector<128x384xbf16>, vector<8x384xf32> -> vector<8x384xf32>
    %311 = arith.addf %310, %9 : vector<8x384xf32>
    %312 = vector.extract_strided_slice %307 {offsets = [0, 0], sizes = [8, 128], strides = [1, 1]} : vector<8x384xf32> to vector<8x128xf32>
    %313 = vector.extract_strided_slice %311 {offsets = [0, 0], sizes = [8, 128], strides = [1, 1]} : vector<8x384xf32> to vector<8x128xf32>
    %314 = arith.addf %312, %313 : vector<8x128xf32>
    %315 = arith.negf %314 : vector<8x128xf32>
    %316 = math.exp %315 : vector<8x128xf32>
    %cst_74 = arith.constant 1.000000e+00 : f32
    %317 = vector.broadcast %cst_74 : f32 to vector<8x128xf32>
    %318 = arith.addf %317, %316 : vector<8x128xf32>
    %319 = arith.divf %317, %318 : vector<8x128xf32>
    %320 = vector.extract_strided_slice %307 {offsets = [0, 128], sizes = [8, 128], strides = [1, 1]} : vector<8x384xf32> to vector<8x128xf32>
    %321 = vector.extract_strided_slice %311 {offsets = [0, 128], sizes = [8, 128], strides = [1, 1]} : vector<8x384xf32> to vector<8x128xf32>
    %322 = arith.addf %320, %321 : vector<8x128xf32>
    %323 = arith.negf %322 : vector<8x128xf32>
    %324 = math.exp %323 : vector<8x128xf32>
    %cst_75 = arith.constant 1.000000e+00 : f32
    %325 = vector.broadcast %cst_75 : f32 to vector<8x128xf32>
    %326 = arith.addf %325, %324 : vector<8x128xf32>
    %327 = arith.divf %325, %326 : vector<8x128xf32>
    %328 = vector.extract_strided_slice %307 {offsets = [0, 256], sizes = [8, 128], strides = [1, 1]} : vector<8x384xf32> to vector<8x128xf32>
    %329 = vector.extract_strided_slice %311 {offsets = [0, 256], sizes = [8, 128], strides = [1, 1]} : vector<8x384xf32> to vector<8x128xf32>
    %330 = arith.mulf %319, %329 : vector<8x128xf32>
    %331 = arith.addf %328, %330 : vector<8x128xf32>
    %332 = math.tanh %331 : vector<8x128xf32>
    %cst_76 = arith.constant 1.000000e+00 : f32
    %333 = vector.broadcast %cst_76 : f32 to vector<8x128xf32>
    %334 = arith.subf %333, %327 : vector<8x128xf32>
    %335 = arith.mulf %334, %332 : vector<8x128xf32>
    %336 = arith.mulf %327, %295 : vector<8x128xf32>
    %337 = arith.addf %335, %336 : vector<8x128xf32>
    %c7_i32 = arith.constant 7 : i32
    %338 = vector.broadcast %c7_i32 : i32 to vector<8x1xi32>
    %339 = arith.cmpi eq, %10, %338 : vector<8x1xi32>
    %340 = arith.extui %339 : vector<8x1xi1> to vector<8x1xi32>
    %341 = arith.sitofp %340 : vector<8x1xi32> to vector<8x1xf32>
    %342 = vector.broadcast %341 : vector<8x1xf32> to vector<8x128xf32>
    %343 = arith.mulf %342, %337 : vector<8x128xf32>
    %cst_77 = arith.constant 1.000000e+00 : f32
    %344 = vector.broadcast %cst_77 : f32 to vector<8x1xf32>
    %345 = arith.subf %344, %341 : vector<8x1xf32>
    %346 = vector.broadcast %345 : vector<8x1xf32> to vector<8x128xf32>
    %347 = arith.mulf %346, %306 : vector<8x128xf32>
    %348 = arith.addf %343, %347 : vector<8x128xf32>
    %c0_78 = arith.constant 0 : index
    %c0_79 = arith.constant 0 : index
    %349 = vector.load %arg6[%c0_78, %c0_79] : memref<128x128xbf16, #tpu.memory_space<vmem>>, vector<128x128xbf16>
    %350 = arith.truncf %348 : vector<8x128xf32> to vector<8x128xbf16>
    %cst_80 = arith.constant dense<0.000000e+00> : vector<8x128xf32>
    %351 = tpu.matmul %350, %349, %cst_80 {dimension_numbers = #tpu.dot_dimension_numbers<[1], [0], [0], [1], [0, 0, 1, 1], [], []>} : vector<8x128xbf16>, vector<128x128xbf16>, vector<8x128xf32> -> vector<8x128xf32>
    %c0_81 = arith.constant 0 : index
    %c0_82 = arith.constant 0 : index
    %352 = vector.load %arg7[%c0_81, %c0_82] : memref<1x128xf32, #tpu.memory_space<vmem>>, vector<1x128xf32>
    %353 = vector.broadcast %352 : vector<1x128xf32> to vector<8x128xf32>
    %354 = arith.addf %351, %353 : vector<8x128xf32>
    tpu.wait_dma2 semaphore(%arg17 : memref<!tpu.dma_semaphore, #tpu.memory_space<semaphore_mem>>) src(%arg12 : memref<56x64xbf16, #tpu.memory_space<any>>) dst(%arg14 : memref<56x64xbf16, #tpu.memory_space<vmem>>)
    %c0_83 = arith.constant 0 : index
    %c0_84 = arith.constant 0 : index
    %355 = vector.load %arg14[%c0_83, %c0_84] : memref<56x64xbf16, #tpu.memory_space<vmem>>, vector<56x64xbf16>
    %c0_85 = arith.constant 0 : index
    %c0_86 = arith.constant 0 : index
    %356 = vector.load %arg8[%c0_85, %c0_86] : memref<64x384xbf16, #tpu.memory_space<vmem>>, vector<64x384xbf16>
    %cst_87 = arith.constant dense<0.000000e+00> : vector<56x384xf32>
    %357 = tpu.matmul %355, %356, %cst_87 {dimension_numbers = #tpu.dot_dimension_numbers<[1], [0], [0], [1], [0, 0, 1, 1], [], []>} : vector<56x64xbf16>, vector<64x384xbf16>, vector<56x384xf32> -> vector<56x384xf32>
    %c0_88 = arith.constant 0 : index
    %c0_89 = arith.constant 0 : index
    %358 = vector.load %arg10[%c0_88, %c0_89] : memref<1x384xf32, #tpu.memory_space<vmem>>, vector<1x384xf32>
    %359 = vector.broadcast %358 : vector<1x384xf32> to vector<56x384xf32>
    %360 = arith.addf %357, %359 : vector<56x384xf32>
    %c0_90 = arith.constant 0 : index
    %c0_91 = arith.constant 0 : index
    %361 = vector.load %arg16[%c0_90, %c0_91] : memref<56x384xf32, #tpu.memory_space<vmem>>, vector<56x384xf32>
    tpu.vector_store %arg16[%c0_90, %c0_91], %360 {strides = array<i32>} : memref<56x384xf32, #tpu.memory_space<vmem>>, vector<56x384xf32>,
    %c0_92 = arith.constant 0 : index
    %c0_93 = arith.constant 0 : index
    %362 = vector.load %arg11[%c0_92, %c0_93] : memref<1x384xf32, #tpu.memory_space<vmem>>, vector<1x384xf32>
    %363 = vector.shape_cast %362 : vector<1x384xf32> to vector<1x384xf32>
    %364 = vector.broadcast %363 : vector<1x384xf32> to vector<8x384xf32>
    %c0_94 = arith.constant 0 : index
    %c0_95 = arith.constant 0 : index
    %365 = vector.load %arg16[%c0_94, %c0_95] : memref<56x384xf32, #tpu.memory_space<vmem>>, vector<8x384xf32>
    %c0_96 = arith.constant 0 : index
    %c0_97 = arith.constant 0 : index
    %366 = vector.load %arg9[%c0_96, %c0_97] : memref<128x384xbf16, #tpu.memory_space<vmem>>, vector<128x384xbf16>
    %367 = arith.truncf %354 : vector<8x128xf32> to vector<8x128xbf16>
    %cst_98 = arith.constant dense<0.000000e+00> : vector<8x384xf32>
    %368 = tpu.matmul %367, %366, %cst_98 {dimension_numbers = #tpu.dot_dimension_numbers<[1], [0], [0], [1], [0, 0, 1, 1], [], []>} : vector<8x128xbf16>, vector<128x384xbf16>, vector<8x384xf32> -> vector<8x384xf32>
    %369 = arith.addf %368, %364 : vector<8x384xf32>
    %370 = vector.extract_strided_slice %365 {offsets = [0, 0], sizes = [8, 128], strides = [1, 1]} : vector<8x384xf32> to vector<8x128xf32>
    %371 = vector.extract_strided_slice %369 {offsets = [0, 0], sizes = [8, 128], strides = [1, 1]} : vector<8x384xf32> to vector<8x128xf32>
    %372 = arith.addf %370, %371 : vector<8x128xf32>
    %373 = arith.negf %372 : vector<8x128xf32>
    %374 = math.exp %373 : vector<8x128xf32>
    %cst_99 = arith.constant 1.000000e+00 : f32
    %375 = vector.broadcast %cst_99 : f32 to vector<8x128xf32>
    %376 = arith.addf %375, %374 : vector<8x128xf32>
    %377 = arith.divf %375, %376 : vector<8x128xf32>
    %378 = vector.extract_strided_slice %365 {offsets = [0, 128], sizes = [8, 128], strides = [1, 1]} : vector<8x384xf32> to vector<8x128xf32>
    %379 = vector.extract_strided_slice %369 {offsets = [0, 128], sizes = [8, 128], strides = [1, 1]} : vector<8x384xf32> to vector<8x128xf32>
    %380 = arith.addf %378, %379 : vector<8x128xf32>
    %381 = arith.negf %380 : vector<8x128xf32>
    %382 = math.exp %381 : vector<8x128xf32>
    %cst_100 = arith.constant 1.000000e+00 : f32
    %383 = vector.broadcast %cst_100 : f32 to vector<8x128xf32>
    %384 = arith.addf %383, %382 : vector<8x128xf32>
    %385 = arith.divf %383, %384 : vector<8x128xf32>
    %386 = vector.extract_strided_slice %365 {offsets = [0, 256], sizes = [8, 128], strides = [1, 1]} : vector<8x384xf32> to vector<8x128xf32>
    %387 = vector.extract_strided_slice %369 {offsets = [0, 256], sizes = [8, 128], strides = [1, 1]} : vector<8x384xf32> to vector<8x128xf32>
    %388 = arith.mulf %377, %387 : vector<8x128xf32>
    %389 = arith.addf %386, %388 : vector<8x128xf32>
    %390 = math.tanh %389 : vector<8x128xf32>
    %cst_101 = arith.constant 1.000000e+00 : f32
    %391 = vector.broadcast %cst_101 : f32 to vector<8x128xf32>
    %392 = arith.subf %391, %385 : vector<8x128xf32>
    %393 = arith.mulf %392, %390 : vector<8x128xf32>
    %394 = arith.mulf %385, %354 : vector<8x128xf32>
    %395 = arith.addf %393, %394 : vector<8x128xf32>
    %c0_102 = arith.constant 0 : index
    %c0_103 = arith.constant 0 : index
    %396 = vector.load %arg13[%c0_102, %c0_103] : memref<56x128xf32, #tpu.memory_space<vmem>>, vector<8x128xf32>
    tpu.vector_store %arg13[%c0_102, %c0_103], %395 {strides = array<i32>} : memref<56x128xf32, #tpu.memory_space<vmem>>, vector<8x128xf32>,
    %c8_104 = arith.constant 8 : index
    %c0_105 = arith.constant 0 : index
    %397 = vector.load %arg16[%c8_104, %c0_105] : memref<56x384xf32, #tpu.memory_space<vmem>>, vector<8x384xf32>
    %c0_106 = arith.constant 0 : index
    %c0_107 = arith.constant 0 : index
    %398 = vector.load %arg9[%c0_106, %c0_107] : memref<128x384xbf16, #tpu.memory_space<vmem>>, vector<128x384xbf16>
    %399 = arith.truncf %395 : vector<8x128xf32> to vector<8x128xbf16>
    %cst_108 = arith.constant dense<0.000000e+00> : vector<8x384xf32>
    %400 = tpu.matmul %399, %398, %cst_108 {dimension_numbers = #tpu.dot_dimension_numbers<[1], [0], [0], [1], [0, 0, 1, 1], [], []>} : vector<8x128xbf16>, vector<128x384xbf16>, vector<8x384xf32> -> vector<8x384xf32>
    %401 = arith.addf %400, %364 : vector<8x384xf32>
    %402 = vector.extract_strided_slice %397 {offsets = [0, 0], sizes = [8, 128], strides = [1, 1]} : vector<8x384xf32> to vector<8x128xf32>
    %403 = vector.extract_strided_slice %401 {offsets = [0, 0], sizes = [8, 128], strides = [1, 1]} : vector<8x384xf32> to vector<8x128xf32>
    %404 = arith.addf %402, %403 : vector<8x128xf32>
    %405 = arith.negf %404 : vector<8x128xf32>
    %406 = math.exp %405 : vector<8x128xf32>
    %cst_109 = arith.constant 1.000000e+00 : f32
    %407 = vector.broadcast %cst_109 : f32 to vector<8x128xf32>
    %408 = arith.addf %407, %406 : vector<8x128xf32>
    %409 = arith.divf %407, %408 : vector<8x128xf32>
    %410 = vector.extract_strided_slice %397 {offsets = [0, 128], sizes = [8, 128], strides = [1, 1]} : vector<8x384xf32> to vector<8x128xf32>
    %411 = vector.extract_strided_slice %401 {offsets = [0, 128], sizes = [8, 128], strides = [1, 1]} : vector<8x384xf32> to vector<8x128xf32>
    %412 = arith.addf %410, %411 : vector<8x128xf32>
    %413 = arith.negf %412 : vector<8x128xf32>
    %414 = math.exp %413 : vector<8x128xf32>
    %cst_110 = arith.constant 1.000000e+00 : f32
    %415 = vector.broadcast %cst_110 : f32 to vector<8x128xf32>
    %416 = arith.addf %415, %414 : vector<8x128xf32>
    %417 = arith.divf %415, %416 : vector<8x128xf32>
    %418 = vector.extract_strided_slice %397 {offsets = [0, 256], sizes = [8, 128], strides = [1, 1]} : vector<8x384xf32> to vector<8x128xf32>
    %419 = vector.extract_strided_slice %401 {offsets = [0, 256], sizes = [8, 128], strides = [1, 1]} : vector<8x384xf32> to vector<8x128xf32>
    %420 = arith.mulf %409, %419 : vector<8x128xf32>
    %421 = arith.addf %418, %420 : vector<8x128xf32>
    %422 = math.tanh %421 : vector<8x128xf32>
    %cst_111 = arith.constant 1.000000e+00 : f32
    %423 = vector.broadcast %cst_111 : f32 to vector<8x128xf32>
    %424 = arith.subf %423, %417 : vector<8x128xf32>
    %425 = arith.mulf %424, %422 : vector<8x128xf32>
    %426 = arith.mulf %417, %395 : vector<8x128xf32>
    %427 = arith.addf %425, %426 : vector<8x128xf32>
    %c8_112 = arith.constant 8 : index
    %c0_113 = arith.constant 0 : index
    %428 = vector.load %arg13[%c8_112, %c0_113] : memref<56x128xf32, #tpu.memory_space<vmem>>, vector<8x128xf32>
    tpu.vector_store %arg13[%c8_112, %c0_113], %427 {strides = array<i32>} : memref<56x128xf32, #tpu.memory_space<vmem>>, vector<8x128xf32>,
    %c16_114 = arith.constant 16 : index
    %c0_115 = arith.constant 0 : index
    %429 = vector.load %arg16[%c16_114, %c0_115] : memref<56x384xf32, #tpu.memory_space<vmem>>, vector<8x384xf32>
    %c0_116 = arith.constant 0 : index
    %c0_117 = arith.constant 0 : index
    %430 = vector.load %arg9[%c0_116, %c0_117] : memref<128x384xbf16, #tpu.memory_space<vmem>>, vector<128x384xbf16>
    %431 = arith.truncf %427 : vector<8x128xf32> to vector<8x128xbf16>
    %cst_118 = arith.constant dense<0.000000e+00> : vector<8x384xf32>
    %432 = tpu.matmul %431, %430, %cst_118 {dimension_numbers = #tpu.dot_dimension_numbers<[1], [0], [0], [1], [0, 0, 1, 1], [], []>} : vector<8x128xbf16>, vector<128x384xbf16>, vector<8x384xf32> -> vector<8x384xf32>
    %433 = arith.addf %432, %364 : vector<8x384xf32>
    %434 = vector.extract_strided_slice %429 {offsets = [0, 0], sizes = [8, 128], strides = [1, 1]} : vector<8x384xf32> to vector<8x128xf32>
    %435 = vector.extract_strided_slice %433 {offsets = [0, 0], sizes = [8, 128], strides = [1, 1]} : vector<8x384xf32> to vector<8x128xf32>
    %436 = arith.addf %434, %435 : vector<8x128xf32>
    %437 = arith.negf %436 : vector<8x128xf32>
    %438 = math.exp %437 : vector<8x128xf32>
    %cst_119 = arith.constant 1.000000e+00 : f32
    %439 = vector.broadcast %cst_119 : f32 to vector<8x128xf32>
    %440 = arith.addf %439, %438 : vector<8x128xf32>
    %441 = arith.divf %439, %440 : vector<8x128xf32>
    %442 = vector.extract_strided_slice %429 {offsets = [0, 128], sizes = [8, 128], strides = [1, 1]} : vector<8x384xf32> to vector<8x128xf32>
    %443 = vector.extract_strided_slice %433 {offsets = [0, 128], sizes = [8, 128], strides = [1, 1]} : vector<8x384xf32> to vector<8x128xf32>
    %444 = arith.addf %442, %443 : vector<8x128xf32>
    %445 = arith.negf %444 : vector<8x128xf32>
    %446 = math.exp %445 : vector<8x128xf32>
    %cst_120 = arith.constant 1.000000e+00 : f32
    %447 = vector.broadcast %cst_120 : f32 to vector<8x128xf32>
    %448 = arith.addf %447, %446 : vector<8x128xf32>
    %449 = arith.divf %447, %448 : vector<8x128xf32>
    %450 = vector.extract_strided_slice %429 {offsets = [0, 256], sizes = [8, 128], strides = [1, 1]} : vector<8x384xf32> to vector<8x128xf32>
    %451 = vector.extract_strided_slice %433 {offsets = [0, 256], sizes = [8, 128], strides = [1, 1]} : vector<8x384xf32> to vector<8x128xf32>
    %452 = arith.mulf %441, %451 : vector<8x128xf32>
    %453 = arith.addf %450, %452 : vector<8x128xf32>
    %454 = math.tanh %453 : vector<8x128xf32>
    %cst_121 = arith.constant 1.000000e+00 : f32
    %455 = vector.broadcast %cst_121 : f32 to vector<8x128xf32>
    %456 = arith.subf %455, %449 : vector<8x128xf32>
    %457 = arith.mulf %456, %454 : vector<8x128xf32>
    %458 = arith.mulf %449, %427 : vector<8x128xf32>
    %459 = arith.addf %457, %458 : vector<8x128xf32>
    %c16_122 = arith.constant 16 : index
    %c0_123 = arith.constant 0 : index
    %460 = vector.load %arg13[%c16_122, %c0_123] : memref<56x128xf32, #tpu.memory_space<vmem>>, vector<8x128xf32>
    tpu.vector_store %arg13[%c16_122, %c0_123], %459 {strides = array<i32>} : memref<56x128xf32, #tpu.memory_space<vmem>>, vector<8x128xf32>,
    %c24_124 = arith.constant 24 : index
    %c0_125 = arith.constant 0 : index
    %461 = vector.load %arg16[%c24_124, %c0_125] : memref<56x384xf32, #tpu.memory_space<vmem>>, vector<8x384xf32>
    %c0_126 = arith.constant 0 : index
    %c0_127 = arith.constant 0 : index
    %462 = vector.load %arg9[%c0_126, %c0_127] : memref<128x384xbf16, #tpu.memory_space<vmem>>, vector<128x384xbf16>
    %463 = arith.truncf %459 : vector<8x128xf32> to vector<8x128xbf16>
    %cst_128 = arith.constant dense<0.000000e+00> : vector<8x384xf32>
    %464 = tpu.matmul %463, %462, %cst_128 {dimension_numbers = #tpu.dot_dimension_numbers<[1], [0], [0], [1], [0, 0, 1, 1], [], []>} : vector<8x128xbf16>, vector<128x384xbf16>, vector<8x384xf32> -> vector<8x384xf32>
    %465 = arith.addf %464, %364 : vector<8x384xf32>
    %466 = vector.extract_strided_slice %461 {offsets = [0, 0], sizes = [8, 128], strides = [1, 1]} : vector<8x384xf32> to vector<8x128xf32>
    %467 = vector.extract_strided_slice %465 {offsets = [0, 0], sizes = [8, 128], strides = [1, 1]} : vector<8x384xf32> to vector<8x128xf32>
    %468 = arith.addf %466, %467 : vector<8x128xf32>
    %469 = arith.negf %468 : vector<8x128xf32>
    %470 = math.exp %469 : vector<8x128xf32>
    %cst_129 = arith.constant 1.000000e+00 : f32
    %471 = vector.broadcast %cst_129 : f32 to vector<8x128xf32>
    %472 = arith.addf %471, %470 : vector<8x128xf32>
    %473 = arith.divf %471, %472 : vector<8x128xf32>
    %474 = vector.extract_strided_slice %461 {offsets = [0, 128], sizes = [8, 128], strides = [1, 1]} : vector<8x384xf32> to vector<8x128xf32>
    %475 = vector.extract_strided_slice %465 {offsets = [0, 128], sizes = [8, 128], strides = [1, 1]} : vector<8x384xf32> to vector<8x128xf32>
    %476 = arith.addf %474, %475 : vector<8x128xf32>
    %477 = arith.negf %476 : vector<8x128xf32>
    %478 = math.exp %477 : vector<8x128xf32>
    %cst_130 = arith.constant 1.000000e+00 : f32
    %479 = vector.broadcast %cst_130 : f32 to vector<8x128xf32>
    %480 = arith.addf %479, %478 : vector<8x128xf32>
    %481 = arith.divf %479, %480 : vector<8x128xf32>
    %482 = vector.extract_strided_slice %461 {offsets = [0, 256], sizes = [8, 128], strides = [1, 1]} : vector<8x384xf32> to vector<8x128xf32>
    %483 = vector.extract_strided_slice %465 {offsets = [0, 256], sizes = [8, 128], strides = [1, 1]} : vector<8x384xf32> to vector<8x128xf32>
    %484 = arith.mulf %473, %483 : vector<8x128xf32>
    %485 = arith.addf %482, %484 : vector<8x128xf32>
    %486 = math.tanh %485 : vector<8x128xf32>
    %cst_131 = arith.constant 1.000000e+00 : f32
    %487 = vector.broadcast %cst_131 : f32 to vector<8x128xf32>
    %488 = arith.subf %487, %481 : vector<8x128xf32>
    %489 = arith.mulf %488, %486 : vector<8x128xf32>
    %490 = arith.mulf %481, %459 : vector<8x128xf32>
    %491 = arith.addf %489, %490 : vector<8x128xf32>
    %c24_132 = arith.constant 24 : index
    %c0_133 = arith.constant 0 : index
    %492 = vector.load %arg13[%c24_132, %c0_133] : memref<56x128xf32, #tpu.memory_space<vmem>>, vector<8x128xf32>
    tpu.vector_store %arg13[%c24_132, %c0_133], %491 {strides = array<i32>} : memref<56x128xf32, #tpu.memory_space<vmem>>, vector<8x128xf32>,
    %c32_134 = arith.constant 32 : index
    %c0_135 = arith.constant 0 : index
    %493 = vector.load %arg16[%c32_134, %c0_135] : memref<56x384xf32, #tpu.memory_space<vmem>>, vector<8x384xf32>
    %c0_136 = arith.constant 0 : index
    %c0_137 = arith.constant 0 : index
    %494 = vector.load %arg9[%c0_136, %c0_137] : memref<128x384xbf16, #tpu.memory_space<vmem>>, vector<128x384xbf16>
    %495 = arith.truncf %491 : vector<8x128xf32> to vector<8x128xbf16>
    %cst_138 = arith.constant dense<0.000000e+00> : vector<8x384xf32>
    %496 = tpu.matmul %495, %494, %cst_138 {dimension_numbers = #tpu.dot_dimension_numbers<[1], [0], [0], [1], [0, 0, 1, 1], [], []>} : vector<8x128xbf16>, vector<128x384xbf16>, vector<8x384xf32> -> vector<8x384xf32>
    %497 = arith.addf %496, %364 : vector<8x384xf32>
    %498 = vector.extract_strided_slice %493 {offsets = [0, 0], sizes = [8, 128], strides = [1, 1]} : vector<8x384xf32> to vector<8x128xf32>
    %499 = vector.extract_strided_slice %497 {offsets = [0, 0], sizes = [8, 128], strides = [1, 1]} : vector<8x384xf32> to vector<8x128xf32>
    %500 = arith.addf %498, %499 : vector<8x128xf32>
    %501 = arith.negf %500 : vector<8x128xf32>
    %502 = math.exp %501 : vector<8x128xf32>
    %cst_139 = arith.constant 1.000000e+00 : f32
    %503 = vector.broadcast %cst_139 : f32 to vector<8x128xf32>
    %504 = arith.addf %503, %502 : vector<8x128xf32>
    %505 = arith.divf %503, %504 : vector<8x128xf32>
    %506 = vector.extract_strided_slice %493 {offsets = [0, 128], sizes = [8, 128], strides = [1, 1]} : vector<8x384xf32> to vector<8x128xf32>
    %507 = vector.extract_strided_slice %497 {offsets = [0, 128], sizes = [8, 128], strides = [1, 1]} : vector<8x384xf32> to vector<8x128xf32>
    %508 = arith.addf %506, %507 : vector<8x128xf32>
    %509 = arith.negf %508 : vector<8x128xf32>
    %510 = math.exp %509 : vector<8x128xf32>
    %cst_140 = arith.constant 1.000000e+00 : f32
    %511 = vector.broadcast %cst_140 : f32 to vector<8x128xf32>
    %512 = arith.addf %511, %510 : vector<8x128xf32>
    %513 = arith.divf %511, %512 : vector<8x128xf32>
    %514 = vector.extract_strided_slice %493 {offsets = [0, 256], sizes = [8, 128], strides = [1, 1]} : vector<8x384xf32> to vector<8x128xf32>
    %515 = vector.extract_strided_slice %497 {offsets = [0, 256], sizes = [8, 128], strides = [1, 1]} : vector<8x384xf32> to vector<8x128xf32>
    %516 = arith.mulf %505, %515 : vector<8x128xf32>
    %517 = arith.addf %514, %516 : vector<8x128xf32>
    %518 = math.tanh %517 : vector<8x128xf32>
    %cst_141 = arith.constant 1.000000e+00 : f32
    %519 = vector.broadcast %cst_141 : f32 to vector<8x128xf32>
    %520 = arith.subf %519, %513 : vector<8x128xf32>
    %521 = arith.mulf %520, %518 : vector<8x128xf32>
    %522 = arith.mulf %513, %491 : vector<8x128xf32>
    %523 = arith.addf %521, %522 : vector<8x128xf32>
    %c32_142 = arith.constant 32 : index
    %c0_143 = arith.constant 0 : index
    %524 = vector.load %arg13[%c32_142, %c0_143] : memref<56x128xf32, #tpu.memory_space<vmem>>, vector<8x128xf32>
    tpu.vector_store %arg13[%c32_142, %c0_143], %523 {strides = array<i32>} : memref<56x128xf32, #tpu.memory_space<vmem>>, vector<8x128xf32>,
    %c40_144 = arith.constant 40 : index
    %c0_145 = arith.constant 0 : index
    %525 = vector.load %arg16[%c40_144, %c0_145] : memref<56x384xf32, #tpu.memory_space<vmem>>, vector<8x384xf32>
    %c0_146 = arith.constant 0 : index
    %c0_147 = arith.constant 0 : index
    %526 = vector.load %arg9[%c0_146, %c0_147] : memref<128x384xbf16, #tpu.memory_space<vmem>>, vector<128x384xbf16>
    %527 = arith.truncf %523 : vector<8x128xf32> to vector<8x128xbf16>
    %cst_148 = arith.constant dense<0.000000e+00> : vector<8x384xf32>
    %528 = tpu.matmul %527, %526, %cst_148 {dimension_numbers = #tpu.dot_dimension_numbers<[1], [0], [0], [1], [0, 0, 1, 1], [], []>} : vector<8x128xbf16>, vector<128x384xbf16>, vector<8x384xf32> -> vector<8x384xf32>
    %529 = arith.addf %528, %364 : vector<8x384xf32>
    %530 = vector.extract_strided_slice %525 {offsets = [0, 0], sizes = [8, 128], strides = [1, 1]} : vector<8x384xf32> to vector<8x128xf32>
    %531 = vector.extract_strided_slice %529 {offsets = [0, 0], sizes = [8, 128], strides = [1, 1]} : vector<8x384xf32> to vector<8x128xf32>
    %532 = arith.addf %530, %531 : vector<8x128xf32>
    %533 = arith.negf %532 : vector<8x128xf32>
    %534 = math.exp %533 : vector<8x128xf32>
    %cst_149 = arith.constant 1.000000e+00 : f32
    %535 = vector.broadcast %cst_149 : f32 to vector<8x128xf32>
    %536 = arith.addf %535, %534 : vector<8x128xf32>
    %537 = arith.divf %535, %536 : vector<8x128xf32>
    %538 = vector.extract_strided_slice %525 {offsets = [0, 128], sizes = [8, 128], strides = [1, 1]} : vector<8x384xf32> to vector<8x128xf32>
    %539 = vector.extract_strided_slice %529 {offsets = [0, 128], sizes = [8, 128], strides = [1, 1]} : vector<8x384xf32> to vector<8x128xf32>
    %540 = arith.addf %538, %539 : vector<8x128xf32>
    %541 = arith.negf %540 : vector<8x128xf32>
    %542 = math.exp %541 : vector<8x128xf32>
    %cst_150 = arith.constant 1.000000e+00 : f32
    %543 = vector.broadcast %cst_150 : f32 to vector<8x128xf32>
    %544 = arith.addf %543, %542 : vector<8x128xf32>
    %545 = arith.divf %543, %544 : vector<8x128xf32>
    %546 = vector.extract_strided_slice %525 {offsets = [0, 256], sizes = [8, 128], strides = [1, 1]} : vector<8x384xf32> to vector<8x128xf32>
    %547 = vector.extract_strided_slice %529 {offsets = [0, 256], sizes = [8, 128], strides = [1, 1]} : vector<8x384xf32> to vector<8x128xf32>
    %548 = arith.mulf %537, %547 : vector<8x128xf32>
    %549 = arith.addf %546, %548 : vector<8x128xf32>
    %550 = math.tanh %549 : vector<8x128xf32>
    %cst_151 = arith.constant 1.000000e+00 : f32
    %551 = vector.broadcast %cst_151 : f32 to vector<8x128xf32>
    %552 = arith.subf %551, %545 : vector<8x128xf32>
    %553 = arith.mulf %552, %550 : vector<8x128xf32>
    %554 = arith.mulf %545, %523 : vector<8x128xf32>
    %555 = arith.addf %553, %554 : vector<8x128xf32>
    %c40_152 = arith.constant 40 : index
    %c0_153 = arith.constant 0 : index
    %556 = vector.load %arg13[%c40_152, %c0_153] : memref<56x128xf32, #tpu.memory_space<vmem>>, vector<8x128xf32>
    tpu.vector_store %arg13[%c40_152, %c0_153], %555 {strides = array<i32>} : memref<56x128xf32, #tpu.memory_space<vmem>>, vector<8x128xf32>,
    %c48_154 = arith.constant 48 : index
    %c0_155 = arith.constant 0 : index
    %557 = vector.load %arg16[%c48_154, %c0_155] : memref<56x384xf32, #tpu.memory_space<vmem>>, vector<8x384xf32>
    %c0_156 = arith.constant 0 : index
    %c0_157 = arith.constant 0 : index
    %558 = vector.load %arg9[%c0_156, %c0_157] : memref<128x384xbf16, #tpu.memory_space<vmem>>, vector<128x384xbf16>
    %559 = arith.truncf %555 : vector<8x128xf32> to vector<8x128xbf16>
    %cst_158 = arith.constant dense<0.000000e+00> : vector<8x384xf32>
    %560 = tpu.matmul %559, %558, %cst_158 {dimension_numbers = #tpu.dot_dimension_numbers<[1], [0], [0], [1], [0, 0, 1, 1], [], []>} : vector<8x128xbf16>, vector<128x384xbf16>, vector<8x384xf32> -> vector<8x384xf32>
    %561 = arith.addf %560, %364 : vector<8x384xf32>
    %562 = vector.extract_strided_slice %557 {offsets = [0, 0], sizes = [8, 128], strides = [1, 1]} : vector<8x384xf32> to vector<8x128xf32>
    %563 = vector.extract_strided_slice %561 {offsets = [0, 0], sizes = [8, 128], strides = [1, 1]} : vector<8x384xf32> to vector<8x128xf32>
    %564 = arith.addf %562, %563 : vector<8x128xf32>
    %565 = arith.negf %564 : vector<8x128xf32>
    %566 = math.exp %565 : vector<8x128xf32>
    %cst_159 = arith.constant 1.000000e+00 : f32
    %567 = vector.broadcast %cst_159 : f32 to vector<8x128xf32>
    %568 = arith.addf %567, %566 : vector<8x128xf32>
    %569 = arith.divf %567, %568 : vector<8x128xf32>
    %570 = vector.extract_strided_slice %557 {offsets = [0, 128], sizes = [8, 128], strides = [1, 1]} : vector<8x384xf32> to vector<8x128xf32>
    %571 = vector.extract_strided_slice %561 {offsets = [0, 128], sizes = [8, 128], strides = [1, 1]} : vector<8x384xf32> to vector<8x128xf32>
    %572 = arith.addf %570, %571 : vector<8x128xf32>
    %573 = arith.negf %572 : vector<8x128xf32>
    %574 = math.exp %573 : vector<8x128xf32>
    %cst_160 = arith.constant 1.000000e+00 : f32
    %575 = vector.broadcast %cst_160 : f32 to vector<8x128xf32>
    %576 = arith.addf %575, %574 : vector<8x128xf32>
    %577 = arith.divf %575, %576 : vector<8x128xf32>
    %578 = vector.extract_strided_slice %557 {offsets = [0, 256], sizes = [8, 128], strides = [1, 1]} : vector<8x384xf32> to vector<8x128xf32>
    %579 = vector.extract_strided_slice %561 {offsets = [0, 256], sizes = [8, 128], strides = [1, 1]} : vector<8x384xf32> to vector<8x128xf32>
    %580 = arith.mulf %569, %579 : vector<8x128xf32>
    %581 = arith.addf %578, %580 : vector<8x128xf32>
    %582 = math.tanh %581 : vector<8x128xf32>
    %cst_161 = arith.constant 1.000000e+00 : f32
    %583 = vector.broadcast %cst_161 : f32 to vector<8x128xf32>
    %584 = arith.subf %583, %577 : vector<8x128xf32>
    %585 = arith.mulf %584, %582 : vector<8x128xf32>
    %586 = arith.mulf %577, %555 : vector<8x128xf32>
    %587 = arith.addf %585, %586 : vector<8x128xf32>
    %c48_162 = arith.constant 48 : index
    %c0_163 = arith.constant 0 : index
    %588 = vector.load %arg13[%c48_162, %c0_163] : memref<56x128xf32, #tpu.memory_space<vmem>>, vector<8x128xf32>
    tpu.vector_store %arg13[%c48_162, %c0_163], %587 {strides = array<i32>} : memref<56x128xf32, #tpu.memory_space<vmem>>, vector<8x128xf32>,
    return
  }
}

module attributes {stable_mosaic.version = 11 : i64} {
  func.func @logits_kernel(%arg0: i32, %arg1: i32, %arg2: memref<56x128xf32, #tpu.memory_space<vmem>>, %arg3: memref<128x128xbf16, #tpu.memory_space<vmem>>, %arg4: memref<1x128xf32, #tpu.memory_space<vmem>>, %arg5: memref<56x128xf32, #tpu.memory_space<vmem>>) attributes {dimension_semantics = [#tpu.dimension_semantics<parallel>, #tpu.dimension_semantics<parallel>], iteration_bounds = array<i64: 1, 1>, scalar_prefetch = 0 : i64, scratch_operands = 0 : i64, tpu.core_type = #tpu.core_type<tc>, window_params = [{transform_indices = @transform_0, window_bounds = array<i64: 56, 128>}, {transform_indices = @transform_1, window_bounds = array<i64: 128, 128>}, {transform_indices = @transform_2, window_bounds = array<i64: 1, 128>}, {transform_indices = @transform_3, window_bounds = array<i64: 56, 128>}]} {
    %c0 = arith.constant 0 : index
    %c0_0 = arith.constant 0 : index
    %0 = vector.load %arg2[%c0, %c0_0] : memref<56x128xf32, #tpu.memory_space<vmem>>, vector<56x128xf32>
    %1 = arith.truncf %0 : vector<56x128xf32> to vector<56x128xbf16>
    %c0_1 = arith.constant 0 : index
    %c0_2 = arith.constant 0 : index
    %2 = vector.load %arg3[%c0_1, %c0_2] : memref<128x128xbf16, #tpu.memory_space<vmem>>, vector<128x128xbf16>
    %cst = arith.constant dense<0.000000e+00> : vector<56x128xf32>
    %3 = tpu.matmul %1, %2, %cst {dimension_numbers = #tpu.dot_dimension_numbers<[1], [0], [0], [1], [0, 0, 1, 1], [], []>} : vector<56x128xbf16>, vector<128x128xbf16>, vector<56x128xf32> -> vector<56x128xf32>
    %c0_3 = arith.constant 0 : index
    %c0_4 = arith.constant 0 : index
    %4 = vector.load %arg4[%c0_3, %c0_4] : memref<1x128xf32, #tpu.memory_space<vmem>>, vector<1x128xf32>
    %5 = vector.broadcast %4 : vector<1x128xf32> to vector<56x128xf32>
    %6 = arith.addf %3, %5 : vector<56x128xf32>
    %c0_5 = arith.constant 0 : index
    %c0_6 = arith.constant 0 : index
    %7 = vector.load %arg5[%c0_5, %c0_6] : memref<56x128xf32, #tpu.memory_space<vmem>>, vector<56x128xf32>
    tpu.vector_store %arg5[%c0_5, %c0_6], %6 {strides = array<i32>} : memref<56x128xf32, #tpu.memory_space<vmem>>, vector<56x128xf32>,
    return
  }
  func.func @transform_0(%arg0: i32, %arg1: i32) -> (i32, i32) {
    %c0_i32 = arith.constant 0 : i32
    %c0_i32_0 = arith.constant 0 : i32
    return %arg0, %c0_i32 : i32, i32
  }
  func.func @transform_1(%arg0: i32, %arg1: i32) -> (i32, i32) {
    %c0_i32 = arith.constant 0 : i32
    %c0_i32_0 = arith.constant 0 : i32
    return %c0_i32, %arg1 : i32, i32
  }
  func.func @transform_2(%arg0: i32, %arg1: i32) -> (i32, i32) {
    %c0_i32 = arith.constant 0 : i32
    %c0_i32_0 = arith.constant 0 : i32
    return %c0_i32, %arg1 : i32, i32
  }
  func.func @transform_3(%arg0: i32, %arg1: i32) -> (i32, i32) {
    %c0_i32 = arith.constant 0 : i32
    return %arg0, %arg1 : i32, i32
  }
}

</mosaic_0001>

<bundles_post_ra>
// kernel: basic_model_forward.3
= control target key start
LH: loop header
LB: loop body
LE: loop exit
PB: predicated region body
PF: predicated region fallthrough
CT: control target
= control target key end

     0   :  { %s286_s1 = inlined_call_operand.vmem [shape: bf16[128,128], index: 1, kind: input, shape index: {}]   ;;  %s287_s2 = inlined_call_operand.vmem [shape: f32[1,128], index: 2, kind: input, shape index: {}]   ;;  %s288_s0 = inlined_call_operand.vmem [shape: f32[56,128], index: 0, kind: input, shape index: {}]   ;;  %s289_s3 = inlined_call_operand.vmem [shape: f32[56,128], index: 3, kind: output, shape index: {}]  }
   0x1   :  { %v171_v0 = vld [vmem:[%s286_s1 + $0x38] sm:$0xff]  ;;  %v170_v1 = vld [vmem:[%s286_s1 + $0x30] sm:$0xff]  ;;  %v169_v2 = vld [vmem:[%s286_s1 + $0x28] sm:$0xff] }
   0x2   :  { %93 = vmatpush.bf16.msra.mxu0 %v171_v0  ;;  %172 = vmatpush.bf16.msra.mxu1 %v171_v0  ;;  %v168_v3 = vld [vmem:[%s286_s1 + $0x20] sm:$0xff]  ;;  %v167_v4 = vld [vmem:[%s286_s1 + $0x18] sm:$0xff]  ;;  %v166_v5 = vld [vmem:[%s286_s1 + $0x10] sm:$0xff] }
   0x3   :  { %173 = vmatpush.bf16.msra.mxu2 %v171_v0  ;;  %174 = vmatpush.bf16.msra.mxu3 %v171_v0  ;;  %v165_v6 = vld [vmem:[%s286_s1 + $0x8] sm:$0xff]  ;;  %v164_v7 = vld [vmem:[%s286_s1] sm:$0xff]  ;;  %v16_v10 = vld [vmem:[%s288_s0 + $0x10] sm:$0xff] }
   0x4   :  { %v14_v8 = vld [vmem:[%s288_s0] sm:$0xff]  ;;  %v15_v9 = vld [vmem:[%s288_s0 + $0x8] sm:$0xff]  ;;  %v17_v11 = vld [vmem:[%s288_s0 + $0x18] sm:$0xff] }
   0x5   :  { %v18_v12 = vld [vmem:[%s288_s0 + $0x20] sm:$0xff]  ;;  %v19_v13 = vld [vmem:[%s288_s0 + $0x28] sm:$0xff]  ;;  %v20_v14 = vld [vmem:[%s288_s0 + $0x30] sm:$0xff]  ;;  %v21_v15 = vpack.c.bf16 %v15_v9, %v14_v8  ;;  %v22_v16 = vpack.c.bf16 %v17_v11, %v16_v10 }
   0x6   :  { %94 = vmatpush.bf16.msra.mxu0 %v170_v1  ;;  %175 = vmatpush.bf16.msra.mxu1 %v170_v1  ;;  %v23_v17 = vpack.c.bf16 %v19_v13, %v18_v12  ;;  %v24_v18 = vpack.c.bf16 %v20_v14, %v20_v14  ;;  %v196_v19 = vld [vmem:[%s287_s2] ss:$0 sm:$0xff] }
   0x7   :  { %176 = vmatpush.bf16.msra.mxu2 %v170_v1  ;;  %177 = vmatpush.bf16.msra.mxu3 %v170_v1 }
   0xa   :  { %95 = vmatpush.bf16.msra.mxu0 %v169_v2  ;;  %178 = vmatpush.bf16.msra.mxu1 %v169_v2 }
   0xb   :  { %179 = vmatpush.bf16.msra.mxu2 %v169_v2  ;;  %180 = vmatpush.bf16.msra.mxu3 %v169_v2 }
   0xe   :  { %96 = vmatpush.bf16.msra.mxu0 %v168_v3  ;;  %181 = vmatpush.bf16.msra.mxu1 %v168_v3 }
   0xf   :  { %182 = vmatpush.bf16.msra.mxu2 %v168_v3  ;;  %183 = vmatpush.bf16.msra.mxu3 %v168_v3 }
  0x12   :  { %97 = vmatpush.bf16.msra.mxu0 %v167_v4  ;;  %184 = vmatpush.bf16.msra.mxu1 %v167_v4 }
  0x13   :  { %185 = vmatpush.bf16.msra.mxu2 %v167_v4  ;;  %186 = vmatpush.bf16.msra.mxu3 %v167_v4 }
  0x16   :  { %98 = vmatpush.bf16.msra.mxu0 %v166_v5  ;;  %187 = vmatpush.bf16.msra.mxu1 %v166_v5 }
  0x17   :  { %188 = vmatpush.bf16.msra.mxu2 %v166_v5  ;;  %189 = vmatpush.bf16.msra.mxu3 %v166_v5 }
  0x1a   :  { %99 = vmatpush.bf16.msra.mxu0 %v165_v6  ;;  %190 = vmatpush.bf16.msra.mxu1 %v165_v6 }
  0x1b   :  { %191 = vmatpush.bf16.msra.mxu2 %v165_v6  ;;  %192 = vmatpush.bf16.msra.mxu3 %v165_v6 }
  0x1e   :  { %100 = vmatpush.bf16.msra.mxu0 %v164_v7  ;;  %193 = vmatpush.bf16.msra.mxu1 %v164_v7 }
  0x1f   :  { %194 = vmatpush.bf16.msra.mxu2 %v164_v7  ;;  %195 = vmatpush.bf16.msra.mxu3 %v164_v7 }
  0x21   :  { %101 = vmatmul.bf16.vlgmr.msra.gmra.mxu0 %v21_v15  ;;  %106 = vmatmul.bf16.vlgmr.msra.gmra.mxu1 %v22_v16 }
  0x22   :  { %111 = vmatmul.bf16.vlgmr.msra.gmra.mxu2 %v23_v17  ;;  %116 = vmatmul.bf16.vlgmr.msra.gmra.mxu3 %v24_v18 }
  0x9e   :  { %v102_v20 = vpop.f32.mrf.mxu0  ;;  %v107_v21 = vpop.f32.mrf.mxu1 }
  0x9f   :  { %v103_v22 = vadd.f32 %v196_v19, %v102_v20  ;;  %v108_v23 = vadd.f32 %v196_v19, %v107_v21 }
  0xa1   :  { %121 = vst [vmem:[%s289_s3] sm:$0xff] %v103_v22 }
  0xa2   :  { %123 = vst [vmem:[%s289_s3 + $0x10] sm:$0xff] %v108_v23 }
  0xa5   :  { %v112_v24 = vpop.f32.mrf.mxu2  ;;  %v117_v25 = vpop.f32.mrf.mxu3 }
  0xa6   :  { %v113_v26 = vadd.f32 %v196_v19, %v112_v24  ;;  %v118_v27 = vadd.f32 %v196_v19, %v117_v25  ;;  %v104_v28 = vpop.f32.mrf.mxu0  ;;  %v109_v29 = vpop.f32.mrf.mxu1 }
  0xa7   :  { %v105_v30 = vadd.f32 %v196_v19, %v104_v28  ;;  %v110_v31 = vadd.f32 %v196_v19, %v109_v29 }
  0xa8   :  { %125 = vst [vmem:[%s289_s3 + $0x20] sm:$0xff] %v113_v26 }
  0xa9   :  { %127 = vst [vmem:[%s289_s3 + $0x30] sm:$0xff] %v118_v27 }
  0xaa   :  { %122 = vst [vmem:[%s289_s3 + $0x8] sm:$0xff] %v105_v30 }
  0xab   :  { %124 = vst [vmem:[%s289_s3 + $0x18] sm:$0xff] %v110_v31 }
  0xad   :  { %v114_v32 = vpop.f32.mrf.mxu2  ;;  %v119_v33 = vpop.f32.mrf.mxu3 }
  0xae   :  { %v115_v34 = vadd.f32 %v196_v19, %v114_v32 }
  0xb0   :  { %126 = vst [vmem:[%s289_s3 + $0x28] sm:$0xff] %v115_v34 }

// kernel: basic_model_forward.2
= control target key start
LH: loop header
LB: loop body
LE: loop exit
PB: predicated region body
PF: predicated region fallthrough
CT: control target
= control target key end

     0   :  { %s6961_s0 = inlined_call_operand.vmem [shape: s32[8,1], index: 0, kind: input, shape index: {}]   ;;  %s6962_s1 = inlined_call_operand.vmem [shape: bf16[64,64], index: 1, kind: input, shape index: {}]   ;;  %s6963_s2 = inlined_call_operand.vmem [shape: bf16[64,384], index: 2, kind: input, shape index: {}]   ;;  %s6964_s3 = inlined_call_operand.vmem [shape: bf16[128,384], index: 3, kind: input, shape index: {}]   ;;  %s6965_s4 = inlined_call_operand.vmem [shape: f32[1,384], index: 4, kind: input, shape index: {}]   ;;  %s6966_s5 = inlined_call_operand.vmem [shape: f32[1,384], index: 5, kind: input, shape index: {}]   ;;  %s6967_s6 = inlined_call_operand.vmem [shape: bf16[128,128], index: 6, kind: input, shape index: {}]   ;;  %s6968_s7 = inlined_call_operand.vmem [shape: f32[1,128], index: 7, kind: input, shape index: {}]   ;;  %s6969_s8 = inlined_call_operand.vmem [shape: bf16[64,384], index: 8, kind: input, shape index: {}]   ;;  %s6970_s9 = inlined_call_operand.vmem [shape: bf16[128,384], index: 9, kind: input, shape index: {}]   ;;  %s6971_s10 = inlined_call_operand.vmem [shape: f32[1,384], index: 10, kind: input, shape index: {}]   ;;  %s6972_s11 = inlined_call_operand.vmem [shape: f32[1,384], index: 11, kind: input, shape index: {}]   ;;  %s6973_s12 = inlined_call_operand.vmem [shape: bf16[56,64], index: 12, kind: input, shape index: {}]   ;;  %s6974_s13 = inlined_call_operand.vmem [shape: f32[56,128], index: 13, kind: output, shape index: {}]  }
   0x1   :  { %v55_v0 = vld [vmem:[%s6973_s12] sm:$0xff]  ;;  %v57_v1 = vld [vmem:[%s6973_s12 + $0x8] sm:$0xff]  ;;  %v59_v2 = vld [vmem:[%s6973_s12 + $0x10] sm:$0xff] }
   0x2   :  { %56 = vst [vmem:[#allocation2] sm:$0xff] %v55_v0  ;;  %v3440_v3 = vld [vmem:[%s6973_s12 + $0x18] sm:$0xf] }
   0x3   :  { %58 = vst [vmem:[#allocation2 + $0x8] sm:$0xff] %v57_v1 }
   0x4   :  { %60 = vst [vmem:[#allocation2 + $0x10] sm:$0xff] %v59_v2 }
   0x5   :  { %72 = vst [vmem:[#allocation2 + $0x18] sm:$0xf] %v3440_v3 }
   0x6   :  { %76 = vsyncadd [#allocation5], 448  ;;  %v3495_v4 = vld [vmem:[%s6963_s2 + $0x48] sm:$0xf]  ;;  %v4442_v5 = vld [vmem:[%s6963_s2 + $0x50] sm:$0xf0] }
   0x7   :  { %v3496_v6 = vor.u32 %v4442_v5, %v3495_v4  ;;  %v3603_v7 = vld [vmem:[%s6964_s3 + $0xa8] sm:$0xf]  ;;  %v4466_v8 = vld [vmem:[%s6964_s3 + $0xb0] sm:$0xf0]  ;;  %v3483_v9 = vld [vmem:[%s6963_s2 + $0x30] sm:$0xf] }
   0x8   :  { %v4937_v10 = vor.u32 %v4466_v8, %v3603_v7  ;;  %v4439_v11 = vld [vmem:[%s6963_s2 + $0x38] sm:$0xf0]  ;;  %v3591_v12 = vld [vmem:[%s6964_s3 + $0x90] sm:$0xf]  ;;  %v3471_v16 = vld [vmem:[%s6963_s2 + $0x18] sm:$0xf] }
   0x9   :  { %v4463_v13 = vld [vmem:[%s6964_s3 + $0x98] sm:$0xf0]  ;;  %210 = vmatpush.bf16.msra.mxu0 %v3496_v6  ;;  %v3484_v14 = vor.u32 %v4439_v11, %v3483_v9  ;;  %v4436_v17 = vld [vmem:[%s6963_s2 + $0x20] sm:$0xf0]  ;;  %v3579_v18 = vld [vmem:[%s6964_s3 + $0x78] sm:$0xf] }
   0xa   :  { %489 = vmatpush.bf16.msra.mxu3 %v4937_v10  ;;  %v4949_v15 = vor.u32 %v4463_v13, %v3591_v12  ;;  %v4460_v19 = vld [vmem:[%s6964_s3 + $0x80] sm:$0xf0]  ;;  %v3472_v20 = vor.u32 %v4436_v17, %v3471_v16  ;;  %v3459_v22 = vld [vmem:[%s6963_s2] sm:$0xf]  ;;  %v4433_v23 = vld [vmem:[%s6963_s2 + $0x8] sm:$0xf0] }
   0xb   :  { %v4964_v21 = vor.u32 %v4460_v19, %v3579_v18  ;;  %v3567_v24 = vld [vmem:[%s6964_s3 + $0x60] sm:$0xf]  ;;  %v4457_v25 = vld [vmem:[%s6964_s3 + $0x68] sm:$0xf0]  ;;  %v3611_v26 = vld [vmem:[%s6964_s3 + $0xb0] sm:$0xf]  ;;  %v3460_v28 = vor.u32 %v4433_v23, %v3459_v22 }
   0xc   :  { %v4467_v27 = vld [vmem:[%s6964_s3 + $0xb8] sm:$0xf0]  ;;  %v4838_v29 = vmov 0   ;;  %v4986_v30 = vor.u32 %v4457_v25, %v3567_v24  ;;  %v3555_v31 = vld [vmem:[%s6964_s3 + $0x48] sm:$0xf]  ;;  %v5010_v37 = vld [vmem:[%s6962_s1] sm:$0xff] }
   0xd   :  { %211 = vmatpush.bf16.msra.mxu0 %v3484_v14  ;;  %4661 = vset.pattern.permute.xlu0 %v4838_v29  ;;  %v4454_v32 = vld [vmem:[%s6964_s3 + $0x50] sm:$0xf0]  ;;  %v4994_v33 = vor.u32 %v4467_v27, %v3611_v26  ;;  %v3599_v34 = vld [vmem:[%s6964_s3 + $0x98] sm:$0xf]  ;;  %v4464_v35 = vld [vmem:[%s6964_s3 + $0xa0] sm:$0xf0] }
   0xe   :  { %490 = vmatpush.bf16.msra.mxu3 %v4949_v15  ;;  %4667 = vset.pattern.permute.xlu1 %v4838_v29  ;;  %v4441_v36 = vld [vmem:[%s6963_s2 + $0x4c] sm:$0xf]  ;;  %v3497_v38 = vld [vmem:[%s6963_s2 + $0x54] sm:$0xf0]  ;;  %vm193_vm0 = vcmask 523264   ;;  %v5016_v40 = vor.u32 %v4454_v32, %v3555_v31  ;;  %v5022_v42 = vor.u32 %v4464_v35, %v3599_v34 }
   0xf   :  { %4673 = vset.pattern.permute.xlu2 %v4838_v29  ;;  %v3500_v39 = vor.u32 %v4441_v36, %v3497_v38  ;;  %v3543_v41 = vld [vmem:[%s6964_s3 + $0x30] sm:$0xf]  ;;  %v4438_v43 = vld [vmem:[%s6963_s2 + $0x34] sm:$0xf]  ;;  %v3485_v44 = vld [vmem:[%s6963_s2 + $0x3c] sm:$0xf0] }
  0x10   :  { %v4451_v45 = vld [vmem:[%s6964_s3 + $0x38] sm:$0xf0]  ;;  %v3587_v46 = vld [vmem:[%s6964_s3 + $0x80] sm:$0xf]  ;;  %v4461_v47 = vld [vmem:[%s6964_s3 + $0x88] sm:$0xf0]  ;;  %v3488_v48 = vor.u32 %v4438_v43, %v3485_v44 }
  0x11   :  { %212 = vmatpush.bf16.msra.mxu0 %v3472_v20  ;;  %239 = vmatpush.bf16.msra.mxu1 %v3500_v39  ;;  %v5042_v49 = vor.u32 %v4451_v45, %v3543_v41  ;;  %v3531_v50 = vld [vmem:[%s6964_s3 + $0x18] sm:$0xf]  ;;  %v5048_v51 = vor.u32 %v4461_v47, %v3587_v46  ;;  %v4435_v52 = vld [vmem:[%s6963_s2 + $0x1c] sm:$0xf]  ;;  %v3473_v53 = vld [vmem:[%s6963_s2 + $0x24] sm:$0xf0] }
  0x12   :  { %491 = vmatpush.bf16.msra.mxu3 %v4964_v21  ;;  %v4448_v54 = vld [vmem:[%s6964_s3 + $0x20] sm:$0xf0]  ;;  %v3575_v55 = vld [vmem:[%s6964_s3 + $0x68] sm:$0xf]  ;;  %v4458_v56 = vld [vmem:[%s6964_s3 + $0x70] sm:$0xf0]  ;;  %v3476_v57 = vor.u32 %v4435_v52, %v3473_v53 }
  0x13   :  { %v5066_v58 = vor.u32 %v4448_v54, %v3531_v50  ;;  %v3519_v59 = vld [vmem:[%s6964_s3] sm:$0xf]  ;;  %v5072_v60 = vor.u32 %v4458_v56, %v3575_v55  ;;  %v4432_v61 = vld [vmem:[%s6963_s2 + $0x4] sm:$0xf]  ;;  %v3461_v62 = vld [vmem:[%s6963_s2 + $0xc] sm:$0xf0] }
  0x14   :  { %v4445_v63 = vld [vmem:[%s6964_s3 + $0x8] sm:$0xf0]  ;;  %v3464_v0 = vor.u32 %v4432_v61, %v3461_v62  ;;  %v3563_v1 = vld [vmem:[%s6964_s3 + $0x50] sm:$0xf]  ;;  %v4455_v2 = vld [vmem:[%s6964_s3 + $0x58] sm:$0xf0] }
  0x15   :  { %213 = vmatpush.bf16.msra.mxu0 %v3460_v28  ;;  %240 = vmatpush.bf16.msra.mxu1 %v3488_v48  ;;  %v4465_v3 = vld [vmem:[%s6964_s3 + $0xac] sm:$0xf]  ;;  %v3605_v4 = vld [vmem:[%s6964_s3 + $0xb4] sm:$0xf0]  ;;  %v5096_v5 = vor.u32 %v4445_v63, %v3519_v59  ;;  %v5099_v6 = vor.u32 %v4455_v2, %v3563_v1  ;;  %v3503_v8 = vld [vmem:[%s6963_s2 + $0x50] sm:$0xf] }
  0x16   :  { %492 = vmatpush.bf16.msra.mxu3 %v4986_v30  ;;  %v5101_v7 = vor.u32 %v4465_v3, %v3605_v4  ;;  %v4443_v9 = vld [vmem:[%s6963_s2 + $0x58] sm:$0xf0]  ;;  %v5112_v11 = vld [vmem:[%s6962_s1 + $0x8] sm:$0xff]  ;;  %v4462_v12 = vld [vmem:[%s6964_s3 + $0x94] sm:$0xf] }
  0x17   :  { %v3593_v13 = vld [vmem:[%s6964_s3 + $0x9c] sm:$0xf0]  ;;  %v3504_v14 = vor.u32 %v4443_v9, %v3503_v8  ;;  %v4459_v16 = vld [vmem:[%s6964_s3 + $0x7c] sm:$0xf]  ;;  %v3581_v18 = vld [vmem:[%s6964_s3 + $0x84] sm:$0xf0] }
  0x18   :  { %3505 = vmatmul.msk.bf16.vlgmr.msra.gmra.mxu0 %vm193_vm0, %v5010_v37  ;;  %v5127_v17 = vor.u32 %v4462_v12, %v3593_v13  ;;  %v3491_v19 = vld [vmem:[%s6963_s2 + $0x38] sm:$0xf]  ;;  %v4440_v20 = vld [vmem:[%s6963_s2 + $0x40] sm:$0xf0]  ;;  %v3479_v25 = vld [vmem:[%s6963_s2 + $0x20] sm:$0xf]  ;;  %v5165_v32 = vor.u32 %v4459_v16, %v3581_v18 }
  0x19   :  { %515 = vmatpush.bf16.msrb.mxu0 %v4994_v33  ;;  %241 = vmatpush.bf16.msra.mxu1 %v3476_v57  ;;  %v3551_v22 = vld [vmem:[%s6964_s3 + $0x38] sm:$0xf]  ;;  %v4452_v23 = vld [vmem:[%s6964_s3 + $0x40] sm:$0xf0]  ;;  %v3492_v24 = vor.u32 %v4440_v20, %v3491_v19  ;;  %v4437_v27 = vld [vmem:[%s6963_s2 + $0x28] sm:$0xf0] }
  0x1a   :  { %493 = vmatpush.bf16.msra.mxu3 %v5016_v40  ;;  %268 = vmatpush.bf16.msra.mxu2 %v3504_v14  ;;  %v5152_v26 = vor.u32 %v4452_v23, %v3551_v22  ;;  %v3539_v28 = vld [vmem:[%s6964_s3 + $0x20] sm:$0xf]  ;;  %v4449_v31 = vld [vmem:[%s6964_s3 + $0x28] sm:$0xf0]  ;;  %v4456_v34 = vld [vmem:[%s6964_s3 + $0x64] sm:$0xf]  ;;  %v3480_v38 = vor.u32 %v4437_v27, %v3479_v25 }
  0x1b   :  { %v5171_v35 = vor.u32 %v4449_v31, %v3539_v28  ;;  %v3569_v36 = vld [vmem:[%s6964_s3 + $0x6c] sm:$0xf0]  ;;  %v3527_v39 = vld [vmem:[%s6964_s3 + $0x8] sm:$0xf]  ;;  %v4446_v41 = vld [vmem:[%s6964_s3 + $0x10] sm:$0xf0] }
  0x1c   :  { %v3467_v43 = vld [vmem:[%s6963_s2 + $0x8] sm:$0xf]  ;;  %v4434_v44 = vld [vmem:[%s6963_s2 + $0x10] sm:$0xf0]  ;;  %v5190_v45 = vor.u32 %v4456_v34, %v3569_v36  ;;  %v5193_v46 = vor.u32 %v4446_v41, %v3527_v39  ;;  %v4453_v47 = vld [vmem:[%s6964_s3 + $0x4c] sm:$0xf] }
  0x1d   :  { %516 = vmatpush.bf16.msrb.mxu0 %v5022_v42  ;;  %242 = vmatpush.bf16.msra.mxu1 %v3464_v0  ;;  %v3557_v48 = vld [vmem:[%s6964_s3 + $0x54] sm:$0xf0]  ;;  %v3468_v50 = vor.u32 %v4434_v44, %v3467_v43  ;;  %v5209_v53 = vld [vmem:[%s6962_s1 + $0x10] sm:$0xff]  ;;  %v3545_v55 = vld [vmem:[%s6964_s3 + $0x3c] sm:$0xf0] }
  0x1e   :  { %494 = vmatpush.bf16.msra.mxu3 %v5042_v49  ;;  %269 = vmatpush.bf16.msra.mxu2 %v3492_v24  ;;  %v5203_v52 = vor.u32 %v4453_v47, %v3557_v48  ;;  %v4450_v54 = vld [vmem:[%s6964_s3 + $0x34] sm:$0xf]  ;;  %v4447_v57 = vld [vmem:[%s6964_s3 + $0x1c] sm:$0xf]  ;;  %v3533_v59 = vld [vmem:[%s6964_s3 + $0x24] sm:$0xf0] }
  0x1f   :  { %v5221_v56 = vor.u32 %v4450_v54, %v3545_v55  ;;  %v5236_v61 = vld [vmem:[%s6961_s0] sm:$0xff]  ;;  %v5248_v0 = vor.u32 %v4447_v57, %v3533_v59  ;;  %v3521_v4 = vld [vmem:[%s6964_s3 + $0xc] sm:$0xf0]  ;;  %v4431_v12 = vld [vmem:[%s6962_s1 + $0x18] sm:$0xff] }
  0x20   :  { %3509 = vmatmul.msk.bf16.vlgmr.msra.gmra.mxu1 %vm193_vm0, %v5010_v37  ;;  %vm575_vm1 = vcmp.eq.s32.totalorder %v5236_v61, 0  ;;  %vm682_vm2 = vcmp.eq.s32.totalorder %v5236_v61, 1  ;;  %v4444_v3 = vld [vmem:[%s6964_s3 + $0x4] sm:$0xf]  ;;  %v317_v20 = vld [vmem:[%s6966_s5] sm:$0x7] }
  0x21   :  { %517 = vmatpush.bf16.msrb.mxu0 %v5048_v51  ;;  %596 = vmatpush.bf16.msrb.mxu1 %v4937_v10  ;;  %v5259_v8 = vor.u32 %v4444_v3, %v3521_v4  ;;  %v5341_v22 = vperm.slane %v317_v20, 0  ;;  %v5355_v55 = vperm.slane %v317_v20, 1  ;;  %vm789_vm3 = vcmp.eq.s32.totalorder %v5236_v61, 2 }
  0x22   :  { %495 = vmatpush.bf16.msra.mxu3 %v5066_v58  ;;  %270 = vmatpush.bf16.msra.mxu2 %v3480_v38  ;;  %vm896_vm4 = vcmp.eq.s32.totalorder %v5236_v61, 3 }
  0x25   :  { %518 = vmatpush.bf16.msrb.mxu0 %v5072_v60  ;;  %597 = vmatpush.bf16.msrb.mxu1 %v4949_v15 }
  0x26   :  { %496 = vmatpush.bf16.msra.mxu3 %v5096_v5  ;;  %271 = vmatpush.bf16.msra.mxu2 %v3468_v50 }
  0x28   :  { %3506 = vmatmul.msk.bf16.gmra.mxu0 %vm193_vm0, %v5112_v11 }
  0x29   :  { %519 = vmatpush.bf16.msrb.mxu0 %v5099_v6  ;;  %497 = vmatmul.bf16.vlgmr.msra.gmra.mxu3 %v4838_v29 }
  0x2a   :  { %502 = vmatpush.bf16.msrb.mxu3 %v5101_v7  ;;  %598 = vmatpush.bf16.msrb.mxu1 %v4964_v21 }
  0x2b   :  { %609 = vmatpush.bf16.msrb.mxu2 %v5101_v7 }
  0x2c   :  { %3513 = vmatmul.msk.bf16.vlgmr.msra.gmra.mxu2 %vm193_vm0, %v5010_v37  ;;  %v6975_v37 = vmov 0.0  }
  0x2d   :  { %520 = vmatpush.bf16.msrb.mxu0 %v5152_v26  ;;  %v3615_v62 = vsel %vm575_vm1, 1.0, %v6975_v37  ;;  %v3618_v63 = vsel %vm682_vm2, 1.0, %v6975_v37 }
  0x2e   :  { %503 = vmatpush.bf16.msrb.mxu3 %v5127_v17  ;;  %599 = vmatpush.bf16.msrb.mxu1 %v4986_v30  ;;  %v4662_v1 = vpack.i.bf16 %v3618_v63, %v3615_v62  ;;  %v691_v2 = vsub.f32 1.0, %v3618_v63  ;;  %v584_v9 = vsub.f32 1.0, %v3615_v62 }
  0x2f   :  { %610 = vmatpush.bf16.msrb.mxu2 %v5127_v17 }
  0x30   :  { %3510 = vmatmul.msk.bf16.gmra.mxu1 %vm193_vm0, %v5112_v11  ;;  %4663 = vperm.xlu0 %4661, %v4662_v1  }
  0x31   :  { %521 = vmatpush.bf16.msrb.mxu0 %v5171_v35  ;;  %694 = vperm.xlu1 %4667, %v691_v2  }
  0x32   :  { %504 = vmatpush.bf16.msrb.mxu3 %v5165_v32  ;;  %600 = vmatpush.bf16.msrb.mxu1 %v5016_v40 }
  0x33   :  { %611 = vmatpush.bf16.msrb.mxu2 %v5165_v32 }
  0x35   :  { %522 = vmatpush.bf16.msrb.mxu0 %v5193_v46 }
  0x36   :  { %505 = vmatpush.bf16.msrb.mxu3 %v5190_v45  ;;  %601 = vmatpush.bf16.msrb.mxu1 %v5042_v49 }
  0x37   :  { %612 = vmatpush.bf16.msrb.mxu2 %v5190_v45 }
  0x38   :  { %3507 = vmatmul.msk.bf16.gmra.mxu0 %vm193_vm0, %v5209_v53  ;;  %587 = vperm.xlu0 %4661, %v584_v9  }
  0x39   :  { %703 = vmatpush.bf16.msra.mxu0 %v4937_v10 }
  0x3a   :  { %506 = vmatpush.bf16.msrb.mxu3 %v5203_v52  ;;  %602 = vmatpush.bf16.msrb.mxu1 %v5066_v58 }
  0x3b   :  { %613 = vmatpush.bf16.msrb.mxu2 %v5203_v52 }
  0x3c   :  { %3514 = vmatmul.msk.bf16.gmra.mxu2 %vm193_vm0, %v5112_v11  ;;  %v5331_v11 = vld [vmem:[%s6965_s4] sm:$0x7] }
  0x3d   :  { %704 = vmatpush.bf16.msra.mxu0 %v4949_v15  ;;  %v103_v13 = vperm.slane %v5331_v11, 0  ;;  %v5351_v48 = vperm.slane %v5331_v11, 1 }
  0x3e   :  { %507 = vmatpush.bf16.msrb.mxu3 %v5221_v56  ;;  %603 = vmatpush.bf16.msrb.mxu1 %v5096_v5 }
  0x3f   :  { %614 = vmatpush.bf16.msrb.mxu2 %v5221_v56 }
  0x40   :  { %3511 = vmatmul.msk.bf16.gmra.mxu1 %vm193_vm0, %v5209_v53 }
  0x41   :  { %705 = vmatpush.bf16.msra.mxu0 %v4964_v21 }
  0x42   :  { %508 = vmatpush.bf16.msrb.mxu3 %v5248_v0  ;;  %716 = vmatpush.bf16.msra.mxu1 %v5101_v7 }
  0x43   :  { %615 = vmatpush.bf16.msrb.mxu2 %v5248_v0 }
  0x45   :  { %706 = vmatpush.bf16.msra.mxu0 %v4986_v30 }
  0x46   :  { %509 = vmatpush.bf16.msrb.mxu3 %v5259_v8  ;;  %717 = vmatpush.bf16.msra.mxu1 %v5127_v17 }
  0x47   :  { %616 = vmatpush.bf16.msrb.mxu2 %v5259_v8 }
  0x48   :  { %3508 = vmatmul.msk.bf16.gmra.mxu0 %vm193_vm0, %v4431_v12 }
  0x49   :  { %510 = vmatmul.bf16.vlgmr.msrb.gmra.mxu3 %v4838_v29  ;;  %707 = vmatpush.bf16.msra.mxu0 %v5016_v40 }
  0x4a   :  { %622 = vmatpush.bf16.msra.mxu3 %v4994_v33  ;;  %718 = vmatpush.bf16.msra.mxu1 %v5165_v32 }
  0x4b   :  { %729 = vmatpush.bf16.msra.mxu2 %v4994_v33 }
  0x4c   :  { %3515 = vmatmul.msk.bf16.gmra.mxu2 %vm193_vm0, %v5209_v53 }
  0x4d   :  { %708 = vmatpush.bf16.msra.mxu0 %v5042_v49 }
  0x4e   :  { %623 = vmatpush.bf16.msra.mxu3 %v5022_v42  ;;  %719 = vmatpush.bf16.msra.mxu1 %v5190_v45 }
  0x4f   :  { %730 = vmatpush.bf16.msra.mxu2 %v5022_v42 }
  0x50   :  { %3512 = vmatmul.msk.bf16.gmra.mxu1 %vm193_vm0, %v4431_v12 }
  0x51   :  { %709 = vmatpush.bf16.msra.mxu0 %v5066_v58 }
  0x52   :  { %624 = vmatpush.bf16.msra.mxu3 %v5048_v51  ;;  %720 = vmatpush.bf16.msra.mxu1 %v5203_v52 }
  0x53   :  { %731 = vmatpush.bf16.msra.mxu2 %v5048_v51 }
  0x55   :  { %710 = vmatpush.bf16.msra.mxu0 %v5096_v5 }
  0x56   :  { %625 = vmatpush.bf16.msra.mxu3 %v5072_v60  ;;  %721 = vmatpush.bf16.msra.mxu1 %v5221_v56 }
  0x57   :  { %732 = vmatpush.bf16.msra.mxu2 %v5072_v60 }
  0x58   :  { %523 = vmatmul.bf16.vlgmr.msrb.gmra.mxu0 %v4838_v29 }
  0x59   :  { %823 = vmatpush.bf16.msrb.mxu0 %v5101_v7 }
  0x5a   :  { %626 = vmatpush.bf16.msra.mxu3 %v5099_v6  ;;  %722 = vmatpush.bf16.msra.mxu1 %v5248_v0 }
  0x5b   :  { %733 = vmatpush.bf16.msra.mxu2 %v5099_v6 }
  0x5c   :  { %3516 = vmatmul.msk.bf16.gmra.mxu2 %vm193_vm0, %v4431_v12 }
  0x5d   :  { %824 = vmatpush.bf16.msrb.mxu0 %v5127_v17 }
  0x5e   :  { %627 = vmatpush.bf16.msra.mxu3 %v5152_v26  ;;  %723 = vmatpush.bf16.msra.mxu1 %v5259_v8 }
  0x5f   :  { %734 = vmatpush.bf16.msra.mxu2 %v5152_v26 }
  0x61   :  { %825 = vmatpush.bf16.msrb.mxu0 %v5165_v32 }
  0x62   :  { %628 = vmatpush.bf16.msra.mxu3 %v5171_v35 }
  0x63   :  { %735 = vmatpush.bf16.msra.mxu2 %v5171_v35 }
  0x65   :  { %826 = vmatpush.bf16.msrb.mxu0 %v5190_v45 }
  0x66   :  { %629 = vmatpush.bf16.msra.mxu3 %v5193_v46 }
  0x67   :  { %736 = vmatpush.bf16.msra.mxu2 %v5193_v46 }
  0x69   :  { %827 = vmatpush.bf16.msrb.mxu0 %v5203_v52 }
  0x6a   :  { %810 = vmatpush.bf16.msrb.mxu3 %v4937_v10 }
  0x6d   :  { %828 = vmatpush.bf16.msrb.mxu0 %v5221_v56 }
  0x6e   :  { %811 = vmatpush.bf16.msrb.mxu3 %v4949_v15 }
  0x71   :  { %829 = vmatpush.bf16.msrb.mxu0 %v5248_v0 }
  0x72   :  { %812 = vmatpush.bf16.msrb.mxu3 %v4964_v21 }
  0x75   :  { %830 = vmatpush.bf16.msrb.mxu0 %v5259_v8 }
  0x76   :  { %813 = vmatpush.bf16.msrb.mxu3 %v4986_v30 }
  0x7a   :  { %814 = vmatpush.bf16.msrb.mxu3 %v5016_v40 }
  0x7e   :  { %815 = vmatpush.bf16.msrb.mxu3 %v5042_v49 }
  0x82   :  { %816 = vmatpush.bf16.msrb.mxu3 %v5066_v58 }
  0x86   :  { %817 = vmatpush.bf16.msrb.mxu3 %v5096_v5 }
  0x95   :  { %v215_v29 = vpop.f32.mrf.mxu0 }
  0x96   :  { %v216_v24 = vadd.f32 %v215_v29, %v103_v13 }
  0x9d   :  { %v217_v14 = vpop.f32.mrf.mxu0  ;;  %v244_v57 = vpop.f32.mrf.mxu1 }
  0x9e   :  { %v5334_v16 = vadd.f32 %v217_v14, %v103_v13  ;;  %v245_v59 = vadd.f32 %v244_v57, %v5351_v48 }
  0xa5   :  { %v220_v18 = vpop.f32.mrf.mxu0 }
  0xa6   :  { %v5336_v19 = vadd.f32 %v220_v18, %v103_v13  ;;  %v5361_v18 = vperm.slane %v317_v20, 2 }
  0xac   :  { %v498_v23 = vpop.f32.mrf.mxu3 }
  0xad   :  { %v499_v25 = vadd.f32 %v498_v23, %v5341_v22  ;;  %v222_v27 = vpop.f32.mrf.mxu0 }
  0xae   :  { %v5344_v28 = vadd.f32 %v222_v27, %v103_v13  ;;  %v5367_v27 = vsel %vm896_vm4, 1.0, %v6975_v37 }
  0xaf   :  { %v528_v31 = vadd.f32 %v499_v25, %v216_v24  ;;  %v3621_v25 = vsel %vm789_vm3, 1.0, %v6975_v37 }
  0xb1   :  { %v3613_v34 = vmul.f32 -1.442695, %v528_v31 }
  0xb3   :  { %4685 = vpow2.f32 %v3613_v34  ;;  %v4668_v34 = vpack.i.bf16 %v5367_v27, %v3621_v25 }
  0xb4   :  { %v500_v36 = vpop.f32.mrf.mxu3 }
  0xb5   :  { %v225_v38 = vpop.f32.mrf.mxu0  ;;  %v798_v36 = vsub.f32 1.0, %v3621_v25  ;;  %4669 = vperm.xlu1 %4667, %v4668_v34  }
  0xb6   :  { %v5346_v39 = vadd.f32 %v225_v38, %v103_v13 }
  0xb7   :  { %801 = vperm.xlu2 %4673, %v798_v36  }
  0xb9   :  { %v4686_v41 = vpop.eup %4685 }
  0xba   :  { %v532_v43 = vadd.f32 1.0, %v4686_v41 }
  0xbc   :  { %4687 = vrcp.f32 %v532_v43  ;;  %vm538_vm6 = vweird.f32 %v532_v43  ;;  %v542_v20 = vand.u32 2147483647, %v532_v43 }
  0xbd   :  { %v227_v44 = vpop.f32.mrf.mxu0 }
  0xbe   :  { %v5348_v47 = vadd.f32 %v227_v44, %v103_v13  ;;  %vm543_vm8 = vcmp.eq.f32.partialorder %v542_v20, 8.507059e+37 }
  0xc2   :  { %v4688_v53 = vpop.eup %4687 }
  0xc3   :  { %v534_v63 = vmul.f32 %v4688_v53, %v532_v43  ;;  %vm539_vm5 = vweird.f32 %v4688_v53 }
  0xc4   :  { %vm540_vm7 = vmor %vm538_vm6, %vm539_vm5  ;;  %vm1003_vm6 = vcmp.eq.s32.totalorder %v5236_v61, 4 }
  0xc5   :  { %v230_v50 = vpop.f32.mrf.mxu0  ;;  %v535_v4 = vsub.f32 1.0, %v534_v63 }
  0xc6   :  { %v5353_v54 = vadd.f32 %v230_v50, %v103_v13  ;;  %v5372_v50 = vperm.slane %v5331_v11, 2 }
  0xc7   :  { %v536_v14 = vmul.f32 %v4688_v53, %v535_v4 }
  0xc8   :  { %6977 = vst [vmem:[#allocation8_spill] sm:$0xff] %v5353_v54 }
  0xc9   :  { %v537_v24 = vadd.f32 %v4688_v53, %v536_v14 }
  0xcb   :  { %v541_v44 = vsel %vm540_vm7, %v4688_v53, %v537_v24 }
  0xcc   :  { %v511_v62 = vpop.f32.mrf.mxu3 }
  0xcd   :  { %v512_v1 = vadd.f32 %v511_v62, %v5355_v55  ;;  %v232_v3 = vpop.f32.mrf.mxu0 }
  0xce   :  { %v5359_v12 = vadd.f32 %v232_v3, %v103_v13  ;;  %v544_v13 = vand.u32 2147483648, %v532_v43 }
  0xcf   :  { %v548_v2 = vadd.f32 %v512_v1, %v245_v59  ;;  %v273_v59 = vpop.f32.mrf.mxu2 }
  0xd0   :  { %6978 = vst [vmem:[#allocation9_spill] sm:$0xff] %v5359_v12  ;;  %v545_v57 = vor.u32 1.1754944e-38, %v544_v13  ;;  %v274_v1 = vadd.f32 %v273_v59, %v5372_v50 }
  0xd1   :  { %v3614_v9 = vmul.f32 -1.442695, %v548_v2 }
  0xd2   :  { %v546_v62 = vsel %vm543_vm8, %v545_v57, %v541_v44 }
  0xd3   :  { %4689 = vpow2.f32 %v3614_v9 }
  0xd4   :  { %v513_v29 = vpop.f32.mrf.mxu3 }
  0xd5   :  { %v524_v23 = vpop.f32.mrf.mxu0 }
  0xd6   :  { %v525_v41 = vadd.f32 %v524_v23, %v5361_v18 }
  0xd7   :  { %v275_v44 = vpop.f32.mrf.mxu2 }
  0xd8   :  { %v568_v63 = vmul.f32 %v546_v62, %v525_v41 }
  0xd9   :  { %v4690_v31 = vpop.eup %4689 }
  0xda   :  { %v552_v38 = vadd.f32 1.0, %v4690_v31  ;;  %v569_v4 = vadd.f32 %v568_v63, %v274_v1 }
  0xdc   :  { %4691 = vrcp.f32 %v552_v38  ;;  %v564_v29 = vand.u32 2147483648, %v552_v38  ;;  %v562_v23 = vand.u32 2147483647, %v552_v38  ;;  %vm558_vm10 = vweird.f32 %v552_v38 }
  0xdd   :  { %v526_v2 = vpop.f32.mrf.mxu0  ;;  %4693 = vtanh.f32 %v569_v4 }
  0xde   :  { %v565_v53 = vor.u32 1.1754944e-38, %v564_v29  ;;  %vm563_vm12 = vcmp.eq.f32.partialorder %v562_v23, 8.507059e+37 }
  0xdf   :  { %v5405_v59 = vpop.f32.mrf.mxu2 }
  0xe2   :  { %v4692_v3 = vpop.eup %4691 }
  0xe3   :  { %v554_v43 = vmul.f32 %v4692_v3, %v552_v38  ;;  %vm559_vm9 = vweird.f32 %v4692_v3  ;;  %v4694_v13 = vpop.eup %4693  ;;  %v246_v38 = vpop.f32.mrf.mxu1 }
  0xe4   :  { %vm560_vm11 = vmor %vm558_vm10, %vm559_vm9 }
  0xe5   :  { %v555_v9 = vsub.f32 1.0, %v554_v43 }
  0xe7   :  { %v556_v14 = vmul.f32 %v4692_v3, %v555_v9  ;;  %v5409_v63 = vpop.f32.mrf.mxu2 }
  0xe9   :  { %v557_v11 = vadd.f32 %v4692_v3, %v556_v14 }
  0xeb   :  { %v561_v24 = vsel %vm560_vm11, %v4692_v3, %v557_v11  ;;  %v5403_v57 = vpop.f32.mrf.mxu1 }
  0xec   :  { %v566_v25 = vsel %vm563_vm12, %v565_v53, %v561_v24 }
  0xed   :  { %v571_v31 = vsub.f32 1.0, %v566_v25  ;;  %v573_v36 = vmul.f32 0.0, %v566_v25 }
  0xef   :  { %v572_v34 = vmul.f32 %v4694_v13, %v571_v31  ;;  %v5413_v2 = vpop.f32.mrf.mxu2  ;;  %v247_v31 = vadd.f32 %v246_v38, %v5351_v48 }
  0xf1   :  { %v5375_v20 = vadd.f32 %v573_v36, %v572_v34 }
  0xf3   :  { %v595_v41 = vpack.c.bf16 %v5375_v20, %v5375_v20  ;;  %v5407_v62 = vpop.f32.mrf.mxu1 }
  0xf5   :  { %604 = vmatmul.bf16.vlgmr.msrb.gmra.mxu1 %v595_v41  ;;  %617 = vmatmul.bf16.vlgmr.msrb.gmra.mxu2 %v595_v41 }
  0xf6   :  { %630 = vmatmul.bf16.vlgmr.msra.gmra.mxu3 %v595_v41  ;;  %836 = vmatpush.bf16.msrb.mxu1 %v4994_v33 }
  0xf7   :  { %917 = vmatpush.bf16.msrb.mxu2 %v4937_v10  ;;  %930 = vmatpush.bf16.msra.mxu3 %v5101_v7  ;;  %v5417_v43 = vpop.f32.mrf.mxu2 }
  0xf8   :  { %6980 = vst [vmem:[#allocation11_spill] sm:$0xff] %v5417_v43 }
  0xfa   :  { %837 = vmatpush.bf16.msrb.mxu1 %v5022_v42 }
  0xfb   :  { %918 = vmatpush.bf16.msrb.mxu2 %v4949_v15  ;;  %931 = vmatpush.bf16.msra.mxu3 %v5127_v17  ;;  %v5411_v1 = vpop.f32.mrf.mxu1 }
  0xfe   :  { %838 = vmatpush.bf16.msrb.mxu1 %v5048_v51 }
  0xff   :  { %919 = vmatpush.bf16.msrb.mxu2 %v4964_v21  ;;  %932 = vmatpush.bf16.msra.mxu3 %v5165_v32  ;;  %v5421_v9 = vpop.f32.mrf.mxu2 }
 0x100   :  { %6982 = vst [vmem:[#allocation13_spill] sm:$0xff] %v5421_v9 }
 0x102   :  { %839 = vmatpush.bf16.msrb.mxu1 %v5072_v60 }
 0x103   :  { %920 = vmatpush.bf16.msrb.mxu2 %v4986_v30  ;;  %933 = vmatpush.bf16.msra.mxu3 %v5190_v45  ;;  %v5415_v3 = vpop.f32.mrf.mxu1 }
 0x104   :  { %6979 = vst [vmem:[#allocation10_spill] sm:$0xff] %v5415_v3 }
 0x106   :  { %840 = vmatpush.bf16.msrb.mxu1 %v5099_v6 }
 0x107   :  { %921 = vmatpush.bf16.msrb.mxu2 %v5016_v40  ;;  %934 = vmatpush.bf16.msra.mxu3 %v5203_v52  ;;  %v5425_v14 = vpop.f32.mrf.mxu2 }
 0x108   :  { %6984 = vst [vmem:[#allocation15_spill] sm:$0xff] %v5425_v14 }
 0x10a   :  { %841 = vmatpush.bf16.msrb.mxu1 %v5152_v26 }
 0x10b   :  { %922 = vmatpush.bf16.msrb.mxu2 %v5042_v49  ;;  %935 = vmatpush.bf16.msra.mxu3 %v5221_v56  ;;  %v5419_v4 = vpop.f32.mrf.mxu1 }
 0x10c   :  { %6981 = vst [vmem:[#allocation12_spill] sm:$0xff] %v5419_v4 }
 0x10e   :  { %842 = vmatpush.bf16.msrb.mxu1 %v5171_v35 }
 0x10f   :  { %923 = vmatpush.bf16.msrb.mxu2 %v5066_v58  ;;  %936 = vmatpush.bf16.msra.mxu3 %v5248_v0 }
 0x112   :  { %843 = vmatpush.bf16.msrb.mxu1 %v5193_v46 }
 0x113   :  { %924 = vmatpush.bf16.msrb.mxu2 %v5096_v5  ;;  %937 = vmatpush.bf16.msra.mxu3 %v5259_v8  ;;  %v5423_v29 = vpop.f32.mrf.mxu1 }
 0x114   :  { %6983 = vst [vmem:[#allocation14_spill] sm:$0xff] %v5423_v29 }
 0x172   :  { %v605_v23 = vpop.f32.mrf.mxu1 }
 0x173   :  { %v606_v11 = vadd.f32 %v605_v23, %v5341_v22 }
 0x175   :  { %v635_v53 = vadd.f32 %v606_v11, %v5334_v16  ;;  %v905_v16 = vsub.f32 1.0, %v5367_v27  ;;  %v276_v27 = vadd.f32 %v275_v44, %v5372_v50 }
 0x177   :  { %v3616_v24 = vmul.f32 -1.442695, %v635_v53  ;;  %908 = vperm.xlu2 %4673, %v905_v16  }
 0x178   :  { %v618_v25 = vpop.f32.mrf.mxu2 }
 0x179   :  { %4695 = vpow2.f32 %v3616_v24  ;;  %v619_v13 = vadd.f32 %v618_v25, %v5355_v55  ;;  %v631_v34 = vpop.f32.mrf.mxu3 }
 0x17a   :  { %v607_v36 = vpop.f32.mrf.mxu1 }
 0x17b   :  { %v655_v41 = vadd.f32 %v619_v13, %v247_v31 }
 0x17d   :  { %v3617_v37 = vmul.f32 -1.442695, %v655_v41 }
 0x17f   :  { %v4696_v12 = vpop.eup %4695  ;;  %4697 = vpow2.f32 %v3617_v37 }
 0x180   :  { %v639_v29 = vadd.f32 1.0, %v4696_v12  ;;  %v620_v14 = vpop.f32.mrf.mxu2 }
 0x181   :  { %v633_v9 = vpop.f32.mrf.mxu3  ;;  %v632_v14 = vadd.f32 %v631_v34, %v5361_v18 }
 0x182   :  { %4699 = vrcp.f32 %v639_v29  ;;  %v651_v24 = vand.u32 2147483648, %v639_v29  ;;  %v649_v31 = vand.u32 2147483647, %v639_v29  ;;  %vm645_vm14 = vweird.f32 %v639_v29 }
 0x184   :  { %v652_v12 = vor.u32 1.1754944e-38, %v651_v24  ;;  %vm650_vm1 = vcmp.eq.f32.partialorder %v649_v31, 8.507059e+37 }
 0x185   :  { %v4698_v23 = vpop.eup %4697 }
 0x186   :  { %v659_v54 = vadd.f32 1.0, %v4698_v23 }
 0x188   :  { %v4700_v11 = vpop.eup %4699  ;;  %4701 = vrcp.f32 %v659_v54  ;;  %v669_v4 = vand.u32 2147483647, %v659_v54  ;;  %vm665_vm3 = vweird.f32 %v659_v54 }
 0x189   :  { %v641_v38 = vmul.f32 %v4700_v11, %v639_v29  ;;  %vm646_vm13 = vweird.f32 %v4700_v11 }
 0x18a   :  { %vm647_vm15 = vmor %vm645_vm14, %vm646_vm13  ;;  %vm670_vm5 = vcmp.eq.f32.partialorder %v669_v4, 8.507059e+37 }
 0x18b   :  { %v642_v53 = vsub.f32 1.0, %v641_v38  ;;  %v671_v38 = vand.u32 2147483648, %v659_v54 }
 0x18d   :  { %v643_v25 = vmul.f32 %v4700_v11, %v642_v53  ;;  %v672_v29 = vor.u32 1.1754944e-38, %v671_v38 }
 0x18e   :  { %v4702_v13 = vpop.eup %4701 }
 0x18f   :  { %v661_v36 = vmul.f32 %v4702_v13, %v659_v54  ;;  %v644_v37 = vadd.f32 %v4700_v11, %v643_v25  ;;  %vm666_vm2 = vweird.f32 %v4702_v13 }
 0x190   :  { %vm667_vm4 = vmor %vm665_vm3, %vm666_vm2 }
 0x191   :  { %v662_v9 = vsub.f32 1.0, %v661_v36  ;;  %v648_v41 = vsel %vm647_vm15, %v4700_v11, %v644_v37  ;;  %vm1110_vm15 = vcmp.eq.s32.totalorder %v5236_v61, 5 }
 0x192   :  { %v653_v23 = vsel %vm650_vm1, %v652_v12, %v648_v41 }
 0x193   :  { %v663_v16 = vmul.f32 %v4702_v13, %v662_v9  ;;  %v675_v53 = vmul.f32 %v653_v23, %v632_v14 }
 0x195   :  { %v664_v43 = vadd.f32 %v4702_v13, %v663_v16  ;;  %v676_v3 = vadd.f32 %v675_v53, %v276_v27 }
 0x197   :  { %v668_v25 = vsel %vm667_vm4, %v4702_v13, %v664_v43  ;;  %4703 = vtanh.f32 %v676_v3  ;;  %v250_v43 = vadd.f32 %v5403_v57, %v5351_v48  ;;  %v6985_v57 = vmov 0.0  }
 0x198   :  { %v673_v24 = vsel %vm670_vm5, %v672_v29, %v668_v25 }
 0x199   :  { %v678_v34 = vsub.f32 1.0, %v673_v24  ;;  %v680_v44 = vmul.f32 %v673_v24, %v5375_v20 }
 0x19d   :  { %v4704_v11 = vpop.eup %4703 }
 0x19e   :  { %v679_v31 = vmul.f32 %v4704_v11, %v678_v34  ;;  %v5470_v34 = vsel %vm1003_vm6, 1.0, %v6985_v57 }
 0x19f   :  { %v1012_v11 = vsub.f32 1.0, %v5470_v34 }
 0x1a0   :  { %v5435_v36 = vadd.f32 %v680_v44, %v679_v31 }
 0x1a1   :  { %1015 = vperm.xlu1 %4667, %v1012_v11  }
 0x1a2   :  { %v702_v37 = vpack.c.bf16 %v5435_v36, %v5435_v36 }
 0x1a4   :  { %711 = vmatmul.bf16.vlgmr.msra.gmra.mxu0 %v702_v37  ;;  %724 = vmatmul.bf16.vlgmr.msra.gmra.mxu1 %v702_v37 }
 0x1a5   :  { %737 = vmatmul.bf16.vlgmr.msra.gmra.mxu2 %v702_v37  ;;  %943 = vmatpush.bf16.msra.mxu0 %v4994_v33 }
 0x1a6   :  { %1024 = vmatpush.bf16.msra.mxu1 %v4937_v10  ;;  %1037 = vmatpush.bf16.msra.mxu2 %v5101_v7 }
 0x1a9   :  { %944 = vmatpush.bf16.msra.mxu0 %v5022_v42 }
 0x1aa   :  { %1025 = vmatpush.bf16.msra.mxu1 %v4949_v15  ;;  %1038 = vmatpush.bf16.msra.mxu2 %v5127_v17 }
 0x1ad   :  { %945 = vmatpush.bf16.msra.mxu0 %v5048_v51 }
 0x1ae   :  { %1026 = vmatpush.bf16.msra.mxu1 %v4964_v21  ;;  %1039 = vmatpush.bf16.msra.mxu2 %v5165_v32 }
 0x1b1   :  { %946 = vmatpush.bf16.msra.mxu0 %v5072_v60 }
 0x1b2   :  { %1027 = vmatpush.bf16.msra.mxu1 %v4986_v30  ;;  %1040 = vmatpush.bf16.msra.mxu2 %v5190_v45 }
 0x1b5   :  { %947 = vmatpush.bf16.msra.mxu0 %v5099_v6 }
 0x1b6   :  { %1028 = vmatpush.bf16.msra.mxu1 %v5016_v40  ;;  %1041 = vmatpush.bf16.msra.mxu2 %v5203_v52 }
 0x1b9   :  { %948 = vmatpush.bf16.msra.mxu0 %v5152_v26 }
 0x1ba   :  { %1029 = vmatpush.bf16.msra.mxu1 %v5042_v49  ;;  %1042 = vmatpush.bf16.msra.mxu2 %v5221_v56 }
 0x1bd   :  { %949 = vmatpush.bf16.msra.mxu0 %v5171_v35 }
 0x1be   :  { %1030 = vmatpush.bf16.msra.mxu1 %v5066_v58  ;;  %1043 = vmatpush.bf16.msra.mxu2 %v5248_v0 }
 0x1c1   :  { %950 = vmatpush.bf16.msra.mxu0 %v5193_v46 }
 0x1c2   :  { %1031 = vmatpush.bf16.msra.mxu1 %v5096_v5  ;;  %1044 = vmatpush.bf16.msra.mxu2 %v5259_v8 }
 0x221   :  { %v712_v54 = vpop.f32.mrf.mxu0  ;;  %v725_v3 = vpop.f32.mrf.mxu1 }
 0x222   :  { %v713_v4 = vadd.f32 %v712_v54, %v5341_v22  ;;  %v726_v13 = vadd.f32 %v725_v3, %v5355_v55 }
 0x224   :  { %v742_v12 = vadd.f32 %v713_v4, %v5336_v19  ;;  %v762_v9 = vadd.f32 %v726_v13, %v250_v43 }
 0x226   :  { %v3619_v14 = vmul.f32 -1.442695, %v742_v12  ;;  %v3620_v41 = vmul.f32 -1.442695, %v762_v9 }
 0x228   :  { %4705 = vpow2.f32 %v3619_v14  ;;  %v738_v27 = vpop.f32.mrf.mxu2 }
 0x229   :  { %4707 = vpow2.f32 %v3620_v41  ;;  %v714_v23 = vpop.f32.mrf.mxu0  ;;  %v727_v16 = vpop.f32.mrf.mxu1  ;;  %v739_v41 = vadd.f32 %v738_v27, %v5361_v18 }
 0x22e   :  { %v4706_v38 = vpop.eup %4705 }
 0x22f   :  { %v4708_v53 = vpop.eup %4707  ;;  %v746_v29 = vadd.f32 1.0, %v4706_v38 }
 0x230   :  { %v766_v25 = vadd.f32 1.0, %v4708_v53  ;;  %v740_v24 = vpop.f32.mrf.mxu2  ;;  %v279_v53 = vadd.f32 %v5405_v59, %v5372_v50 }
 0x231   :  { %4709 = vrcp.f32 %v746_v29  ;;  %v758_v43 = vand.u32 2147483648, %v746_v29  ;;  %v756_v13 = vand.u32 2147483647, %v746_v29  ;;  %vm752_vm8 = vweird.f32 %v746_v29 }
 0x232   :  { %4711 = vrcp.f32 %v766_v25  ;;  %v778_v11 = vand.u32 2147483648, %v766_v25  ;;  %vm772_vm12 = vweird.f32 %v766_v25 }
 0x233   :  { %v759_v14 = vor.u32 1.1754944e-38, %v758_v43  ;;  %vm757_vm10 = vcmp.eq.f32.partialorder %v756_v13, 8.507059e+37 }
 0x237   :  { %v4710_v19 = vpop.eup %4709 }
 0x238   :  { %v4712_v31 = vpop.eup %4711  ;;  %v748_v44 = vmul.f32 %v4710_v19, %v746_v29  ;;  %vm753_vm7 = vweird.f32 %v4710_v19  ;;  %v779_v29 = vor.u32 1.1754944e-38, %v778_v11 }
 0x239   :  { %v768_v37 = vmul.f32 %v4712_v31, %v766_v25  ;;  %vm754_vm9 = vmor %vm752_vm8, %vm753_vm7  ;;  %vm773_vm11 = vweird.f32 %v4712_v31 }
 0x23a   :  { %v749_v54 = vsub.f32 1.0, %v748_v44  ;;  %v776_v44 = vand.u32 2147483647, %v766_v25  ;;  %vm774_vm13 = vmor %vm772_vm12, %vm773_vm11 }
 0x23b   :  { %v769_v3 = vsub.f32 1.0, %v768_v37 }
 0x23c   :  { %v750_v4 = vmul.f32 %v4710_v19, %v749_v54  ;;  %vm777_vm14 = vcmp.eq.f32.partialorder %v776_v44, 8.507059e+37 }
 0x23d   :  { %v770_v12 = vmul.f32 %v4712_v31, %v769_v3 }
 0x23e   :  { %v751_v9 = vadd.f32 %v4710_v19, %v750_v4 }
 0x23f   :  { %v771_v38 = vadd.f32 %v4712_v31, %v770_v12 }
 0x240   :  { %v755_v23 = vsel %vm754_vm9, %v4710_v19, %v751_v9 }
 0x241   :  { %v760_v16 = vsel %vm757_vm10, %v759_v14, %v755_v23  ;;  %v775_v54 = vsel %vm774_vm13, %v4712_v31, %v771_v38  ;;  %v252_v31 = vadd.f32 %v5407_v62, %v5351_v48 }
 0x242   :  { %v782_v24 = vmul.f32 %v760_v16, %v739_v41  ;;  %v780_v3 = vsel %vm777_vm14, %v779_v29, %v775_v54 }
 0x243   :  { %v785_v27 = vsub.f32 1.0, %v780_v3  ;;  %v787_v4 = vmul.f32 %v780_v3, %v5435_v36 }
 0x244   :  { %v783_v37 = vadd.f32 %v782_v24, %v279_v53 }
 0x246   :  { %4713 = vtanh.f32 %v783_v37 }
 0x24c   :  { %v4714_v19 = vpop.eup %4713 }
 0x24d   :  { %v786_v43 = vmul.f32 %v4714_v19, %v785_v27  ;;  %v3630_v19 = vsel %vm1110_vm15, 1.0, %v6985_v57 }
 0x24f   :  { %v5477_v13 = vadd.f32 %v787_v4, %v786_v43  ;;  %v4674_v4 = vpack.i.bf16 %v3630_v19, %v5470_v34 }
 0x251   :  { %v809_v59 = vpack.c.bf16 %v5477_v13, %v5477_v13  ;;  %4675 = vperm.xlu0 %4661, %v4674_v4  }
 0x253   :  { %818 = vmatmul.bf16.vlgmr.msrb.gmra.mxu3 %v809_v59  ;;  %831 = vmatmul.bf16.vlgmr.msrb.gmra.mxu0 %v809_v59 }
 0x254   :  { %844 = vmatmul.bf16.vlgmr.msrb.gmra.mxu1 %v809_v59  ;;  %1050 = vmatpush.bf16.msrb.mxu3 %v4994_v33 }
 0x255   :  { %1131 = vmatpush.bf16.msrb.mxu0 %v4937_v10  ;;  %1144 = vmatpush.bf16.msrb.mxu1 %v5101_v7 }
 0x258   :  { %1051 = vmatpush.bf16.msrb.mxu3 %v5022_v42 }
 0x259   :  { %1132 = vmatpush.bf16.msrb.mxu0 %v4949_v15  ;;  %1145 = vmatpush.bf16.msrb.mxu1 %v5127_v17 }
 0x25c   :  { %1052 = vmatpush.bf16.msrb.mxu3 %v5048_v51 }
 0x25d   :  { %1133 = vmatpush.bf16.msrb.mxu0 %v4964_v21  ;;  %1146 = vmatpush.bf16.msrb.mxu1 %v5165_v32 }
 0x260   :  { %1053 = vmatpush.bf16.msrb.mxu3 %v5072_v60 }
 0x261   :  { %1134 = vmatpush.bf16.msrb.mxu0 %v4986_v30  ;;  %1147 = vmatpush.bf16.msrb.mxu1 %v5190_v45 }
 0x264   :  { %1054 = vmatpush.bf16.msrb.mxu3 %v5099_v6 }
 0x265   :  { %1135 = vmatpush.bf16.msrb.mxu0 %v5016_v40  ;;  %1148 = vmatpush.bf16.msrb.mxu1 %v5203_v52 }
 0x268   :  { %1055 = vmatpush.bf16.msrb.mxu3 %v5152_v26 }
 0x269   :  { %1136 = vmatpush.bf16.msrb.mxu0 %v5042_v49  ;;  %1149 = vmatpush.bf16.msrb.mxu1 %v5221_v56 }
 0x26c   :  { %1056 = vmatpush.bf16.msrb.mxu3 %v5171_v35 }
 0x26d   :  { %1137 = vmatpush.bf16.msrb.mxu0 %v5066_v58  ;;  %1150 = vmatpush.bf16.msrb.mxu1 %v5248_v0 }
 0x270   :  { %1057 = vmatpush.bf16.msrb.mxu3 %v5193_v46 }
 0x271   :  { %1138 = vmatpush.bf16.msrb.mxu0 %v5096_v5  ;;  %1151 = vmatpush.bf16.msrb.mxu1 %v5259_v8 }
 0x2d0   :  { %v832_v25 = vpop.f32.mrf.mxu0 }
 0x2d1   :  { %v833_v12 = vadd.f32 %v832_v25, %v5355_v55  ;;  %v845_v9 = vpop.f32.mrf.mxu1 }
 0x2d3   :  { %v869_v14 = vadd.f32 %v833_v12, %v252_v31 }
 0x2d5   :  { %v3623_v41 = vmul.f32 -1.442695, %v869_v14 }
 0x2d6   :  { %v819_v23 = vpop.f32.mrf.mxu3 }
 0x2d7   :  { %4715 = vpow2.f32 %v3623_v41  ;;  %v820_v16 = vadd.f32 %v819_v23, %v5341_v22 }
 0x2d8   :  { %v834_v38 = vpop.f32.mrf.mxu0 }
 0x2d9   :  { %v849_v53 = vadd.f32 %v820_v16, %v5344_v28  ;;  %v847_v24 = vpop.f32.mrf.mxu1  ;;  %v1119_v28 = vsub.f32 1.0, %v3630_v19  ;;  %v846_v38 = vadd.f32 %v845_v9, %v5361_v18 }
 0x2db   :  { %v3622_v11 = vmul.f32 -1.442695, %v849_v53  ;;  %1122 = vperm.xlu2 %4673, %v1119_v28  }
 0x2dd   :  { %v4716_v44 = vpop.eup %4715  ;;  %4717 = vpow2.f32 %v3622_v11  ;;  %v281_v11 = vadd.f32 %v5409_v63, %v5372_v50 }
 0x2de   :  { %v873_v37 = vadd.f32 1.0, %v4716_v44  ;;  %v821_v54 = vpop.f32.mrf.mxu3 }
 0x2e0   :  { %4719 = vrcp.f32 %v873_v37  ;;  %v885_v44 = vand.u32 2147483648, %v873_v37  ;;  %vm879_vm6 = vweird.f32 %v873_v37 }
 0x2e3   :  { %v4718_v62 = vpop.eup %4717 }
 0x2e4   :  { %v853_v29 = vadd.f32 1.0, %v4718_v62  ;;  %v883_v62 = vand.u32 2147483647, %v873_v37 }
 0x2e6   :  { %4721 = vrcp.f32 %v853_v29  ;;  %v4720_v3 = vpop.eup %4719  ;;  %v865_v12 = vand.u32 2147483648, %v853_v29  ;;  %v863_v41 = vand.u32 2147483647, %v853_v29  ;;  %vm859_vm2 = vweird.f32 %v853_v29 }
 0x2e7   :  { %v875_v27 = vmul.f32 %v4720_v3, %v873_v37  ;;  %vm880_vm5 = vweird.f32 %v4720_v3  ;;  %vm884_vm8 = vcmp.eq.f32.partialorder %v883_v62, 8.507059e+37 }
 0x2e8   :  { %v866_v61 = vor.u32 1.1754944e-38, %v865_v12  ;;  %vm864_vm4 = vcmp.eq.f32.partialorder %v863_v41, 8.507059e+37  ;;  %vm881_vm7 = vmor %vm879_vm6, %vm880_vm5 }
 0x2e9   :  { %v876_v25 = vsub.f32 1.0, %v875_v27 }
 0x2eb   :  { %v877_v23 = vmul.f32 %v4720_v3, %v876_v25 }
 0x2ec   :  { %v4722_v43 = vpop.eup %4721 }
 0x2ed   :  { %v855_v59 = vmul.f32 %v4722_v43, %v853_v29  ;;  %vm860_vm1 = vweird.f32 %v4722_v43  ;;  %v878_v24 = vadd.f32 %v4720_v3, %v877_v23  ;;  %v886_v29 = vor.u32 1.1754944e-38, %v885_v44 }
 0x2ee   :  { %vm861_vm3 = vmor %vm859_vm2, %vm860_vm1 }
 0x2ef   :  { %v856_v31 = vsub.f32 1.0, %v855_v59  ;;  %v882_v19 = vsel %vm881_vm7, %v4720_v3, %v878_v24 }
 0x2f0   :  { %v887_v4 = vsel %vm884_vm8, %v886_v29, %v882_v19  ;;  %v284_v19 = vadd.f32 %v5413_v2, %v5372_v50 }
 0x2f1   :  { %v857_v14 = vmul.f32 %v4722_v43, %v856_v31  ;;  %v892_v9 = vsub.f32 1.0, %v887_v4  ;;  %v894_v59 = vmul.f32 %v887_v4, %v5477_v13 }
 0x2f3   :  { %v858_v16 = vadd.f32 %v4722_v43, %v857_v14 }
 0x2f5   :  { %v862_v53 = vsel %vm861_vm3, %v4722_v43, %v858_v16 }
 0x2f6   :  { %v867_v34 = vsel %vm864_vm4, %v866_v61, %v862_v53 }
 0x2f7   :  { %v889_v54 = vmul.f32 %v867_v34, %v846_v38 }
 0x2f9   :  { %v890_v27 = vadd.f32 %v889_v54, %v281_v11 }
 0x2fb   :  { %4723 = vtanh.f32 %v890_v27 }
 0x301   :  { %v4724_v43 = vpop.eup %4723 }
 0x302   :  { %v893_v28 = vmul.f32 %v4724_v43, %v892_v9 }
 0x304   :  { %v5517_v25 = vadd.f32 %v894_v59, %v893_v28 }
 0x306   :  { %v916_v63 = vpack.c.bf16 %v5517_v25, %v5517_v25 }
 0x308   :  { %925 = vmatmul.bf16.vlgmr.msrb.gmra.mxu2 %v916_v63  ;;  %938 = vmatmul.bf16.vlgmr.msra.gmra.mxu3 %v916_v63 }
 0x309   :  { %951 = vmatmul.bf16.vlgmr.msra.gmra.mxu0 %v916_v63  ;;  %1157 = vmatpush.bf16.msrb.mxu2 %v4994_v33 }
 0x30a   :  { %1238 = vmatpush.bf16.msra.mxu3 %v4937_v10  ;;  %1251 = vmatpush.bf16.msra.mxu0 %v5101_v7 }
 0x30d   :  { %1158 = vmatpush.bf16.msrb.mxu2 %v5022_v42 }
 0x30e   :  { %1239 = vmatpush.bf16.msra.mxu3 %v4949_v15  ;;  %1252 = vmatpush.bf16.msra.mxu0 %v5127_v17 }
 0x311   :  { %1159 = vmatpush.bf16.msrb.mxu2 %v5048_v51 }
 0x312   :  { %1240 = vmatpush.bf16.msra.mxu3 %v4964_v21  ;;  %1253 = vmatpush.bf16.msra.mxu0 %v5165_v32 }
 0x315   :  { %1160 = vmatpush.bf16.msrb.mxu2 %v5072_v60 }
 0x316   :  { %1241 = vmatpush.bf16.msra.mxu3 %v4986_v30  ;;  %1254 = vmatpush.bf16.msra.mxu0 %v5190_v45  ;;  %v255_v30 = vadd.f32 %v5411_v1, %v5351_v48  ;;  %v5553_v1 = vld [vmem:[%s6961_s0] sm:$0xff] }
 0x317   :  { %vm1217_vm9 = vcmp.eq.s32.totalorder %v5553_v1, 6  ;;  %vm1324_vm3 = vcmp.eq.s32.totalorder %v5553_v1, 7 }
 0x319   :  { %1161 = vmatpush.bf16.msrb.mxu2 %v5099_v6 }
 0x31a   :  { %1242 = vmatpush.bf16.msra.mxu3 %v5016_v40  ;;  %1255 = vmatpush.bf16.msra.mxu0 %v5203_v52 }
 0x31d   :  { %1162 = vmatpush.bf16.msrb.mxu2 %v5152_v26 }
 0x31e   :  { %1243 = vmatpush.bf16.msra.mxu3 %v5042_v49  ;;  %1256 = vmatpush.bf16.msra.mxu0 %v5221_v56 }
 0x321   :  { %1163 = vmatpush.bf16.msrb.mxu2 %v5171_v35 }
 0x322   :  { %1244 = vmatpush.bf16.msra.mxu3 %v5066_v58  ;;  %1257 = vmatpush.bf16.msra.mxu0 %v5248_v0 }
 0x325   :  { %1164 = vmatpush.bf16.msrb.mxu2 %v5193_v46 }
 0x326   :  { %1245 = vmatpush.bf16.msra.mxu3 %v5096_v5  ;;  %1258 = vmatpush.bf16.msra.mxu0 %v5259_v8 }
 0x386   :  { %v952_v10 = vpop.f32.mrf.mxu0 }
 0x387   :  { %v953_v44 = vadd.f32 %v952_v10, %v5361_v18 }
 0x38b   :  { %v926_v15 = vpop.f32.mrf.mxu2  ;;  %v939_v21 = vpop.f32.mrf.mxu3 }
 0x38c   :  { %v927_v40 = vadd.f32 %v926_v15, %v5341_v22  ;;  %v940_v49 = vadd.f32 %v939_v21, %v5355_v55 }
 0x38e   :  { %v956_v58 = vadd.f32 %v927_v40, %v5346_v39  ;;  %v976_v7 = vadd.f32 %v940_v49, %v255_v30  ;;  %v954_v17 = vpop.f32.mrf.mxu0  ;;  %v5557_v39 = vsel %vm1217_vm9, 1.0, %v6985_v57 }
 0x38f   :  { %v1226_v31 = vsub.f32 1.0, %v5557_v39 }
 0x390   :  { %v3625_v32 = vmul.f32 -1.442695, %v956_v58  ;;  %v3626_v45 = vmul.f32 -1.442695, %v976_v7 }
 0x391   :  { %1229 = vperm.xlu1 %4667, %v1226_v31  }
 0x392   :  { %4725 = vpow2.f32 %v3625_v32 }
 0x393   :  { %4727 = vpow2.f32 %v3626_v45  ;;  %v928_v5 = vpop.f32.mrf.mxu2  ;;  %v941_v52 = vpop.f32.mrf.mxu3 }
 0x398   :  { %v4726_v56 = vpop.eup %4725 }
 0x399   :  { %v4728_v0 = vpop.eup %4727  ;;  %v960_v8 = vadd.f32 1.0, %v4726_v56 }
 0x39a   :  { %v980_v37 = vadd.f32 1.0, %v4728_v0  ;;  %v3636_v0 = vsel %vm1324_vm3, 1.0, %v6985_v57 }
 0x39b   :  { %4729 = vrcp.f32 %v960_v8  ;;  %v972_v16 = vand.u32 2147483648, %v960_v8  ;;  %v970_v53 = vand.u32 2147483647, %v960_v8  ;;  %vm966_vm11 = vweird.f32 %v960_v8 }
 0x39c   :  { %4731 = vrcp.f32 %v980_v37  ;;  %v992_v29 = vand.u32 2147483648, %v980_v37  ;;  %vm986_vm15 = vweird.f32 %v980_v37  ;;  %v990_v9 = vand.u32 2147483647, %v980_v37 }
 0x39d   :  { %v973_v11 = vor.u32 1.1754944e-38, %v972_v16  ;;  %vm971_vm13 = vcmp.eq.f32.partialorder %v970_v53, 8.507059e+37  ;;  %v1333_v31 = vsub.f32 1.0, %v3636_v0 }
 0x39e   :  { %v993_v59 = vor.u32 1.1754944e-38, %v992_v29  ;;  %vm991_vm2 = vcmp.eq.f32.partialorder %v990_v9, 8.507059e+37 }
 0x39f   :  { %1336 = vperm.xlu2 %4673, %v1333_v31  }
 0x3a1   :  { %v4730_v3 = vpop.eup %4729 }
 0x3a2   :  { %v4732_v12 = vpop.eup %4731  ;;  %v962_v14 = vmul.f32 %v4730_v3, %v960_v8  ;;  %vm967_vm10 = vweird.f32 %v4730_v3 }
 0x3a3   :  { %v982_v41 = vmul.f32 %v4732_v12, %v980_v37  ;;  %vm968_vm12 = vmor %vm966_vm11, %vm967_vm10  ;;  %vm987_vm14 = vweird.f32 %v4732_v12 }
 0x3a4   :  { %v963_v23 = vsub.f32 1.0, %v962_v14  ;;  %vm988_vm1 = vmor %vm986_vm15, %vm987_vm14 }
 0x3a5   :  { %v983_v61 = vsub.f32 1.0, %v982_v41 }
 0x3a6   :  { %v964_v38 = vmul.f32 %v4730_v3, %v963_v23 }
 0x3a7   :  { %v984_v34 = vmul.f32 %v4732_v12, %v983_v61 }
 0x3a8   :  { %v965_v24 = vadd.f32 %v4730_v3, %v964_v38 }
 0x3a9   :  { %v985_v27 = vadd.f32 %v4732_v12, %v984_v34 }
 0x3aa   :  { %v969_v54 = vsel %vm968_vm12, %v4730_v3, %v965_v24  ;;  %v4679_v3 = vpack.i.bf16 %v3636_v0, %v5557_v39  ;;  %v6987_v39 = vld [vmem:[#allocation11_spill] sm:$0xff] }
 0x3ab   :  { %v974_v62 = vsel %vm971_vm13, %v973_v11, %v969_v54  ;;  %v989_v28 = vsel %vm988_vm1, %v4732_v12, %v985_v27  ;;  %v286_v24 = vadd.f32 %v6987_v39, %v5372_v50 }
 0x3ac   :  { %v996_v4 = vmul.f32 %v974_v62, %v953_v44  ;;  %v994_v63 = vsel %vm991_vm2, %v993_v59, %v989_v28  ;;  %4680 = vperm.xlu0 %4661, %v4679_v3  }
 0x3ad   :  { %v999_v10 = vsub.f32 1.0, %v994_v63  ;;  %v1001_v30 = vmul.f32 %v994_v63, %v5517_v25 }
 0x3ae   :  { %v997_v43 = vadd.f32 %v996_v4, %v284_v19 }
 0x3b0   :  { %4733 = vtanh.f32 %v997_v43 }
 0x3b6   :  { %v4734_v15 = vpop.eup %4733 }
 0x3b7   :  { %v1000_v21 = vmul.f32 %v4734_v15, %v999_v10 }
 0x3b9   :  { %v5564_v40 = vadd.f32 %v1001_v30, %v1000_v21 }
 0x3bb   :  { %v1023_v2 = vpack.c.bf16 %v5564_v40, %v5564_v40 }
 0x3bd   :  { %1032 = vmatmul.bf16.vlgmr.msra.gmra.mxu1 %v1023_v2  ;;  %1045 = vmatmul.bf16.vlgmr.msra.gmra.mxu2 %v1023_v2 }
 0x3be   :  { %1058 = vmatmul.bf16.vlgmr.msrb.gmra.mxu3 %v1023_v2  ;;  %1264 = vmatpush.bf16.msra.mxu1 %v4994_v33 }
 0x3c2   :  { %1265 = vmatpush.bf16.msra.mxu1 %v5022_v42  ;;  %v6986_v42 = vld [vmem:[#allocation10_spill] sm:$0xff] }
 0x3c6   :  { %1266 = vmatpush.bf16.msra.mxu1 %v5048_v51  ;;  %v257_v51 = vadd.f32 %v6986_v42, %v5351_v48 }
 0x3ca   :  { %1267 = vmatpush.bf16.msra.mxu1 %v5072_v60 }
 0x3ce   :  { %1268 = vmatpush.bf16.msra.mxu1 %v5099_v6 }
 0x3d2   :  { %1269 = vmatpush.bf16.msra.mxu1 %v5152_v26 }
 0x3d6   :  { %1270 = vmatpush.bf16.msra.mxu1 %v5171_v35 }
 0x3da   :  { %1271 = vmatpush.bf16.msra.mxu1 %v5193_v46 }
 0x43a   :  { %v1033_v49 = vpop.f32.mrf.mxu1 }
 0x43b   :  { %v1034_v58 = vadd.f32 %v1033_v49, %v5341_v22  ;;  %v6988_v49 = vld [vmem:[#allocation12_spill] sm:$0xff] }
 0x43d   :  { %v1063_v7 = vadd.f32 %v1034_v58, %v5348_v47  ;;  %v260_v58 = vadd.f32 %v6988_v49, %v5351_v48 }
 0x43f   :  { %v3628_v33 = vmul.f32 -1.442695, %v1063_v7 }
 0x440   :  { %v1046_v17 = vpop.f32.mrf.mxu2 }
 0x441   :  { %4735 = vpow2.f32 %v3628_v33  ;;  %v1047_v60 = vadd.f32 %v1046_v17, %v5355_v55  ;;  %v1059_v6 = vpop.f32.mrf.mxu3  ;;  %v6989_v17 = vld [vmem:[#allocation8_spill] sm:$0xff] }
 0x442   :  { %v1035_v32 = vpop.f32.mrf.mxu1  ;;  %v1060_v53 = vadd.f32 %v1059_v6, %v5361_v18 }
 0x443   :  { %v1083_v26 = vadd.f32 %v1047_v60, %v257_v51 }
 0x445   :  { %v3629_v45 = vmul.f32 -1.442695, %v1083_v26 }
 0x447   :  { %v4736_v35 = vpop.eup %4735  ;;  %4737 = vpow2.f32 %v3629_v45 }
 0x448   :  { %v1067_v46 = vadd.f32 1.0, %v4736_v35  ;;  %v1048_v5 = vpop.f32.mrf.mxu2 }
 0x449   :  { %v1061_v52 = vpop.f32.mrf.mxu3 }
 0x44a   :  { %4739 = vrcp.f32 %v1067_v46  ;;  %v1079_v14 = vand.u32 2147483648, %v1067_v46  ;;  %v1077_v23 = vand.u32 2147483647, %v1067_v46  ;;  %vm1073_vm5 = vweird.f32 %v1067_v46 }
 0x44c   :  { %v1080_v1 = vor.u32 1.1754944e-38, %v1079_v14  ;;  %vm1078_vm7 = vcmp.eq.f32.partialorder %v1077_v23, 8.507059e+37 }
 0x44d   :  { %v4738_v56 = vpop.eup %4737 }
 0x44e   :  { %v1087_v47 = vadd.f32 1.0, %v4738_v56 }
 0x450   :  { %v4740_v8 = vpop.eup %4739  ;;  %4741 = vrcp.f32 %v1087_v47  ;;  %v1099_v54 = vand.u32 2147483648, %v1087_v47  ;;  %v1097_v27 = vand.u32 2147483647, %v1087_v47  ;;  %vm1093_vm9 = vweird.f32 %v1087_v47 }
 0x451   :  { %v1069_v37 = vmul.f32 %v4740_v8, %v1067_v46  ;;  %vm1074_vm4 = vweird.f32 %v4740_v8 }
 0x452   :  { %vm1075_vm6 = vmor %vm1073_vm5, %vm1074_vm4  ;;  %v1100_v4 = vor.u32 1.1754944e-38, %v1099_v54  ;;  %vm1098_vm11 = vcmp.eq.f32.partialorder %v1097_v27, 8.507059e+37 }
 0x453   :  { %v1070_v12 = vsub.f32 1.0, %v1069_v37 }
 0x455   :  { %v1071_v41 = vmul.f32 %v4740_v8, %v1070_v12 }
 0x456   :  { %v4742_v16 = vpop.eup %4741 }
 0x457   :  { %v1089_v61 = vmul.f32 %v4742_v16, %v1087_v47  ;;  %v1072_v38 = vadd.f32 %v4740_v8, %v1071_v41  ;;  %vm1094_vm8 = vweird.f32 %v4742_v16 }
 0x458   :  { %vm1095_vm10 = vmor %vm1093_vm9, %vm1094_vm8 }
 0x459   :  { %v1090_v57 = vsub.f32 1.0, %v1089_v61  ;;  %v1076_v34 = vsel %vm1075_vm6, %v4740_v8, %v1072_v38 }
 0x45a   :  { %v1081_v11 = vsel %vm1078_vm7, %v1080_v1, %v1076_v34  ;;  %v6990_v34 = vld [vmem:[#allocation13_spill] sm:$0xff] }
 0x45b   :  { %v1091_v44 = vmul.f32 %v4742_v16, %v1090_v57  ;;  %v1103_v62 = vmul.f32 %v1081_v11, %v1060_v53  ;;  %v289_v39 = vadd.f32 %v6990_v34, %v5372_v50 }
 0x45d   :  { %v1092_v19 = vadd.f32 %v4742_v16, %v1091_v44  ;;  %v1104_v29 = vadd.f32 %v1103_v62, %v286_v24 }
 0x45f   :  { %v1096_v9 = vsel %vm1095_vm10, %v4742_v16, %v1092_v19  ;;  %4743 = vtanh.f32 %v1104_v29 }
 0x460   :  { %v1101_v43 = vsel %vm1098_vm11, %v1100_v4, %v1096_v9 }
 0x461   :  { %v1106_v28 = vsub.f32 1.0, %v1101_v43  ;;  %v1108_v10 = vmul.f32 %v1101_v43, %v5564_v40 }
 0x465   :  { %v4744_v59 = vpop.eup %4743 }
 0x466   :  { %v1107_v63 = vmul.f32 %v4744_v59, %v1106_v28 }
 0x468   :  { %v5588_v15 = vadd.f32 %v1108_v10, %v1107_v63  ;;  %v4475_v63 = vld [vmem:[%s6967_s6 + $0x38] sm:$0xff]  ;;  %v4664_v10 = vpop.permute.xlu0 %4663 }
 0x469   :  { %1410 = vmatpush.bf16.msra.mxu2 %v4475_v63 }
 0x46a   :  { %v1130_v21 = vpack.c.bf16 %v5588_v15, %v5588_v15 }
 0x46c   :  { %1139 = vmatmul.bf16.vlgmr.msrb.gmra.mxu0 %v1130_v21  ;;  %1152 = vmatmul.bf16.vlgmr.msrb.gmra.mxu1 %v1130_v21 }
 0x46d   :  { %1165 = vmatmul.bf16.vlgmr.msrb.gmra.mxu2 %v1130_v21 }
 0x4e9   :  { %v1140_v30 = vpop.f32.mrf.mxu0  ;;  %v1153_v2 = vpop.f32.mrf.mxu1 }
 0x4ea   :  { %v1141_v7 = vadd.f32 %v1140_v30, %v5341_v22  ;;  %v1154_v33 = vadd.f32 %v1153_v2, %v5355_v55  ;;  %v4474_v30 = vld [vmem:[%s6967_s6 + $0x30] sm:$0xff] }
 0x4eb   :  { %v6991_v2 = vld [vmem:[#allocation14_spill] sm:$0xff]  ;;  %1411 = vmatpush.bf16.msra.mxu2 %v4474_v30 }
 0x4ec   :  { %v1170_v42 = vadd.f32 %v1141_v7, %v6989_v17  ;;  %v1190_v51 = vadd.f32 %v1154_v33, %v260_v58  ;;  %v262_v49 = vadd.f32 %v6991_v2, %v5351_v48  ;;  %v4473_v17 = vld [vmem:[%s6967_s6 + $0x28] sm:$0xff]  ;;  %v4472_v48 = vld [vmem:[%s6967_s6 + $0x20] sm:$0xff] }
 0x4ee   :  { %v3631_v60 = vmul.f32 -1.442695, %v1170_v42  ;;  %v3632_v6 = vmul.f32 -1.442695, %v1190_v51  ;;  %v4665_v51 = vunpack.i.l.bf16 %v4664_v10 }
 0x4ef   :  { %1412 = vmatpush.bf16.msra.mxu2 %v4473_v17 }
 0x4f0   :  { %4745 = vpow2.f32 %v3631_v60  ;;  %v1166_v32 = vpop.f32.mrf.mxu2 }
 0x4f1   :  { %4747 = vpow2.f32 %v3632_v6  ;;  %v1142_v26 = vpop.f32.mrf.mxu0  ;;  %v1155_v45 = vpop.f32.mrf.mxu1  ;;  %v1167_v38 = vadd.f32 %v1166_v32, %v5361_v18 }
 0x4f2   :  { %v588_v6 = vpop.permute.xlu0 %587  ;;  %v695_v32 = vpop.permute.xlu1 %694  ;;  %v6992_v45 = vld [vmem:[#allocation9_spill] sm:$0xff] }
 0x4f3   :  { %1413 = vmatpush.bf16.msra.mxu2 %v4472_v48 }
 0x4f6   :  { %v4746_v35 = vpop.eup %4745 }
 0x4f7   :  { %v4748_v46 = vpop.eup %4747  ;;  %v1174_v5 = vadd.f32 1.0, %v4746_v35 }
 0x4f8   :  { %v1194_v52 = vadd.f32 1.0, %v4748_v46  ;;  %v1168_v56 = vpop.f32.mrf.mxu2 }
 0x4f9   :  { %4749 = vrcp.f32 %v1174_v5  ;;  %v1186_v12 = vand.u32 2147483648, %v1174_v5  ;;  %v1184_v41 = vand.u32 2147483647, %v1174_v5  ;;  %vm1180_vm13 = vweird.f32 %v1174_v5  ;;  %v4471_v56 = vld [vmem:[%s6967_s6 + $0x18] sm:$0xff] }
 0x4fa   :  { %4751 = vrcp.f32 %v1194_v52  ;;  %v1206_v11 = vand.u32 2147483648, %v1194_v52  ;;  %vm1200_vm2 = vweird.f32 %v1194_v52  ;;  %v1204_v44 = vand.u32 2147483647, %v1194_v52  ;;  %1414 = vmatpush.bf16.msra.mxu2 %v4471_v56 }
 0x4fb   :  { %v1187_v61 = vor.u32 1.1754944e-38, %v1186_v12  ;;  %vm1185_vm15 = vcmp.eq.f32.partialorder %v1184_v41, 8.507059e+37 }
 0x4fc   :  { %v1207_v27 = vor.u32 1.1754944e-38, %v1206_v11  ;;  %vm1205_vm4 = vcmp.eq.f32.partialorder %v1204_v44, 8.507059e+37 }
 0x4ff   :  { %v4750_v47 = vpop.eup %4749 }
 0x500   :  { %v4752_v0 = vpop.eup %4751  ;;  %v1176_v8 = vmul.f32 %v4750_v47, %v1174_v5  ;;  %vm1181_vm12 = vweird.f32 %v4750_v47  ;;  %v583_v5 = vmul.f32 %v4665_v51, %v5375_v20  ;;  %v4670_v20 = vpop.permute.xlu1 %4669 }
 0x501   :  { %v1196_v37 = vmul.f32 %v4752_v0, %v1194_v52  ;;  %vm1182_vm14 = vmor %vm1180_vm13, %vm1181_vm12  ;;  %vm1201_vm1 = vweird.f32 %v4752_v0  ;;  %v590_v52 = vmul.f32 0.0, %v588_v6  ;;  %v4671_v41 = vunpack.i.l.bf16 %v4670_v20 }
 0x502   :  { %v1177_v3 = vsub.f32 1.0, %v1176_v8  ;;  %vm1202_vm3 = vmor %vm1200_vm2, %vm1201_vm1 }
 0x503   :  { %v1197_v31 = vsub.f32 1.0, %v1196_v37 }
 0x504   :  { %v1178_v14 = vmul.f32 %v4750_v47, %v1177_v3 }
 0x505   :  { %v1198_v23 = vmul.f32 %v4752_v0, %v1197_v31  ;;  %v4470_v31 = vld [vmem:[%s6967_s6 + $0x10] sm:$0xff] }
 0x506   :  { %v1179_v16 = vadd.f32 %v4750_v47, %v1178_v14  ;;  %1415 = vmatpush.bf16.msra.mxu2 %v4470_v31 }
 0x507   :  { %v1199_v53 = vadd.f32 %v4752_v0, %v1198_v23  ;;  %v4469_v23 = vld [vmem:[%s6967_s6 + $0x8] sm:$0xff] }
 0x508   :  { %v1183_v1 = vsel %vm1182_vm14, %v4750_v47, %v1179_v16  ;;  %v1016_v63 = vpop.permute.xlu1 %1015 }
 0x509   :  { %v1188_v57 = vsel %vm1185_vm15, %v1187_v61, %v1183_v1  ;;  %v1203_v62 = vsel %vm1202_vm3, %v4752_v0, %v1199_v53  ;;  %v4666_v0 = vunpack.i.h.bf16 %v4664_v10  ;;  %v802_v61 = vpop.permute.xlu2 %801 }
 0x50a   :  { %v1210_v24 = vmul.f32 %v1188_v57, %v1167_v38  ;;  %v1208_v19 = vsel %vm1205_vm4, %v1207_v27, %v1203_v62  ;;  %v797_v57 = vmul.f32 %v4671_v41, %v5477_v13  ;;  %1416 = vmatpush.bf16.msra.mxu2 %v4469_v23 }
 0x50b   :  { %v1213_v29 = vsub.f32 1.0, %v1208_v19  ;;  %v1215_v43 = vmul.f32 %v1208_v19, %v5588_v15  ;;  %v690_v12 = vmul.f32 %v4666_v0, %v5435_v36  ;;  %v4468_v36 = vld [vmem:[%s6967_s6] sm:$0xff] }
 0x50c   :  { %v1211_v54 = vadd.f32 %v1210_v24, %v289_v39  ;;  %v4672_v39 = vunpack.i.h.bf16 %v4670_v20 }
 0x50e   :  { %4753 = vtanh.f32 %v1211_v54  ;;  %1417 = vmatpush.bf16.msra.mxu2 %v4468_v36  ;;  %v4676_v54 = vpop.permute.xlu0 %4675  ;;  %v904_v27 = vmul.f32 %v4672_v39, %v5517_v25 }
 0x511   :  { %v909_v44 = vpop.permute.xlu2 %908 }
 0x514   :  { %v4754_v4 = vpop.eup %4753 }
 0x515   :  { %v1214_v9 = vmul.f32 %v4754_v4, %v1213_v29  ;;  %v4677_v29 = vunpack.i.l.bf16 %v4676_v54 }
 0x516   :  { %v4681_v48 = vpop.permute.xlu0 %4680 }
 0x517   :  { %v5601_v28 = vadd.f32 %v1215_v43, %v1214_v9  ;;  %v1011_v30 = vmul.f32 %v4677_v29, %v5564_v40 }
 0x519   :  { %v1237_v59 = vpack.c.bf16 %v5601_v28, %v5601_v28  ;;  %v1123_v40 = vpop.permute.xlu2 %1122 }
 0x51b   :  { %1246 = vmatmul.bf16.vlgmr.msra.gmra.mxu3 %v1237_v59  ;;  %1259 = vmatmul.bf16.vlgmr.msra.gmra.mxu0 %v1237_v59 }
 0x51c   :  { %1272 = vmatmul.bf16.vlgmr.msra.gmra.mxu1 %v1237_v59 }
 0x598   :  { %v1260_v21 = vpop.f32.mrf.mxu0 }
 0x599   :  { %v1261_v58 = vadd.f32 %v1260_v21, %v5355_v55  ;;  %v5614_v7 = vpop.f32.mrf.mxu1 }
 0x59a   :  { %v1274_v17 = vadd.f32 %v5614_v7, %v5361_v18 }
 0x59b   :  { %v1297_v33 = vadd.f32 %v1261_v58, %v262_v49 }
 0x59d   :  { %v3635_v42 = vmul.f32 -1.442695, %v1297_v33  ;;  %v4678_v33 = vunpack.i.h.bf16 %v4676_v54 }
 0x59e   :  { %v1247_v60 = vpop.f32.mrf.mxu3 }
 0x59f   :  { %4755 = vpow2.f32 %v3635_v42  ;;  %v1248_v26 = vadd.f32 %v1247_v60, %v5341_v22  ;;  %v591_v22 = vadd.f32 %v590_v52, %v583_v5  ;;  %v4682_v5 = vunpack.i.l.bf16 %v4681_v48 }
 0x5a0   :  { %v1262_v55 = vpop.f32.mrf.mxu0 }
 0x5a1   :  { %v1277_v35 = vadd.f32 %v1248_v26, %v6992_v45  ;;  %v1275_v46 = vpop.f32.mrf.mxu1  ;;  %v697_v14 = vmul.f32 %v695_v32, %v591_v22  ;;  %v6993_v32 = vld [vmem:[#allocation15_spill] sm:$0xff] }
 0x5a2   :  { %v291_v26 = vadd.f32 %v6993_v32, %v5372_v50  ;;  %v1230_v50 = vpop.permute.xlu1 %1229 }
 0x5a3   :  { %v3634_v47 = vmul.f32 -1.442695, %v1277_v35  ;;  %v698_v38 = vadd.f32 %v697_v14, %v690_v12  ;;  %v1118_v35 = vmul.f32 %v4678_v33, %v5588_v15  ;;  %v1337_v12 = vpop.permute.xlu2 %1336  ;;  %v4683_v14 = vunpack.i.h.bf16 %v4681_v48 }
 0x5a5   :  { %v4756_v8 = vpop.eup %4755  ;;  %4757 = vpow2.f32 %v3634_v47  ;;  %v804_v34 = vmul.f32 %v802_v61, %v698_v38 }
 0x5a6   :  { %v5628_v37 = vadd.f32 1.0, %v4756_v8  ;;  %v1249_v3 = vpop.f32.mrf.mxu3  ;;  %v1225_v8 = vmul.f32 %v4682_v5, %v5601_v28 }
 0x5a7   :  { %v805_v24 = vadd.f32 %v804_v34, %v797_v57 }
 0x5a8   :  { %4759 = vrcp.f32 %v5628_v37  ;;  %v1313_v55 = vand.u32 2147483648, %v5628_v37  ;;  %vm1307_vm10 = vweird.f32 %v5628_v37  ;;  %v1311_v18 = vand.u32 2147483647, %v5628_v37 }
 0x5a9   :  { %v911_v13 = vmul.f32 %v909_v44, %v805_v24 }
 0x5aa   :  { %v1314_v56 = vor.u32 1.1754944e-38, %v1313_v55  ;;  %vm1312_vm12 = vcmp.eq.f32.partialorder %v1311_v18, 8.507059e+37 }
 0x5ab   :  { %v4758_v16 = vpop.eup %4757  ;;  %v912_v43 = vadd.f32 %v911_v13, %v904_v27 }
 0x5ac   :  { %v1281_v1 = vadd.f32 1.0, %v4758_v16 }
 0x5ad   :  { %v1018_v58 = vmul.f32 %v1016_v63, %v912_v43 }
 0x5ae   :  { %4761 = vrcp.f32 %v1281_v1  ;;  %v4760_v53 = vpop.eup %4759  ;;  %v1293_v59 = vand.u32 2147483648, %v1281_v1  ;;  %v1291_v21 = vand.u32 2147483647, %v1281_v1  ;;  %vm1287_vm6 = vweird.f32 %v1281_v1 }
 0x5af   :  { %v1303_v11 = vmul.f32 %v4760_v53, %v5628_v37  ;;  %v1019_v51 = vadd.f32 %v1018_v58, %v1011_v30  ;;  %vm1308_vm9 = vweird.f32 %v4760_v53 }
 0x5b0   :  { %v1294_v25 = vor.u32 1.1754944e-38, %v1293_v59  ;;  %vm1292_vm8 = vcmp.eq.f32.partialorder %v1291_v21, 8.507059e+37  ;;  %vm1309_vm11 = vmor %vm1307_vm10, %vm1308_vm9 }
 0x5b1   :  { %v1304_v4 = vsub.f32 1.0, %v1303_v11  ;;  %v1125_v46 = vmul.f32 %v1123_v40, %v1019_v51 }
 0x5b3   :  { %v1305_v2 = vmul.f32 %v4760_v53, %v1304_v4  ;;  %v1126_v47 = vadd.f32 %v1125_v46, %v1118_v35 }
 0x5b4   :  { %v4762_v62 = vpop.eup %4761 }
 0x5b5   :  { %v1283_v19 = vmul.f32 %v4762_v62, %v1281_v1  ;;  %vm1288_vm5 = vweird.f32 %v4762_v62  ;;  %v1306_v6 = vadd.f32 %v4760_v53, %v1305_v2  ;;  %v1232_v22 = vmul.f32 %v1230_v50, %v1126_v47  ;;  %v4684_v1 = vld [vmem:[%s6968_s7] ss:$0 sm:$0xff] }
 0x5b6   :  { %vm1289_vm7 = vmor %vm1287_vm6, %vm1288_vm5 }
 0x5b7   :  { %v1284_v9 = vsub.f32 1.0, %v1283_v19  ;;  %v1310_v52 = vsel %vm1309_vm11, %v4760_v53, %v1306_v6  ;;  %v1233_v31 = vadd.f32 %v1232_v22, %v1225_v8 }
 0x5b8   :  { %v1315_v0 = vsel %vm1312_vm12, %v1314_v56, %v1310_v52 }
 0x5b9   :  { %v1285_v10 = vmul.f32 %v4762_v62, %v1284_v9  ;;  %v1320_v3 = vsub.f32 1.0, %v1315_v0  ;;  %v1322_v37 = vmul.f32 %v1315_v0, %v5601_v28  ;;  %v1339_v23 = vmul.f32 %v1337_v12, %v1233_v31 }
 0x5bb   :  { %v1286_v49 = vadd.f32 %v4762_v62, %v1285_v10 }
 0x5bd   :  { %v1290_v42 = vsel %vm1289_vm7, %v4762_v62, %v1286_v49 }
 0x5be   :  { %v1295_v60 = vsel %vm1292_vm8, %v1294_v25, %v1290_v42 }
 0x5bf   :  { %v1317_v45 = vmul.f32 %v1295_v60, %v1274_v17 }
 0x5c1   :  { %v1318_v7 = vadd.f32 %v1317_v45, %v291_v26 }
 0x5c3   :  { %4763 = vtanh.f32 %v1318_v7 }
 0x5c9   :  { %v4764_v15 = vpop.eup %4763 }
 0x5ca   :  { %v1321_v20 = vmul.f32 %v4764_v15, %v1320_v3 }
 0x5cc   :  { %v1323_v41 = vadd.f32 %v1322_v37, %v1321_v20 }
 0x5ce   :  { %v1332_v16 = vmul.f32 %v4683_v14, %v1323_v41 }
 0x5d0   :  { %v1340_v61 = vadd.f32 %v1339_v23, %v1332_v16 }
 0x5d2   :  { %v1357_v38 = vpack.c.bf16 %v1340_v61, %v1340_v61 }
 0x5d4   :  { %1418 = vmatmul.bf16.vlgmr.msra.gmra.mxu2 %v1357_v38 }
 0x657   :  { %v1419_v57 = vpop.f32.mrf.mxu2 }
 0x658   :  { %v5658_v36 = vadd.f32 %v4684_v1, %v1419_v57 }
 0x65f   :  { %v1421_v53 = vpop.f32.mrf.mxu2 }
 0x660   :  { %4836 = dma.done.wait [#allocation5], 448 }
 0x661   :  { %4837 = vsyncadd [#allocation5], 4294966848  ;;  %v3719_v28 = vld [vmem:[%s6969_s8 + $0x48] sm:$0xf]  ;;  %v4489_v34 = vld [vmem:[%s6969_s8 + $0x50] sm:$0xf0] }
 0x662   :  { %v3827_v39 = vld [vmem:[%s6970_s9 + $0xa8] sm:$0xf]  ;;  %v3720_v24 = vor.u32 %v4489_v34, %v3719_v28  ;;  %v4513_v11 = vld [vmem:[%s6970_s9 + $0xb0] sm:$0xf0]  ;;  %v3707_v44 = vld [vmem:[%s6969_s8 + $0x30] sm:$0xf] }
 0x663   :  { %v4486_v54 = vld [vmem:[%s6969_s8 + $0x38] sm:$0xf0]  ;;  %v3828_v62 = vor.u32 %v4513_v11, %v3827_v39  ;;  %v3815_v27 = vld [vmem:[%s6970_s9 + $0x90] sm:$0xf]  ;;  %v3695_v4 = vld [vmem:[%s6969_s8 + $0x18] sm:$0xf] }
 0x664   :  { %v4510_v19 = vld [vmem:[%s6970_s9 + $0x98] sm:$0xf0]  ;;  %1556 = vmatpush.bf16.msrb.mxu3 %v3720_v24  ;;  %v3708_v13 = vor.u32 %v4486_v54, %v3707_v44  ;;  %v4483_v9 = vld [vmem:[%s6969_s8 + $0x20] sm:$0xf0]  ;;  %v3803_v43 = vld [vmem:[%s6970_s9 + $0x78] sm:$0xf] }
 0x665   :  { %1829 = vmatpush.bf16.msrb.mxu2 %v3828_v62  ;;  %v3816_v29 = vor.u32 %v4510_v19, %v3815_v27  ;;  %v4507_v59 = vld [vmem:[%s6970_s9 + $0x80] sm:$0xf0]  ;;  %v3696_v63 = vor.u32 %v4483_v9, %v3695_v4  ;;  %v3683_v21 = vld [vmem:[%s6969_s8] sm:$0xf]  ;;  %v4480_v30 = vld [vmem:[%s6969_s8 + $0x8] sm:$0xf0]  ;;  %v5812_v19 = vpack.c.bf16 %v5658_v36, %v5658_v36 }
 0x666   :  { %v3804_v10 = vor.u32 %v4507_v59, %v3803_v43  ;;  %v3791_v2 = vld [vmem:[%s6970_s9 + $0x60] sm:$0xf]  ;;  %v4504_v49 = vld [vmem:[%s6970_s9 + $0x68] sm:$0xf0]  ;;  %v3835_v58 = vld [vmem:[%s6970_s9 + $0xb0] sm:$0xf]  ;;  %v3684_v25 = vor.u32 %v4480_v30, %v3683_v21 }
 0x667   :  { %v4514_v33 = vld [vmem:[%s6970_s9 + $0xb8] sm:$0xf0]  ;;  %v3792_v17 = vor.u32 %v4504_v49, %v3791_v2  ;;  %v3779_v42 = vld [vmem:[%s6970_s9 + $0x48] sm:$0xf]  ;;  %v4501_v60 = vld [vmem:[%s6970_s9 + $0x50] sm:$0xf0] }
 0x668   :  { %1557 = vmatpush.bf16.msrb.mxu3 %v3708_v13  ;;  %v3836_v51 = vor.u32 %v4514_v33, %v3835_v58  ;;  %v3823_v6 = vld [vmem:[%s6970_s9 + $0x98] sm:$0xf]  ;;  %v4511_v32 = vld [vmem:[%s6970_s9 + $0xa0] sm:$0xf0]  ;;  %v4488_v40 = vld [vmem:[%s6969_s8 + $0x4c] sm:$0xf]  ;;  %v3780_v45 = vor.u32 %v4501_v60, %v3779_v42 }
 0x669   :  { %1830 = vmatpush.bf16.msrb.mxu2 %v3816_v29  ;;  %v5726_v26 = vld [vmem:[#allocation2] sm:$0xff]  ;;  %v3721_v48 = vld [vmem:[%s6969_s8 + $0x54] sm:$0xf0]  ;;  %v3767_v35 = vld [vmem:[%s6970_s9 + $0x30] sm:$0xf]  ;;  %v3824_v18 = vor.u32 %v4511_v32, %v3823_v6 }
 0x66a   :  { %v3724_v55 = vor.u32 %v4488_v40, %v3721_v48  ;;  %v4485_v7 = vld [vmem:[%s6969_s8 + $0x34] sm:$0xf]  ;;  %v3709_v46 = vld [vmem:[%s6969_s8 + $0x3c] sm:$0xf0]  ;;  %v4498_v5 = vld [vmem:[%s6970_s9 + $0x38] sm:$0xf0] }
 0x66b   :  { %v3811_v52 = vld [vmem:[%s6970_s9 + $0x80] sm:$0xf]  ;;  %v4508_v56 = vld [vmem:[%s6970_s9 + $0x88] sm:$0xf0]  ;;  %v3712_v47 = vor.u32 %v4485_v7, %v3709_v46  ;;  %v3768_v50 = vor.u32 %v4498_v5, %v3767_v35  ;;  %v3755_v0 = vld [vmem:[%s6970_s9 + $0x18] sm:$0xf] }
 0x66c   :  { %1558 = vmatpush.bf16.msrb.mxu3 %v3696_v63  ;;  %1584 = vmatpush.bf16.msrb.mxu0 %v3724_v55  ;;  %v3812_v8 = vor.u32 %v4508_v56, %v3811_v52  ;;  %v4482_v22 = vld [vmem:[%s6969_s8 + $0x1c] sm:$0xf]  ;;  %v3697_v3 = vld [vmem:[%s6969_s8 + $0x24] sm:$0xf0]  ;;  %v4495_v15 = vld [vmem:[%s6970_s9 + $0x20] sm:$0xf0] }
 0x66d   :  { %1831 = vmatpush.bf16.msrb.mxu2 %v3804_v10  ;;  %v3799_v31 = vld [vmem:[%s6970_s9 + $0x68] sm:$0xf]  ;;  %v4505_v20 = vld [vmem:[%s6970_s9 + $0x70] sm:$0xf0]  ;;  %v3700_v37 = vor.u32 %v4482_v22, %v3697_v3  ;;  %v3756_v12 = vor.u32 %v4495_v15, %v3755_v0  ;;  %v3743_v14 = vld [vmem:[%s6970_s9] sm:$0xf] }
 0x66e   :  { %v3800_v41 = vor.u32 %v4505_v20, %v3799_v31  ;;  %v4479_v23 = vld [vmem:[%s6969_s8 + $0x4] sm:$0xf]  ;;  %v3685_v16 = vld [vmem:[%s6969_s8 + $0xc] sm:$0xf0]  ;;  %v4492_v61 = vld [vmem:[%s6970_s9 + $0x8] sm:$0xf0] }
 0x66f   :  { %v3787_v38 = vld [vmem:[%s6970_s9 + $0x50] sm:$0xf]  ;;  %v4502_v1 = vld [vmem:[%s6970_s9 + $0x58] sm:$0xf0]  ;;  %v3688_v57 = vor.u32 %v4479_v23, %v3685_v16  ;;  %v4512_v53 = vld [vmem:[%s6970_s9 + $0xac] sm:$0xf]  ;;  %v3744_v34 = vor.u32 %v4492_v61, %v3743_v14 }
 0x670   :  { %1559 = vmatpush.bf16.msrb.mxu3 %v3684_v25  ;;  %1585 = vmatpush.bf16.msrb.mxu0 %v3712_v47  ;;  %v3829_v28 = vld [vmem:[%s6970_s9 + $0xb4] sm:$0xf0]  ;;  %v3788_v39 = vor.u32 %v4502_v1, %v3787_v38  ;;  %v4499_v44 = vld [vmem:[%s6970_s9 + $0x40] sm:$0xf0]  ;;  %v5802_v54 = vld [vmem:[#allocation2 + $0x8] sm:$0xff] }
 0x671   :  { %1832 = vmatpush.bf16.msrb.mxu2 %v3792_v17  ;;  %v3832_v24 = vor.u32 %v4512_v53, %v3829_v28  ;;  %v3775_v11 = vld [vmem:[%s6970_s9 + $0x38] sm:$0xf]  ;;  %v4509_v62 = vld [vmem:[%s6970_s9 + $0x94] sm:$0xf]  ;;  %v3817_v27 = vld [vmem:[%s6970_s9 + $0x9c] sm:$0xf0] }
 0x672   :  { %v3776_v13 = vor.u32 %v4499_v44, %v3775_v11  ;;  %v3820_v29 = vor.u32 %v4509_v62, %v3817_v27  ;;  %v4506_v4 = vld [vmem:[%s6970_s9 + $0x7c] sm:$0xf]  ;;  %v3805_v9 = vld [vmem:[%s6970_s9 + $0x84] sm:$0xf0]  ;;  %v3763_v43 = vld [vmem:[%s6970_s9 + $0x20] sm:$0xf] }
 0x673   :  { %3729 = vmatmul.msk.bf16.vlgmr.msrb.gmra.mxu3 %vm193_vm0, %v5726_v26  ;;  %v4496_v59 = vld [vmem:[%s6970_s9 + $0x28] sm:$0xf0]  ;;  %v3727_v63 = vld [vmem:[%s6969_s8 + $0x50] sm:$0xf]  ;;  %v4490_v10 = vld [vmem:[%s6969_s8 + $0x58] sm:$0xf0]  ;;  %v3808_v58 = vor.u32 %v4506_v4, %v3805_v9 }
 0x674   :  { %1855 = vmatpush.bf16.msra.mxu3 %v3836_v51  ;;  %1586 = vmatpush.bf16.msrb.mxu0 %v3700_v37  ;;  %v3715_v21 = vld [vmem:[%s6969_s8 + $0x38] sm:$0xf]  ;;  %v4487_v30 = vld [vmem:[%s6969_s8 + $0x40] sm:$0xf0]  ;;  %v3764_v2 = vor.u32 %v4496_v59, %v3763_v43  ;;  %v3728_v49 = vor.u32 %v4490_v10, %v3727_v63  ;;  %v3751_v33 = vld [vmem:[%s6970_s9 + $0x8] sm:$0xf] }
 0x675   :  { %1833 = vmatpush.bf16.msrb.mxu2 %v3780_v45  ;;  %v4493_v25 = vld [vmem:[%s6970_s9 + $0x10] sm:$0xf0]  ;;  %v4503_v17 = vld [vmem:[%s6970_s9 + $0x64] sm:$0xf]  ;;  %v3793_v42 = vld [vmem:[%s6970_s9 + $0x6c] sm:$0xf0]  ;;  %v3716_v51 = vor.u32 %v4487_v30, %v3715_v21 }
 0x676   :  { %1612 = vmatpush.bf16.msrb.mxu1 %v3728_v49  ;;  %v3703_v60 = vld [vmem:[%s6969_s8 + $0x20] sm:$0xf]  ;;  %v4484_v6 = vld [vmem:[%s6969_s8 + $0x28] sm:$0xf0]  ;;  %v3752_v32 = vor.u32 %v4493_v25, %v3751_v33  ;;  %v3796_v40 = vor.u32 %v4503_v17, %v3793_v42  ;;  %v3781_v55 = vld [vmem:[%s6970_s9 + $0x54] sm:$0xf0] }
 0x677   :  { %v4500_v48 = vld [vmem:[%s6970_s9 + $0x4c] sm:$0xf]  ;;  %v3704_v45 = vor.u32 %v4484_v6, %v3703_v60  ;;  %v3691_v35 = vld [vmem:[%s6969_s8 + $0x8] sm:$0xf]  ;;  %v4478_v46 = vld [vmem:[#allocation2 + $0x10] sm:$0xff] }
 0x678   :  { %1856 = vmatpush.bf16.msra.mxu3 %v3824_v18  ;;  %1587 = vmatpush.bf16.msrb.mxu0 %v3688_v57  ;;  %v4481_v18 = vld [vmem:[%s6969_s8 + $0x10] sm:$0xf0]  ;;  %v3784_v7 = vor.u32 %v4500_v48, %v3781_v55  ;;  %v3769_v52 = vld [vmem:[%s6970_s9 + $0x3c] sm:$0xf0]  ;;  %v3757_v0 = vld [vmem:[%s6970_s9 + $0x24] sm:$0xf0] }
 0x679   :  { %1834 = vmatpush.bf16.msrb.mxu2 %v3768_v50  ;;  %v4497_v5 = vld [vmem:[%s6970_s9 + $0x34] sm:$0xf]  ;;  %v3692_v56 = vor.u32 %v4481_v18, %v3691_v35  ;;  %v4494_v50 = vld [vmem:[%s6970_s9 + $0x1c] sm:$0xf]  ;;  %v4491_v22 = vld [vmem:[%s6970_s9 + $0x4] sm:$0xf] }
 0x67a   :  { %1613 = vmatpush.bf16.msrb.mxu1 %v3716_v51  ;;  %v3772_v47 = vor.u32 %v4497_v5, %v3769_v52  ;;  %v3745_v3 = vld [vmem:[%s6970_s9 + $0xc] sm:$0xf0]  ;;  %v1433_v15 = vld [vmem:[#allocation2 + $0x18] sm:$0xf]  ;;  %v4537_v14 = vld [vmem:[%s6970_s9 + $0xb0] sm:$0xf0] }
 0x67b   :  { %3733 = vmatmul.msk.bf16.vlgmr.msrb.gmra.mxu0 %vm193_vm0, %v5726_v26  ;;  %v3748_v31 = vor.u32 %v4491_v22, %v3745_v3  ;;  %v1471_v20 = vunpack.c.l.b16 %v1433_v15  ;;  %v4534_v16 = vld [vmem:[%s6970_s9 + $0x98] sm:$0xf0]  ;;  %v4536_v61 = vld [vmem:[%s6970_s9 + $0xac] sm:$0xf]  ;;  %v3927_v38 = vld [vmem:[%s6970_s9 + $0xb4] sm:$0xf0] }
 0x67c   :  { %1857 = vmatpush.bf16.msra.mxu3 %v3812_v8  ;;  %v3760_v8 = vor.u32 %v4494_v50, %v3757_v0  ;;  %v3930_v1 = vor.u32 %v4536_v61, %v3927_v38  ;;  %v5926_v57 = vld [vmem:[%s6971_s10] sm:$0x7]  ;;  %v4533_v28 = vld [vmem:[%s6970_s9 + $0x94] sm:$0xf]  ;;  %v3933_v10 = vld [vmem:[%s6970_s9 + $0xb0] sm:$0xf] }
 0x67d   :  { %1835 = vmatpush.bf16.msrb.mxu2 %v3756_v12  ;;  %v1475_v37 = vpack.c.b16 %v1471_v20, %v1471_v20  ;;  %v3925_v12 = vld [vmem:[%s6970_s9 + $0xa8] sm:$0xf]  ;;  %v5941_v44 = vperm.slane %v5926_v57, 0  ;;  %v4538_v21 = vld [vmem:[%s6970_s9 + $0xb8] sm:$0xf0]  ;;  %v6012_v22 = vperm.slane %v5926_v57, 2 }
 0x67e   :  { %1614 = vmatpush.bf16.msrb.mxu1 %v3704_v45  ;;  %v3926_v23 = vor.u32 %v4537_v14, %v3925_v12  ;;  %v3921_v25 = vld [vmem:[%s6970_s9 + $0x98] sm:$0xf]  ;;  %v4535_v17 = vld [vmem:[%s6970_s9 + $0xa0] sm:$0xf0]  ;;  %v4530_v51 = vld [vmem:[%s6970_s9 + $0x7c] sm:$0xf] }
 0x67f   :  { %v3922_v42 = vor.u32 %v4535_v17, %v3921_v25  ;;  %v3903_v60 = vld [vmem:[%s6970_s9 + $0x84] sm:$0xf0]  ;;  %v4532_v48 = vld [vmem:[%s6970_s9 + $0x88] sm:$0xf0]  ;;  %v4527_v5 = vld [vmem:[%s6970_s9 + $0x64] sm:$0xf] }
 0x680   :  { %1858 = vmatpush.bf16.msra.mxu3 %v3800_v41  ;;  %v3913_v41 = vld [vmem:[%s6970_s9 + $0x90] sm:$0xf]  ;;  %2080 = vmatpush.bf16.msra.mxu0 %v3926_v23  ;;  %v3897_v0 = vld [vmem:[%s6970_s9 + $0x68] sm:$0xf]  ;;  %v4524_v20 = vld [vmem:[%s6970_s9 + $0x4c] sm:$0xf] }
 0x681   :  { %1836 = vmatpush.bf16.msrb.mxu2 %v3744_v34  ;;  %v3914_v53 = vor.u32 %v4534_v16, %v3913_v41  ;;  %v3915_v34 = vld [vmem:[%s6970_s9 + $0x9c] sm:$0xf0]  ;;  %v3877_v15 = vld [vmem:[%s6970_s9 + $0x48] sm:$0xf]  ;;  %v3879_v12 = vld [vmem:[%s6970_s9 + $0x54] sm:$0xf0] }
 0x682   :  { %1615 = vmatpush.bf16.msrb.mxu1 %v3692_v56  ;;  %v3918_v11 = vor.u32 %v4533_v28, %v3915_v34  ;;  %v3885_v41 = vld [vmem:[%s6970_s9 + $0x50] sm:$0xf]  ;;  %v4526_v23 = vld [vmem:[%s6970_s9 + $0x58] sm:$0xf0]  ;;  %v6034_v16 = vperm.slane %v5926_v57, 1 }
 0x683   :  { %3730 = vmatmul.msk.bf16.gmra.mxu3 %vm193_vm0, %v5802_v54  ;;  %v3865_v61 = vld [vmem:[%s6970_s9 + $0x30] sm:$0xf]  ;;  %v4522_v38 = vld [vmem:[%s6970_s9 + $0x38] sm:$0xf0]  ;;  %v3886_v28 = vor.u32 %v4526_v23, %v3885_v41  ;;  %v3853_v57 = vld [vmem:[%s6970_s9 + $0x18] sm:$0xf] }
 0x684   :  { %1859 = vmatpush.bf16.msra.mxu3 %v3788_v39  ;;  %1837 = vmatmul.bf16.vlgmr.msrb.gmra.mxu2 %v5812_v19  ;;  %v3901_v39 = vld [vmem:[%s6970_s9 + $0x78] sm:$0xf]  ;;  %v3841_v17 = vld [vmem:[%s6970_s9] sm:$0xf] }
 0x685   :  { %1842 = vmatpush.bf16.msra.mxu2 %v3832_v24  ;;  %3737 = vmatmul.msk.bf16.vlgmr.msrb.gmra.mxu1 %vm193_vm0, %v5726_v26  ;;  %v4531_v24 = vld [vmem:[%s6970_s9 + $0x80] sm:$0xf0] }
 0x686   :  { %2093 = vmatpush.bf16.msra.mxu1 %v3930_v1  ;;  %2081 = vmatpush.bf16.msra.mxu0 %v3914_v53  ;;  %v3902_v62 = vor.u32 %v4531_v24, %v3901_v39  ;;  %v3882_v1 = vor.u32 %v4524_v20, %v3879_v12  ;;  %v3866_v39 = vor.u32 %v4522_v38, %v3865_v61  ;;  %v4521_v24 = vld [vmem:[%s6970_s9 + $0x34] sm:$0xf] }
 0x688   :  { %1860 = vmatpush.bf16.msra.mxu3 %v3776_v13 }
 0x689   :  { %1843 = vmatpush.bf16.msra.mxu2 %v3820_v29 }
 0x68a   :  { %2094 = vmatpush.bf16.msra.mxu1 %v3918_v11  ;;  %2082 = vmatpush.bf16.msra.mxu0 %v3902_v62  ;;  %v3867_v11 = vld [vmem:[%s6970_s9 + $0x3c] sm:$0xf0]  ;;  %v4519_v62 = vld [vmem:[%s6970_s9 + $0x20] sm:$0xf0] }
 0x68b   :  { %3734 = vmatmul.msk.bf16.gmra.mxu0 %vm193_vm0, %v5802_v54 }
 0x68c   :  { %1861 = vmatpush.bf16.msra.mxu3 %v3764_v2  ;;  %v3934_v2 = vor.u32 %v4538_v21, %v3933_v10  ;;  %v4518_v10 = vld [vmem:[%s6970_s9 + $0x1c] sm:$0xf]  ;;  %v3855_v21 = vld [vmem:[%s6970_s9 + $0x24] sm:$0xf0] }
 0x68d   :  { %1844 = vmatpush.bf16.msra.mxu2 %v3808_v58 }
 0x690   :  { %1862 = vmatpush.bf16.msra.mxu3 %v3752_v32  ;;  %v3909_v32 = vld [vmem:[%s6970_s9 + $0x80] sm:$0xf] }
 0x691   :  { %1845 = vmatpush.bf16.msra.mxu2 %v3796_v40  ;;  %v3906_v40 = vor.u32 %v4530_v51, %v3903_v60  ;;  %v3910_v45 = vor.u32 %v4532_v48, %v3909_v32  ;;  %v3858_v51 = vor.u32 %v4518_v10, %v3855_v21  ;;  %v3843_v48 = vld [vmem:[%s6970_s9 + $0xc] sm:$0xf0] }
 0x693   :  { %3731 = vmatmul.msk.bf16.gmra.mxu3 %vm193_vm0, %v4478_v46  ;;  %2095 = vmatpush.bf16.msra.mxu1 %v3906_v40  ;;  %v4515_v40 = vld [vmem:[%s6970_s9 + $0x4] sm:$0xf] }
 0x695   :  { %1846 = vmatpush.bf16.msra.mxu2 %v3784_v7  ;;  %3738 = vmatmul.msk.bf16.gmra.mxu1 %vm193_vm0, %v5802_v54  ;;  %v3889_v7 = vld [vmem:[%s6970_s9 + $0x60] sm:$0xf] }
 0x699   :  { %1847 = vmatpush.bf16.msra.mxu2 %v3772_v47  ;;  %v3891_v47 = vld [vmem:[%s6970_s9 + $0x6c] sm:$0xf0] }
 0x69a   :  { %v3894_v50 = vor.u32 %v4527_v5, %v3891_v47 }
 0x69b   :  { %3735 = vmatmul.msk.bf16.gmra.mxu0 %vm193_vm0, %v4478_v46 }
 0x69c   :  { %2096 = vmatpush.bf16.msra.mxu1 %v3894_v50 }
 0x69d   :  { %1848 = vmatpush.bf16.msra.mxu2 %v3760_v8  ;;  %v4529_v8 = vld [vmem:[%s6970_s9 + $0x70] sm:$0xf0] }
 0x69e   :  { %v3898_v3 = vor.u32 %v4529_v8, %v3897_v0  ;;  %v3846_v0 = vor.u32 %v4515_v40, %v3843_v48 }
 0x6a0   :  { %2097 = vmatpush.bf16.msra.mxu1 %v3882_v1 }
 0x6a1   :  { %1849 = vmatpush.bf16.msra.mxu2 %v3748_v31  ;;  %v4525_v31 = vld [vmem:[%s6970_s9 + $0x50] sm:$0xf0] }
 0x6a3   :  { %3732 = vmatmul.msk.bf16.gmra.mxu3 %vm193_vm0, %v1475_v37 }
 0x6a4   :  { %1850 = vmatmul.bf16.vlgmr.msra.gmra.mxu2 %v5812_v19 }
 0x6a5   :  { %3739 = vmatmul.msk.bf16.gmra.mxu1 %vm193_vm0, %v4478_v46  ;;  %2106 = vmatpush.bf16.msrb.mxu2 %v3934_v2  ;;  %v4528_v46 = vld [vmem:[%s6970_s9 + $0x68] sm:$0xf0] }
 0x6a6   :  { %v3890_v56 = vor.u32 %v4528_v46, %v3889_v7  ;;  %v4517_v7 = vld [vmem:[%s6970_s9 + $0x10] sm:$0xf0] }
 0x6a8   :  { %2083 = vmatpush.bf16.msra.mxu0 %v3890_v56 }
 0x6a9   :  { %2107 = vmatpush.bf16.msrb.mxu2 %v3922_v42  ;;  %v4516_v42 = vld [vmem:[%s6970_s9 + $0x8] sm:$0xf0] }
 0x6aa   :  { %v3842_v56 = vor.u32 %v4516_v42, %v3841_v17 }
 0x6ab   :  { %3736 = vmatmul.msk.bf16.gmra.mxu0 %vm193_vm0, %v1475_v37 }
 0x6ad   :  { %2108 = vmatpush.bf16.msrb.mxu2 %v3910_v45 }
 0x6b1   :  { %2109 = vmatpush.bf16.msrb.mxu2 %v3898_v3 }
 0x6b3   :  { %1863 = vmatmul.bf16.vlgmr.msra.gmra.mxu3 %v5812_v19  ;;  %v5949_v19 = vld [vmem:[%s6972_s11] sm:$0x7] }
 0x6b4   :  { %v5952_v13 = vperm.slane %v5949_v19, 0  ;;  %v6114_v38 = vperm.slane %v5949_v19, 2 }
 0x6b5   :  { %3740 = vmatmul.msk.bf16.gmra.mxu1 %vm193_vm0, %v1475_v37  ;;  %2110 = vmatpush.bf16.msrb.mxu2 %v3886_v28 }
 0x6f6   :  { %v1561_v26 = vpop.f32.mrf.mxu3 }
 0x6f7   :  { %v1562_v43 = vadd.f32 %v1561_v26, %v5941_v44  ;;  %v3878_v26 = vor.u32 %v4525_v31, %v3877_v15 }
 0x6f8   :  { %v1589_v37 = vpop.f32.mrf.mxu0 }
 0x6f9   :  { %2084 = vmatpush.bf16.msra.mxu0 %v3878_v26  ;;  %v1590_v25 = vadd.f32 %v1589_v37, %v6034_v16 }
 0x6fd   :  { %2085 = vmatpush.bf16.msra.mxu0 %v3866_v39 }
 0x6fe   :  { %v1563_v54 = vpop.f32.mrf.mxu3 }
 0x6ff   :  { %v5944_v27 = vadd.f32 %v1563_v54, %v5941_v44 }
 0x700   :  { %v6102_v46 = vpop.f32.mrf.mxu0 }
 0x702   :  { %v5980_v6 = vpop.f32.mrf.mxu1 }
 0x706   :  { %v1566_v29 = vpop.f32.mrf.mxu3 }
 0x707   :  { %v5955_v4 = vadd.f32 %v1566_v29, %v5941_v44  ;;  %v1838_v9 = vpop.f32.mrf.mxu2  ;;  %v3870_v29 = vor.u32 %v4521_v24, %v3867_v11 }
 0x708   :  { %v1839_v59 = vadd.f32 %v1838_v9, %v5952_v13  ;;  %v3873_v9 = vld [vmem:[%s6970_s9 + $0x38] sm:$0xf]  ;;  %v6107_v26 = vpop.f32.mrf.mxu0 }
 0x709   :  { %2098 = vmatpush.bf16.msra.mxu1 %v3870_v29 }
 0x70a   :  { %v1868_v63 = vadd.f32 %v1839_v59, %v1562_v43  ;;  %v1619_v14 = vpop.f32.mrf.mxu1  ;;  %v4523_v43 = vld [vmem:[%s6970_s9 + $0x40] sm:$0xf0]  ;;  %v6067_v59 = vperm.slane %v5949_v19, 1 }
 0x70b   :  { %v6043_v53 = vadd.f32 %v1619_v14, %v6012_v22 }
 0x70c   :  { %v3837_v30 = vmul.f32 -1.442695, %v1868_v63  ;;  %v3874_v63 = vor.u32 %v4523_v43, %v3873_v9 }
 0x70d   :  { %2099 = vmatpush.bf16.msra.mxu1 %v3858_v51 }
 0x70e   :  { %v1568_v49 = vpop.f32.mrf.mxu3  ;;  %4766 = vpow2.f32 %v3837_v30  ;;  %v3861_v30 = vld [vmem:[%s6970_s9 + $0x20] sm:$0xf]  ;;  %2111 = vmatpush.bf16.msrb.mxu2 %v3874_v63 }
 0x70f   :  { %v5966_v58 = vadd.f32 %v1568_v49, %v5941_v44  ;;  %v1840_v33 = vpop.f32.mrf.mxu2  ;;  %v3854_v49 = vor.u32 %v4519_v62, %v3853_v57  ;;  %v1618_v62 = vadd.f32 %v5980_v6, %v6012_v22 }
 0x710   :  { %v4520_v33 = vld [vmem:[%s6970_s9 + $0x28] sm:$0xf0]  ;;  %v6118_v57 = vpop.f32.mrf.mxu0 }
 0x711   :  { %v3862_v32 = vor.u32 %v4520_v33, %v3861_v30  ;;  %2086 = vmatpush.bf16.msra.mxu0 %v3854_v49  ;;  %2100 = vmatpush.bf16.msra.mxu1 %v3846_v0 }
 0x712   :  { %v1622_v12 = vpop.f32.mrf.mxu1 }
 0x713   :  { %2112 = vmatpush.bf16.msrb.mxu2 %v3862_v32  ;;  %v6110_v14 = vadd.f32 %v1622_v12, %v6012_v22  ;;  %v4031_v12 = vld [vmem:[%s6970_s9 + $0xb0] sm:$0xf] }
 0x714   :  { %v4767_v55 = vpop.eup %4766 }
 0x715   :  { %v6000_v52 = vadd.f32 1.0, %v4767_v55  ;;  %2087 = vmatpush.bf16.msra.mxu0 %v3842_v56 }
 0x716   :  { %v1571_v35 = vpop.f32.mrf.mxu3 }
 0x717   :  { %v5989_v18 = vadd.f32 %v1571_v35, %v5941_v44  ;;  %4768 = vrcp.f32 %v6000_v52  ;;  %v3849_v35 = vld [vmem:[%s6970_s9 + $0x8] sm:$0xf]  ;;  %v1884_v61 = vand.u32 2147483648, %v6000_v52  ;;  %vm1878_vm13 = vweird.f32 %v6000_v52 }
 0x718   :  { %v3850_v8 = vor.u32 %v4517_v7, %v3849_v35  ;;  %v1882_v1 = vand.u32 2147483647, %v6000_v52 }
 0x719   :  { %v1885_v39 = vor.u32 1.1754944e-38, %v1884_v61  ;;  %v4011_v61 = vld [vmem:[%s6970_s9 + $0x90] sm:$0xf] }
 0x71a   :  { %2113 = vmatpush.bf16.msrb.mxu2 %v3850_v8  ;;  %vm1883_vm15 = vcmp.eq.f32.partialorder %v1882_v1, 8.507059e+37  ;;  %v1624_v11 = vpop.f32.mrf.mxu1  ;;  %v4558_v1 = vld [vmem:[%s6970_s9 + $0x98] sm:$0xf0] }
 0x71b   :  { %v6124_v29 = vadd.f32 %v1624_v11, %v6012_v22  ;;  %v4559_v11 = vld [vmem:[%s6970_s9 + $0xa0] sm:$0xf0] }
 0x71d   :  { %v4769_v2 = vpop.eup %4768 }
 0x71e   :  { %v1573_v34 = vpop.f32.mrf.mxu3  ;;  %v1874_v45 = vmul.f32 %v4769_v2, %v6000_v52  ;;  %vm1879_vm0 = vweird.f32 %v4769_v2 }
 0x71f   :  { %v6055_v54 = vadd.f32 %v1573_v34, %v5941_v44  ;;  %vm1880_vm14 = vmor %vm1878_vm13, %vm1879_vm0 }
 0x720   :  { %v1875_v15 = vsub.f32 1.0, %v1874_v45 }
 0x722   :  { %v1876_v20 = vmul.f32 %v4769_v2, %v1875_v15  ;;  %v4023_v15 = vld [vmem:[%s6970_s9 + $0xa8] sm:$0xf] }
 0x724   :  { %v1877_v41 = vadd.f32 %v4769_v2, %v1876_v20  ;;  %v4560_v20 = vld [vmem:[%s6970_s9 + $0xac] sm:$0xf] }
 0x726   :  { %v1576_v5 = vpop.f32.mrf.mxu3  ;;  %v1881_v28 = vsel %vm1880_vm14, %v4769_v2, %v1877_v41  ;;  %v6126_v2 = vpop.f32.mrf.mxu0 }
 0x727   :  { %v1851_v60 = vpop.f32.mrf.mxu2  ;;  %v6105_v50 = vadd.f32 %v1576_v5, %v5941_v44  ;;  %v1886_v19 = vsel %vm1883_vm15, %v1885_v39, %v1881_v28  ;;  %v4557_v28 = vld [vmem:[%s6970_s9 + $0x94] sm:$0xf]  ;;  %v4013_v39 = vld [vmem:[%s6970_s9 + $0x9c] sm:$0xf0] }
 0x728   :  { %v1852_v55 = vadd.f32 %v1851_v60, %v6067_v59 }
 0x72a   :  { %v1888_v47 = vadd.f32 %v1852_v55, %v1590_v25  ;;  %v1627_v25 = vpop.f32.mrf.mxu1 }
 0x72b   :  { %v6129_v6 = vadd.f32 %v1627_v25, %v6012_v22  ;;  %v3987_v25 = vld [vmem:[%s6970_s9 + $0x60] sm:$0xf] }
 0x72c   :  { %v3838_v3 = vmul.f32 -1.442695, %v1888_v47 }
 0x72e   :  { %4770 = vpow2.f32 %v3838_v3  ;;  %v1578_v37 = vpop.f32.mrf.mxu3  ;;  %v6131_v48 = vpop.f32.mrf.mxu0 }
 0x72f   :  { %v1853_v31 = vpop.f32.mrf.mxu2 }
 0x730   :  { %v4561_v31 = vld [vmem:[%s6970_s9 + $0xb0] sm:$0xf0] }
 0x731   :  { %v4024_v37 = vor.u32 %v4561_v31, %v4023_v15  ;;  %v3975_v15 = vld [vmem:[%s6970_s9 + $0x48] sm:$0xf]  ;;  %v4549_v31 = vld [vmem:[%s6970_s9 + $0x50] sm:$0xf0] }
 0x732   :  { %v1629_v35 = vpop.f32.mrf.mxu1 }
 0x733   :  { %v6135_v7 = vadd.f32 %v1629_v35, %v6012_v22  ;;  %2331 = vmatpush.bf16.msrb.mxu3 %v4024_v37  ;;  %v3976_v37 = vor.u32 %v4549_v31, %v3975_v15 }
 0x734   :  { %v4771_v44 = vpop.eup %4770 }
 0x735   :  { %v1892_v23 = vadd.f32 1.0, %v4771_v44  ;;  %v4562_v44 = vld [vmem:[%s6970_s9 + $0xb8] sm:$0xf0] }
 0x736   :  { %v1864_v34 = vpop.f32.mrf.mxu3  ;;  %v6145_v47 = vpop.f32.mrf.mxu0 }
 0x737   :  { %4772 = vrcp.f32 %v1892_v23  ;;  %v1865_v24 = vadd.f32 %v1864_v34, %v6114_v38  ;;  %v1904_v30 = vand.u32 2147483648, %v1892_v23  ;;  %v1902_v33 = vand.u32 2147483647, %v1892_v23 }
 0x738   :  { %vm1898_vm2 = vweird.f32 %v1892_v23  ;;  %v4012_v34 = vor.u32 %v4558_v1, %v4011_v61 }
 0x739   :  { %v1908_v9 = vmul.f32 %v1886_v19, %v1865_v24  ;;  %v1905_v42 = vor.u32 1.1754944e-38, %v1904_v30  ;;  %vm1903_vm4 = vcmp.eq.f32.partialorder %v1902_v33, 8.507059e+37  ;;  %v4019_v24 = vld [vmem:[%s6970_s9 + $0x98] sm:$0xf]  ;;  %v4556_v30 = vld [vmem:[%s6970_s9 + $0x88] sm:$0xf0] }
 0x73a   :  { %v4020_v19 = vor.u32 %v4559_v11, %v4019_v24  ;;  %2332 = vmatpush.bf16.msrb.mxu3 %v4012_v34  ;;  %v3963_v34 = vld [vmem:[%s6970_s9 + $0x30] sm:$0xf]  ;;  %v3965_v24 = vld [vmem:[%s6970_s9 + $0x3c] sm:$0xf0] }
 0x73b   :  { %v1909_v63 = vadd.f32 %v1908_v9, %v1618_v62  ;;  %v4016_v62 = vor.u32 %v4557_v28, %v4013_v39  ;;  %v3999_v9 = vld [vmem:[%s6970_s9 + $0x78] sm:$0xf]  ;;  %v4546_v39 = vld [vmem:[%s6970_s9 + $0x38] sm:$0xf0] }
 0x73d   :  { %v4773_v52 = vpop.eup %4772  ;;  %4774 = vtanh.f32 %v1909_v63 }
 0x73e   :  { %v1894_v43 = vmul.f32 %v4773_v52, %v1892_v23  ;;  %v1866_v21 = vpop.f32.mrf.mxu3  ;;  %vm1899_vm1 = vweird.f32 %v4773_v52  ;;  %v1606_v8 = vpop.f32.mrf.mxu0  ;;  %v4032_v23 = vor.u32 %v4562_v44, %v4031_v12  ;;  %v4550_v12 = vld [vmem:[%s6970_s9 + $0x58] sm:$0xf0] }
 0x73f   :  { %vm1900_vm3 = vmor %vm1898_vm2, %vm1899_vm1  ;;  %v4007_v21 = vld [vmem:[%s6970_s9 + $0x80] sm:$0xf] }
 0x740   :  { %v1895_v10 = vsub.f32 1.0, %v1894_v43  ;;  %2357 = vmatpush.bf16.msrb.mxu1 %v4032_v23  ;;  %v4554_v43 = vld [vmem:[%s6970_s9 + $0x7c] sm:$0xf]  ;;  %v4008_v33 = vor.u32 %v4556_v30, %v4007_v21  ;;  %v3951_v21 = vld [vmem:[%s6970_s9 + $0x18] sm:$0xf] }
 0x741   :  { %v4543_v30 = vld [vmem:[%s6970_s9 + $0x20] sm:$0xf0] }
 0x742   :  { %v1896_v49 = vmul.f32 %v4773_v52, %v1895_v10  ;;  %v4001_v10 = vld [vmem:[%s6970_s9 + $0x84] sm:$0xf0] }
 0x743   :  { %v4775_v40 = vpop.eup %4774 }
 0x744   :  { %v1897_v17 = vadd.f32 %v4773_v52, %v1896_v49  ;;  %2358 = vmatpush.bf16.msrb.mxu1 %v4020_v19  ;;  %v4004_v49 = vor.u32 %v4554_v43, %v4001_v10 }
 0x746   :  { %v1901_v51 = vsel %vm1900_vm3, %v4773_v52, %v1897_v17  ;;  %v4555_v52 = vld [vmem:[%s6970_s9 + $0x80] sm:$0xf0]  ;;  %v4552_v17 = vld [vmem:[%s6970_s9 + $0x68] sm:$0xf0] }
 0x747   :  { %v1906_v60 = vsel %vm1903_vm4, %v1905_v42, %v1901_v51  ;;  %v4000_v63 = vor.u32 %v4555_v52, %v3999_v9  ;;  %v4551_v42 = vld [vmem:[%s6970_s9 + $0x64] sm:$0xf]  ;;  %v3988_v51 = vor.u32 %v4552_v17, %v3987_v25  ;;  %v3971_v9 = vld [vmem:[%s6970_s9 + $0x38] sm:$0xf]  ;;  %v3953_v25 = vld [vmem:[%s6970_s9 + $0x24] sm:$0xf0] }
 0x748   :  { %v1911_v32 = vsub.f32 1.0, %v1906_v60  ;;  %v1913_v45 = vmul.f32 %v1906_v60, %v5658_v36  ;;  %v1632_v36 = vpop.f32.mrf.mxu1  ;;  %2359 = vmatpush.bf16.msrb.mxu1 %v4008_v33  ;;  %v3989_v60 = vld [vmem:[%s6970_s9 + $0x6c] sm:$0xf0]  ;;  %v4547_v52 = vld [vmem:[%s6970_s9 + $0x40] sm:$0xf0]  ;;  %v3952_v33 = vor.u32 %v4543_v30, %v3951_v21 }
 0x749   :  { %v6148_v0 = vadd.f32 %v1632_v36, %v6012_v22  ;;  %v4025_v22 = vld [vmem:[%s6970_s9 + $0xb4] sm:$0xf0]  ;;  %2333 = vmatpush.bf16.msrb.mxu3 %v4000_v63  ;;  %v1592_v36 = vadd.f32 %v6102_v46, %v6034_v16  ;;  %v3972_v10 = vor.u32 %v4547_v52, %v3971_v9  ;;  %v3959_v17 = vld [vmem:[%s6970_s9 + $0x20] sm:$0xf] }
 0x74a   :  { %v1912_v55 = vmul.f32 %v4775_v40, %v1911_v32  ;;  %v4028_v41 = vor.u32 %v4560_v20, %v4025_v22  ;;  %v3995_v32 = vld [vmem:[%s6970_s9 + $0x68] sm:$0xf]  ;;  %v4553_v40 = vld [vmem:[%s6970_s9 + $0x70] sm:$0xf0]  ;;  %v4548_v20 = vld [vmem:[%s6970_s9 + $0x4c] sm:$0xf] }
 0x74b   :  { %v3977_v46 = vld [vmem:[%s6970_s9 + $0x54] sm:$0xf0]  ;;  %v3983_v22 = vld [vmem:[%s6970_s9 + $0x50] sm:$0xf] }
 0x74c   :  { %v6137_v5 = vadd.f32 %v1913_v45, %v1912_v55  ;;  %2344 = vmatpush.bf16.msrb.mxu0 %v4028_v41  ;;  %v3992_v55 = vor.u32 %v4551_v42, %v3989_v60  ;;  %v3996_v45 = vor.u32 %v4553_v40, %v3995_v32  ;;  %v3980_v23 = vor.u32 %v4548_v20, %v3977_v46  ;;  %v4544_v42 = vld [vmem:[%s6970_s9 + $0x28] sm:$0xf0]  ;;  %v3939_v32 = vld [vmem:[%s6970_s9] sm:$0xf] }
 0x74d   :  { %2334 = vmatpush.bf16.msrb.mxu3 %v3988_v51  ;;  %v3984_v61 = vor.u32 %v4550_v12, %v3983_v22  ;;  %v3960_v60 = vor.u32 %v4544_v42, %v3959_v17  ;;  %v4540_v40 = vld [vmem:[%s6970_s9 + $0x8] sm:$0xf0] }
 0x74e   :  { %1915 = vst [vmem:[%s6974_s13] sm:$0xff] %v6137_v5  ;;  %v1951_v56 = vpack.c.bf16 %v6137_v5, %v6137_v5  ;;  %2360 = vmatpush.bf16.msrb.mxu1 %v3996_v45 }
 0x750   :  { %2088 = vmatmul.bf16.vlgmr.msra.gmra.mxu0 %v1951_v56  ;;  %2101 = vmatmul.bf16.vlgmr.msra.gmra.mxu1 %v1951_v56  ;;  %v1634_v3 = vpop.f32.mrf.mxu1 }
 0x751   :  { %2114 = vmatmul.bf16.vlgmr.msrb.gmra.mxu2 %v1951_v56  ;;  %2345 = vmatpush.bf16.msrb.mxu0 %v4016_v62  ;;  %v3964_v62 = vor.u32 %v4546_v39, %v3963_v34 }
 0x752   :  { %2335 = vmatpush.bf16.msrb.mxu3 %v3976_v37  ;;  %2361 = vmatpush.bf16.msrb.mxu1 %v3984_v61 }
 0x755   :  { %2346 = vmatpush.bf16.msrb.mxu0 %v4004_v49  ;;  %v4542_v49 = vld [vmem:[%s6970_s9 + $0x1c] sm:$0xf] }
 0x756   :  { %2336 = vmatpush.bf16.msrb.mxu3 %v3964_v62  ;;  %2362 = vmatpush.bf16.msrb.mxu1 %v3972_v10  ;;  %v3956_v51 = vor.u32 %v4542_v49, %v3953_v25 }
 0x759   :  { %2347 = vmatpush.bf16.msrb.mxu0 %v3992_v55  ;;  %v4539_v55 = vld [vmem:[%s6970_s9 + $0x4] sm:$0xf] }
 0x75a   :  { %2337 = vmatpush.bf16.msrb.mxu3 %v3952_v33  ;;  %2363 = vmatpush.bf16.msrb.mxu1 %v3960_v60  ;;  %v4121_v60 = vld [vmem:[%s6970_s9 + $0xa8] sm:$0xf] }
 0x75d   :  { %2348 = vmatpush.bf16.msrb.mxu0 %v3980_v23 }
 0x7cd   :  { %v2089_v35 = vpop.f32.mrf.mxu0  ;;  %v2102_v56 = vpop.f32.mrf.mxu1 }
 0x7ce   :  { %v2090_v8 = vadd.f32 %v2089_v35, %v5952_v13  ;;  %v2103_v3 = vadd.f32 %v2102_v56, %v6067_v59  ;;  %v3940_v35 = vor.u32 %v4540_v40, %v3939_v32  ;;  %v3941_v56 = vld [vmem:[%s6970_s9 + $0xc] sm:$0xf0]  ;;  %v4584_v32 = vld [vmem:[%s6970_s9 + $0xac] sm:$0xf] }
 0x7cf   :  { %v3944_v31 = vor.u32 %v4539_v55, %v3941_v56  ;;  %v4123_v55 = vld [vmem:[%s6970_s9 + $0xb4] sm:$0xf0] }
 0x7d0   :  { %v2119_v44 = vadd.f32 %v2090_v8, %v5944_v27  ;;  %v2139_v41 = vadd.f32 %v2103_v3, %v1592_v36  ;;  %v4545_v27 = vld [vmem:[%s6970_s9 + $0x34] sm:$0xf]  ;;  %v3947_v36 = vld [vmem:[%s6970_s9 + $0x8] sm:$0xf]  ;;  %2338 = vmatpush.bf16.msrb.mxu3 %v3940_v35  ;;  %v4586_v35 = vld [vmem:[%s6970_s9 + $0xb8] sm:$0xf0]  ;;  %v4126_v56 = vor.u32 %v4584_v32, %v4123_v55 }
 0x7d1   :  { %v3968_v19 = vor.u32 %v4545_v27, %v3965_v24  ;;  %v4541_v8 = vld [vmem:[%s6970_s9 + $0x10] sm:$0xf0]  ;;  %v4075_v55 = vld [vmem:[%s6970_s9 + $0x54] sm:$0xf0] }
 0x7d2   :  { %v3935_v1 = vmul.f32 -1.442695, %v2119_v44  ;;  %v3936_v28 = vmul.f32 -1.442695, %v2139_v41  ;;  %v3948_v20 = vor.u32 %v4541_v8, %v3947_v36  ;;  %v4109_v8 = vld [vmem:[%s6970_s9 + $0x90] sm:$0xf] }
 0x7d3   :  { %2349 = vmatpush.bf16.msrb.mxu0 %v3968_v19 }
 0x7d4   :  { %4776 = vpow2.f32 %v3935_v1  ;;  %v2115_v11 = vpop.f32.mrf.mxu2  ;;  %2364 = vmatpush.bf16.msrb.mxu1 %v3948_v20  ;;  %2595 = vmatpush.bf16.msra.mxu3 %v4126_v56  ;;  %v4111_v20 = vld [vmem:[%s6970_s9 + $0x9c] sm:$0xf0] }
 0x7d5   :  { %4778 = vpow2.f32 %v3936_v28  ;;  %v2091_v43 = vpop.f32.mrf.mxu0  ;;  %v2104_v63 = vpop.f32.mrf.mxu1  ;;  %v2116_v62 = vadd.f32 %v2115_v11, %v6114_v38 }
 0x7d7   :  { %2350 = vmatpush.bf16.msrb.mxu0 %v3956_v51 }
 0x7da   :  { %v4777_v45 = vpop.eup %4776 }
 0x7db   :  { %v4779_v3 = vpop.eup %4778  ;;  %v2123_v15 = vadd.f32 1.0, %v4777_v45  ;;  %2351 = vmatpush.bf16.msrb.mxu0 %v3944_v31  ;;  %v4129_v45 = vld [vmem:[%s6970_s9 + $0xb0] sm:$0xf] }
 0x7dc   :  { %v2143_v37 = vadd.f32 1.0, %v4779_v3  ;;  %v2117_v46 = vpop.f32.mrf.mxu2  ;;  %v4130_v36 = vor.u32 %v4586_v35, %v4129_v45  ;;  %v4582_v3 = vld [vmem:[%s6970_s9 + $0x98] sm:$0xf0]  ;;  %v4081_v45 = vld [vmem:[%s6970_s9 + $0x50] sm:$0xf] }
 0x7dd   :  { %4780 = vrcp.f32 %v2123_v15  ;;  %v2135_v1 = vand.u32 2147483648, %v2123_v15  ;;  %v2133_v34 = vand.u32 2147483647, %v2123_v15  ;;  %vm2129_vm6 = vweird.f32 %v2123_v15  ;;  %v4583_v46 = vld [vmem:[%s6970_s9 + $0xa0] sm:$0xf0] }
 0x7de   :  { %4782 = vrcp.f32 %v2143_v37  ;;  %v2155_v43 = vand.u32 2147483648, %v2143_v37  ;;  %vm2149_vm10 = vweird.f32 %v2143_v37  ;;  %v2153_v10 = vand.u32 2147483647, %v2143_v37  ;;  %v4574_v35 = vld [vmem:[%s6970_s9 + $0x58] sm:$0xf0] }
 0x7df   :  { %v2136_v24 = vor.u32 1.1754944e-38, %v2135_v1  ;;  %vm2134_vm8 = vcmp.eq.f32.partialorder %v2133_v34, 8.507059e+37  ;;  %2608 = vmatpush.bf16.msra.mxu0 %v4130_v36  ;;  %v4110_v31 = vor.u32 %v4582_v3, %v4109_v8  ;;  %v4105_v34 = vld [vmem:[%s6970_s9 + $0x80] sm:$0xf]  ;;  %v4082_v3 = vor.u32 %v4574_v35, %v4081_v45 }
 0x7e0   :  { %v2156_v49 = vor.u32 1.1754944e-38, %v2155_v43  ;;  %vm2154_vm12 = vcmp.eq.f32.partialorder %v2153_v10, 8.507059e+37  ;;  %v4085_v43 = vld [vmem:[%s6970_s9 + $0x60] sm:$0xf] }
 0x7e3   :  { %v4781_v22 = vpop.eup %4780 }
 0x7e4   :  { %v4783_v12 = vpop.eup %4782  ;;  %v2125_v44 = vmul.f32 %v4781_v22, %v2123_v15  ;;  %vm2130_vm5 = vweird.f32 %v4781_v22  ;;  %v4581_v15 = vld [vmem:[%s6970_s9 + $0x94] sm:$0xf] }
 0x7e5   :  { %v2145_v41 = vmul.f32 %v4783_v12, %v2143_v37  ;;  %vm2131_vm7 = vmor %vm2129_vm6, %vm2130_vm5  ;;  %vm2150_vm9 = vweird.f32 %v4783_v12  ;;  %v4117_v37 = vld [vmem:[%s6970_s9 + $0x98] sm:$0xf] }
 0x7e6   :  { %v2126_v23 = vsub.f32 1.0, %v2125_v44  ;;  %vm2151_vm11 = vmor %vm2149_vm10, %vm2150_vm9  ;;  %v4097_v44 = vld [vmem:[%s6970_s9 + $0x78] sm:$0xf] }
 0x7e7   :  { %v2146_v61 = vsub.f32 1.0, %v2145_v41  ;;  %v4579_v41 = vld [vmem:[%s6970_s9 + $0x80] sm:$0xf0] }
 0x7e8   :  { %v2127_v28 = vmul.f32 %v4781_v22, %v2126_v23  ;;  %v4578_v23 = vld [vmem:[%s6970_s9 + $0x7c] sm:$0xf]  ;;  %v4098_v1 = vor.u32 %v4579_v41, %v4097_v44 }
 0x7e9   :  { %v2147_v39 = vmul.f32 %v4783_v12, %v2146_v61 }
 0x7ea   :  { %v2128_v27 = vadd.f32 %v4781_v22, %v2127_v28  ;;  %v4099_v28 = vld [vmem:[%s6970_s9 + $0x84] sm:$0xf0] }
 0x7eb   :  { %v2148_v52 = vadd.f32 %v4783_v12, %v2147_v39  ;;  %v4580_v39 = vld [vmem:[%s6970_s9 + $0x88] sm:$0xf0] }
 0x7ec   :  { %v2132_v19 = vsel %vm2131_vm7, %v4781_v22, %v2128_v27  ;;  %v4114_v22 = vor.u32 %v4581_v15, %v4111_v20  ;;  %v1595_v27 = vadd.f32 %v6107_v26, %v6034_v16  ;;  %v4575_v26 = vld [vmem:[%s6970_s9 + $0x64] sm:$0xf]  ;;  %v4061_v15 = vld [vmem:[%s6970_s9 + $0x30] sm:$0xf]  ;;  %v4569_v20 = vld [vmem:[%s6970_s9 + $0x34] sm:$0xf] }
 0x7ed   :  { %v2137_v9 = vsel %vm2134_vm8, %v2136_v24, %v2132_v19  ;;  %v2152_v30 = vsel %vm2151_vm11, %v4783_v12, %v2148_v52  ;;  %v4118_v12 = vor.u32 %v4583_v46, %v4117_v37  ;;  %v4102_v19 = vor.u32 %v4578_v23, %v4099_v28  ;;  %v4069_v46 = vld [vmem:[%s6970_s9 + $0x38] sm:$0xf]  ;;  %v4051_v28 = vld [vmem:[%s6970_s9 + $0x24] sm:$0xf0] }
 0x7ee   :  { %v2159_v63 = vmul.f32 %v2137_v9, %v2116_v62  ;;  %v2157_v33 = vsel %vm2154_vm12, %v2156_v49, %v2152_v30  ;;  %2596 = vmatpush.bf16.msra.mxu3 %v4114_v22  ;;  %v4106_v9 = vor.u32 %v4580_v39, %v4105_v34  ;;  %v4093_v30 = vld [vmem:[%s6970_s9 + $0x68] sm:$0xf]  ;;  %v4577_v49 = vld [vmem:[%s6970_s9 + $0x70] sm:$0xf0]  ;;  %v4571_v22 = vld [vmem:[%s6970_s9 + $0x40] sm:$0xf0] }
 0x7ef   :  { %v2162_v25 = vsub.f32 1.0, %v2157_v33  ;;  %v2164_v42 = vmul.f32 %v2157_v33, %v6137_v5  ;;  %v4585_v5 = vld [vmem:[%s6970_s9 + $0xb0] sm:$0xf0]  ;;  %2609 = vmatpush.bf16.msra.mxu0 %v4118_v12  ;;  %v4070_v41 = vor.u32 %v4571_v22, %v4069_v46  ;;  %v4049_v23 = vld [vmem:[%s6970_s9 + $0x18] sm:$0xf] }
 0x7f0   :  { %v2160_v21 = vadd.f32 %v2159_v63, %v6043_v53  ;;  %v4122_v40 = vor.u32 %v4585_v5, %v4121_v60  ;;  %v4576_v63 = vld [vmem:[%s6970_s9 + $0x68] sm:$0xf0]  ;;  %v4573_v60 = vld [vmem:[%s6970_s9 + $0x50] sm:$0xf0]  ;;  %v4057_v34 = vld [vmem:[%s6970_s9 + $0x20] sm:$0xf] }
 0x7f1   :  { %v4086_v10 = vor.u32 %v4576_v63, %v4085_v43  ;;  %v4572_v5 = vld [vmem:[%s6970_s9 + $0x4c] sm:$0xf]  ;;  %v4037_v63 = vld [vmem:[%s6970_s9] sm:$0xf] }
 0x7f2   :  { %4784 = vtanh.f32 %v2160_v21  ;;  %2582 = vmatpush.bf16.msra.mxu2 %v4122_v40  ;;  %2597 = vmatpush.bf16.msra.mxu3 %v4102_v19  ;;  %v4087_v21 = vld [vmem:[%s6970_s9 + $0x6c] sm:$0xf0]  ;;  %v4078_v8 = vor.u32 %v4572_v5, %v4075_v55 }
 0x7f3   :  { %2610 = vmatpush.bf16.msra.mxu0 %v4106_v9 }
 0x7f6   :  { %2583 = vmatpush.bf16.msra.mxu2 %v4110_v31  ;;  %v4570_v31 = vld [vmem:[%s6970_s9 + $0x38] sm:$0xf0] }
 0x7f7   :  { %v4062_v37 = vor.u32 %v4570_v31, %v4061_v15 }
 0x7f8   :  { %v4785_v17 = vpop.eup %4784 }
 0x7f9   :  { %v2163_v11 = vmul.f32 %v4785_v17, %v2162_v25  ;;  %v4090_v25 = vor.u32 %v4575_v26, %v4087_v21  ;;  %v4094_v17 = vor.u32 %v4577_v49, %v4093_v30  ;;  %v4564_v26 = vld [vmem:[%s6970_s9 + $0x8] sm:$0xf0]  ;;  %v4039_v21 = vld [vmem:[%s6970_s9 + $0xc] sm:$0xf0]  ;;  %v4045_v30 = vld [vmem:[%s6970_s9 + $0x8] sm:$0xf] }
 0x7fa   :  { %2584 = vmatpush.bf16.msra.mxu2 %v4098_v1  ;;  %v4566_v1 = vld [vmem:[%s6970_s9 + $0x1c] sm:$0xf]  ;;  %v4565_v49 = vld [vmem:[%s6970_s9 + $0x10] sm:$0xf0] }
 0x7fb   :  { %v6302_v51 = vadd.f32 %v2164_v42, %v2163_v11  ;;  %2598 = vmatpush.bf16.msra.mxu3 %v4090_v25  ;;  %2611 = vmatpush.bf16.msra.mxu0 %v4094_v17 }
 0x7fd   :  { %2166 = vst [vmem:[%s6974_s13 + $0x8] sm:$0xff] %v6302_v51  ;;  %v2202_v53 = vpack.c.bf16 %v6302_v51, %v6302_v51 }
 0x7fe   :  { %2585 = vmatpush.bf16.msra.mxu2 %v4086_v10  ;;  %v4563_v10 = vld [vmem:[%s6970_s9 + $0x4] sm:$0xf] }
 0x7ff   :  { %2339 = vmatmul.bf16.vlgmr.msrb.gmra.mxu3 %v2202_v53  ;;  %2352 = vmatmul.bf16.vlgmr.msrb.gmra.mxu0 %v2202_v53  ;;  %v4042_v17 = vor.u32 %v4563_v10, %v4039_v21  ;;  %v4606_v10 = vld [vmem:[%s6970_s9 + $0x98] sm:$0xf0]  ;;  %v4605_v21 = vld [vmem:[%s6970_s9 + $0x94] sm:$0xf] }
 0x800   :  { %2365 = vmatmul.bf16.vlgmr.msrb.gmra.mxu1 %v2202_v53  ;;  %v4073_v53 = vld [vmem:[%s6970_s9 + $0x48] sm:$0xf]  ;;  %2599 = vmatpush.bf16.msra.mxu3 %v4078_v8 }
 0x801   :  { %v4074_v40 = vor.u32 %v4573_v60, %v4073_v53  ;;  %2612 = vmatpush.bf16.msra.mxu0 %v4082_v3 }
 0x803   :  { %2586 = vmatpush.bf16.msra.mxu2 %v4074_v40 }
 0x805   :  { %2613 = vmatpush.bf16.msra.mxu0 %v4070_v41 }
 0x807   :  { %2587 = vmatpush.bf16.msra.mxu2 %v4062_v37 }
 0x87c   :  { %v2353_v61 = vpop.f32.mrf.mxu0 }
 0x87d   :  { %v2354_v24 = vadd.f32 %v2353_v61, %v6067_v59  ;;  %v6367_v62 = vpop.f32.mrf.mxu1  ;;  %v4567_v61 = vld [vmem:[%s6970_s9 + $0x20] sm:$0xf0] }
 0x87e   :  { %v4050_v9 = vor.u32 %v4567_v61, %v4049_v23  ;;  %v2367_v15 = vadd.f32 %v6367_v62, %v6114_v38 }
 0x87f   :  { %v2390_v52 = vadd.f32 %v2354_v24, %v1595_v27  ;;  %v4568_v27 = vld [vmem:[%s6970_s9 + $0x28] sm:$0xf0] }
 0x880   :  { %v4058_v43 = vor.u32 %v4568_v27, %v4057_v34  ;;  %2588 = vmatpush.bf16.msra.mxu2 %v4050_v9  ;;  %v4608_v27 = vld [vmem:[%s6970_s9 + $0xac] sm:$0xf]  ;;  %v4227_v9 = vld [vmem:[%s6970_s9 + $0xb0] sm:$0xf] }
 0x881   :  { %v4034_v33 = vmul.f32 -1.442695, %v2390_v52  ;;  %v4054_v52 = vor.u32 %v4566_v1, %v4051_v28 }
 0x882   :  { %v2340_v11 = vpop.f32.mrf.mxu3  ;;  %2614 = vmatpush.bf16.msra.mxu0 %v4058_v43 }
 0x883   :  { %4786 = vpow2.f32 %v4034_v33  ;;  %v2341_v42 = vadd.f32 %v2340_v11, %v5952_v13  ;;  %v4038_v33 = vor.u32 %v4564_v26, %v4037_v63  ;;  %v4046_v11 = vor.u32 %v4565_v49, %v4045_v30  ;;  %v4207_v26 = vld [vmem:[%s6970_s9 + $0x90] sm:$0xf]  ;;  %v4209_v49 = vld [vmem:[%s6970_s9 + $0x9c] sm:$0xf0] }
 0x884   :  { %v2355_v32 = vpop.f32.mrf.mxu0  ;;  %v4208_v30 = vor.u32 %v4606_v10, %v4207_v26  ;;  %v4167_v10 = vld [vmem:[%s6970_s9 + $0x38] sm:$0xf] }
 0x885   :  { %v2370_v56 = vadd.f32 %v2341_v42, %v5955_v4  ;;  %v2368_v36 = vpop.f32.mrf.mxu1  ;;  %v4063_v4 = vld [vmem:[%s6970_s9 + $0x3c] sm:$0xf0]  ;;  %2589 = vmatpush.bf16.msra.mxu2 %v4038_v33  ;;  %v4215_v33 = vld [vmem:[%s6970_s9 + $0x98] sm:$0xf] }
 0x886   :  { %v4066_v44 = vor.u32 %v4569_v20, %v4063_v4  ;;  %2615 = vmatpush.bf16.msra.mxu0 %v4046_v11 }
 0x887   :  { %v4033_v12 = vmul.f32 -1.442695, %v2370_v56 }
 0x888   :  { %2600 = vmatpush.bf16.msra.mxu3 %v4066_v44 }
 0x889   :  { %v4787_v39 = vpop.eup %4786  ;;  %4788 = vpow2.f32 %v4033_v12 }
 0x88a   :  { %v2394_v24 = vadd.f32 1.0, %v4787_v39  ;;  %v2342_v19 = vpop.f32.mrf.mxu3  ;;  %v4219_v39 = vld [vmem:[%s6970_s9 + $0xa8] sm:$0xf] }
 0x88b   :  { %v4221_v19 = vld [vmem:[%s6970_s9 + $0xb4] sm:$0xf0] }
 0x88c   :  { %4790 = vrcp.f32 %v2394_v24  ;;  %2601 = vmatpush.bf16.msra.mxu3 %v4054_v52  ;;  %v2406_v4 = vand.u32 2147483648, %v2394_v24  ;;  %vm2400_vm2 = vweird.f32 %v2394_v24  ;;  %v2404_v22 = vand.u32 2147483647, %v2394_v24  ;;  %v4610_v52 = vld [vmem:[%s6970_s9 + $0xb8] sm:$0xf0] }
 0x88d   :  { %v4224_v43 = vor.u32 %v4608_v27, %v4221_v19  ;;  %v4228_v63 = vor.u32 %v4610_v52, %v4227_v9  ;;  %v4159_v52 = vld [vmem:[%s6970_s9 + $0x30] sm:$0xf] }
 0x88e   :  { %v2407_v41 = vor.u32 1.1754944e-38, %v2406_v4  ;;  %vm2405_vm4 = vcmp.eq.f32.partialorder %v2404_v22, 8.507059e+37 }
 0x88f   :  { %v4789_v25 = vpop.eup %4788  ;;  %2846 = vmatpush.bf16.msrb.mxu2 %v4224_v43  ;;  %v4594_v43 = vld [vmem:[%s6970_s9 + $0x38] sm:$0xf0] }
 0x890   :  { %v2374_v42 = vadd.f32 1.0, %v4789_v25  ;;  %2602 = vmatpush.bf16.msra.mxu3 %v4042_v17  ;;  %v4607_v25 = vld [vmem:[%s6970_s9 + $0xa0] sm:$0xf0]  ;;  %v4212_v17 = vor.u32 %v4605_v21, %v4209_v49  ;;  %v4160_v26 = vor.u32 %v4594_v43, %v4159_v52 }
 0x891   :  { %v4216_v11 = vor.u32 %v4607_v25, %v4215_v33  ;;  %v4595_v21 = vld [vmem:[%s6970_s9 + $0x40] sm:$0xf0] }
 0x892   :  { %4792 = vrcp.f32 %v2374_v42  ;;  %v4791_v53 = vpop.eup %4790  ;;  %v2386_v45 = vand.u32 2147483648, %v2374_v42  ;;  %v2384_v56 = vand.u32 2147483647, %v2374_v42  ;;  %vm2380_vm13 = vweird.f32 %v2374_v42 }
 0x893   :  { %v2396_v60 = vmul.f32 %v4791_v53, %v2394_v24  ;;  %vm2401_vm1 = vweird.f32 %v4791_v53  ;;  %2847 = vmatpush.bf16.msrb.mxu2 %v4212_v17  ;;  %v4168_v25 = vor.u32 %v4595_v21, %v4167_v10  ;;  %v4147_v17 = vld [vmem:[%s6970_s9 + $0x18] sm:$0xf] }
 0x894   :  { %v2387_v3 = vor.u32 1.1754944e-38, %v2386_v45  ;;  %vm2385_vm15 = vcmp.eq.f32.partialorder %v2384_v56, 8.507059e+37  ;;  %vm2402_vm3 = vmor %vm2400_vm2, %vm2401_vm1  ;;  %2859 = vmatpush.bf16.msrb.mxu3 %v4228_v63  ;;  %v4593_v63 = vld [vmem:[%s6970_s9 + $0x34] sm:$0xf] }
 0x895   :  { %v2397_v40 = vsub.f32 1.0, %v2396_v60  ;;  %v4602_v60 = vld [vmem:[%s6970_s9 + $0x7c] sm:$0xf] }
 0x897   :  { %v2398_v36 = vmul.f32 %v4791_v53, %v2397_v40  ;;  %v4203_v40 = vld [vmem:[%s6970_s9 + $0x80] sm:$0xf] }
 0x898   :  { %v4793_v5 = vpop.eup %4792  ;;  %2860 = vmatpush.bf16.msrb.mxu3 %v4216_v11  ;;  %v4591_v11 = vld [vmem:[%s6970_s9 + $0x20] sm:$0xf0] }
 0x899   :  { %v2376_v32 = vmul.f32 %v4793_v5, %v2374_v42  ;;  %vm2381_vm0 = vweird.f32 %v4793_v5  ;;  %v2399_v37 = vadd.f32 %v4791_v53, %v2398_v36  ;;  %v4195_v42 = vld [vmem:[%s6970_s9 + $0x78] sm:$0xf]  ;;  %v4183_v36 = vld [vmem:[%s6970_s9 + $0x60] sm:$0xf] }
 0x89a   :  { %vm2382_vm14 = vmor %vm2380_vm13, %vm2381_vm0 }
 0x89b   :  { %v2377_v55 = vsub.f32 1.0, %v2376_v32  ;;  %v2403_v44 = vsel %vm2402_vm3, %v4791_v53, %v2399_v37  ;;  %v4603_v53 = vld [vmem:[%s6970_s9 + $0x80] sm:$0xf0]  ;;  %v4197_v32 = vld [vmem:[%s6970_s9 + $0x84] sm:$0xf0] }
 0x89c   :  { %v2408_v23 = vsel %vm2405_vm4, %v2407_v41, %v2403_v44  ;;  %v4601_v37 = vld [vmem:[%s6970_s9 + $0x70] sm:$0xf0]  ;;  %v1597_v44 = vadd.f32 %v6118_v57, %v6034_v16  ;;  %v4173_v57 = vld [vmem:[%s6970_s9 + $0x54] sm:$0xf0] }
 0x89d   :  { %v2378_v35 = vmul.f32 %v4793_v5, %v2377_v55  ;;  %v2413_v61 = vsub.f32 1.0, %v2408_v23  ;;  %v2415_v28 = vmul.f32 %v2408_v23, %v6302_v51  ;;  %v4609_v51 = vld [vmem:[%s6970_s9 + $0xb0] sm:$0xf0]  ;;  %v4604_v55 = vld [vmem:[%s6970_s9 + $0x88] sm:$0xf0] }
 0x89e   :  { %v4220_v24 = vor.u32 %v4609_v51, %v4219_v39  ;;  %v4204_v56 = vor.u32 %v4604_v55, %v4203_v40  ;;  %v4598_v39 = vld [vmem:[%s6970_s9 + $0x58] sm:$0xf0]  ;;  %v4148_v55 = vor.u32 %v4591_v11, %v4147_v17 }
 0x89f   :  { %v2379_v8 = vadd.f32 %v4793_v5, %v2378_v35  ;;  %v4200_v35 = vor.u32 %v4602_v60, %v4197_v32  ;;  %v4155_v60 = vld [vmem:[%s6970_s9 + $0x20] sm:$0xf] }
 0x8a0   :  { %2833 = vmatpush.bf16.msra.mxu1 %v4220_v24  ;;  %2861 = vmatpush.bf16.msrb.mxu3 %v4204_v56 }
 0x8a1   :  { %v2383_v31 = vsel %vm2382_vm14, %v4793_v5, %v2379_v8  ;;  %v4196_v5 = vor.u32 %v4603_v53, %v4195_v42  ;;  %2848 = vmatpush.bf16.msrb.mxu2 %v4200_v35  ;;  %v4600_v8 = vld [vmem:[%s6970_s9 + $0x68] sm:$0xf0]  ;;  %v4590_v42 = vld [vmem:[%s6970_s9 + $0x1c] sm:$0xf]  ;;  %v4149_v53 = vld [vmem:[%s6970_s9 + $0x24] sm:$0xf0] }
 0x8a2   :  { %v2388_v20 = vsel %vm2385_vm15, %v2387_v3, %v2383_v31  ;;  %v4599_v3 = vld [vmem:[%s6970_s9 + $0x64] sm:$0xf]  ;;  %v4185_v31 = vld [vmem:[%s6970_s9 + $0x6c] sm:$0xf0]  ;;  %v4152_v35 = vor.u32 %v4590_v42, %v4149_v53  ;;  %v4317_v53 = vld [vmem:[%s6970_s9 + $0xa8] sm:$0xf] }
 0x8a3   :  { %v2410_v46 = vmul.f32 %v2388_v20, %v2367_v15  ;;  %v4184_v15 = vor.u32 %v4600_v8, %v4183_v36  ;;  %v4191_v20 = vld [vmem:[%s6970_s9 + $0x68] sm:$0xf]  ;;  %v4188_v4 = vor.u32 %v4599_v3, %v4185_v31  ;;  %v4135_v36 = vld [vmem:[%s6970_s9] sm:$0xf]  ;;  %v4588_v8 = vld [vmem:[%s6970_s9 + $0x8] sm:$0xf0] }
 0x8a4   :  { %2834 = vmatpush.bf16.msra.mxu1 %v4208_v30  ;;  %v4587_v3 = vld [vmem:[%s6970_s9 + $0x4] sm:$0xf]  ;;  %v4143_v31 = vld [vmem:[%s6970_s9 + $0x8] sm:$0xf] }
 0x8a5   :  { %v2411_v12 = vadd.f32 %v2410_v46, %v6110_v14  ;;  %v4192_v46 = vor.u32 %v4601_v37, %v4191_v20  ;;  %2849 = vmatpush.bf16.msrb.mxu2 %v4188_v4  ;;  %v4589_v20 = vld [vmem:[%s6970_s9 + $0x10] sm:$0xf0]  ;;  %v4136_v37 = vor.u32 %v4588_v8, %v4135_v36  ;;  %v4305_v36 = vld [vmem:[%s6970_s9 + $0x90] sm:$0xf]  ;;  %v4630_v8 = vld [vmem:[%s6970_s9 + $0x98] sm:$0xf0] }
 0x8a7   :  { %4794 = vtanh.f32 %v2411_v12  ;;  %2862 = vmatpush.bf16.msrb.mxu3 %v4192_v46 }
 0x8a8   :  { %2835 = vmatpush.bf16.msra.mxu1 %v4196_v5  ;;  %v4592_v5 = vld [vmem:[%s6970_s9 + $0x28] sm:$0xf0] }
 0x8a9   :  { %v4156_v56 = vor.u32 %v4592_v5, %v4155_v60  ;;  %v4632_v60 = vld [vmem:[%s6970_s9 + $0xac] sm:$0xf] }
 0x8ac   :  { %2836 = vmatpush.bf16.msra.mxu1 %v4184_v15  ;;  %v4137_v15 = vld [vmem:[%s6970_s9 + $0xc] sm:$0xf0] }
 0x8ad   :  { %v4795_v1 = vpop.eup %4794  ;;  %v4140_v46 = vor.u32 %v4587_v3, %v4137_v15  ;;  %v4629_v3 = vld [vmem:[%s6970_s9 + $0x94] sm:$0xf]  ;;  %v4306_v15 = vor.u32 %v4630_v8, %v4305_v36  ;;  %v4619_v36 = vld [vmem:[%s6970_s9 + $0x40] sm:$0xf0] }
 0x8ae   :  { %v2414_v62 = vmul.f32 %v4795_v1, %v2413_v61  ;;  %v4171_v61 = vld [vmem:[%s6970_s9 + $0x48] sm:$0xf]  ;;  %v4597_v1 = vld [vmem:[%s6970_s9 + $0x50] sm:$0xf0] }
 0x8b0   :  { %v6465_v34 = vadd.f32 %v2415_v28, %v2414_v62  ;;  %v4596_v62 = vld [vmem:[%s6970_s9 + $0x4c] sm:$0xf]  ;;  %v4172_v28 = vor.u32 %v4597_v1, %v4171_v61 }
 0x8b1   :  { %v4176_v19 = vor.u32 %v4596_v62, %v4173_v57 }
 0x8b2   :  { %2417 = vst [vmem:[%s6974_s13 + $0x10] sm:$0xff] %v6465_v34  ;;  %v2453_v14 = vpack.c.bf16 %v6465_v34, %v6465_v34  ;;  %2837 = vmatpush.bf16.msra.mxu1 %v4172_v28 }
 0x8b3   :  { %2850 = vmatpush.bf16.msrb.mxu2 %v4176_v19 }
 0x8b4   :  { %2590 = vmatmul.bf16.vlgmr.msra.gmra.mxu2 %v2453_v14  ;;  %2603 = vmatmul.bf16.vlgmr.msra.gmra.mxu3 %v2453_v14 }
 0x8b5   :  { %2616 = vmatmul.bf16.vlgmr.msra.gmra.mxu0 %v2453_v14  ;;  %v4179_v14 = vld [vmem:[%s6970_s9 + $0x50] sm:$0xf] }
 0x8b6   :  { %v4180_v9 = vor.u32 %v4598_v39, %v4179_v14  ;;  %2838 = vmatpush.bf16.msra.mxu1 %v4160_v26 }
 0x8b8   :  { %2863 = vmatpush.bf16.msrb.mxu3 %v4180_v9 }
 0x8ba   :  { %2839 = vmatpush.bf16.msra.mxu1 %v4148_v55  ;;  %v4634_v55 = vld [vmem:[%s6970_s9 + $0xb8] sm:$0xf0] }
 0x8bc   :  { %2864 = vmatpush.bf16.msrb.mxu3 %v4168_v25 }
 0x8be   :  { %2840 = vmatpush.bf16.msra.mxu1 %v4136_v37  ;;  %v4631_v37 = vld [vmem:[%s6970_s9 + $0xa0] sm:$0xf0] }
 0x8c0   :  { %2865 = vmatpush.bf16.msrb.mxu3 %v4156_v56 }
 0x932   :  { %v6527_v45 = vpop.f32.mrf.mxu0 }
 0x933   :  { %v2618_v9 = vadd.f32 %v6527_v45, %v6114_v38 }
 0x937   :  { %v2591_v22 = vpop.f32.mrf.mxu2  ;;  %v2604_v12 = vpop.f32.mrf.mxu3 }
 0x938   :  { %v2592_v41 = vadd.f32 %v2591_v22, %v5952_v13  ;;  %v2605_v23 = vadd.f32 %v2604_v12, %v6067_v59  ;;  %v4144_v22 = vor.u32 %v4589_v20, %v4143_v31  ;;  %v4307_v31 = vld [vmem:[%s6970_s9 + $0x9c] sm:$0xf0]  ;;  %v4313_v20 = vld [vmem:[%s6970_s9 + $0x98] sm:$0xf] }
 0x93a   :  { %v2621_v51 = vadd.f32 %v2592_v41, %v5966_v58  ;;  %v2641_v27 = vadd.f32 %v2605_v23, %v1597_v44  ;;  %v2619_v24 = vpop.f32.mrf.mxu0  ;;  %v4161_v58 = vld [vmem:[%s6970_s9 + $0x3c] sm:$0xf0]  ;;  %2866 = vmatpush.bf16.msrb.mxu3 %v4144_v22  ;;  %v4293_v22 = vld [vmem:[%s6970_s9 + $0x78] sm:$0xf] }
 0x93b   :  { %v4164_v33 = vor.u32 %v4593_v63, %v4161_v58 }
 0x93c   :  { %v4131_v30 = vmul.f32 -1.442695, %v2621_v51  ;;  %v4132_v49 = vmul.f32 -1.442695, %v2641_v27 }
 0x93d   :  { %2851 = vmatpush.bf16.msrb.mxu2 %v4164_v33 }
 0x93e   :  { %4796 = vpow2.f32 %v4131_v30 }
 0x93f   :  { %4798 = vpow2.f32 %v4132_v49  ;;  %v2593_v32 = vpop.f32.mrf.mxu2  ;;  %v2606_v40 = vpop.f32.mrf.mxu3 }
 0x940   :  { %v4319_v32 = vld [vmem:[%s6970_s9 + $0xb4] sm:$0xf0]  ;;  %v4325_v40 = vld [vmem:[%s6970_s9 + $0xb0] sm:$0xf] }
 0x941   :  { %2852 = vmatpush.bf16.msrb.mxu2 %v4152_v35  ;;  %v4322_v35 = vor.u32 %v4632_v60, %v4319_v32  ;;  %v4326_v56 = vor.u32 %v4634_v55, %v4325_v40  ;;  %v4265_v32 = vld [vmem:[%s6970_s9 + $0x38] sm:$0xf]  ;;  %v1600_v40 = vadd.f32 %v6126_v2, %v6034_v16  ;;  %v4615_v2 = vld [vmem:[%s6970_s9 + $0x20] sm:$0xf0] }
 0x943   :  { %3097 = vmatpush.bf16.msrb.mxu1 %v4322_v35 }
 0x944   :  { %v4797_v4 = vpop.eup %4796 }
 0x945   :  { %v4799_v12 = vpop.eup %4798  ;;  %v2625_v44 = vadd.f32 1.0, %v4797_v4  ;;  %2853 = vmatpush.bf16.msrb.mxu2 %v4140_v46  ;;  %v4310_v4 = vor.u32 %v4629_v3, %v4307_v31  ;;  %v4314_v46 = vor.u32 %v4631_v37, %v4313_v20  ;;  %v4266_v3 = vor.u32 %v4619_v36, %v4265_v32  ;;  %v4245_v31 = vld [vmem:[%s6970_s9 + $0x18] sm:$0xf]  ;;  %v4614_v20 = vld [vmem:[%s6970_s9 + $0x1c] sm:$0xf] }
 0x946   :  { %v2645_v41 = vadd.f32 1.0, %v4799_v12  ;;  %v4627_v12 = vld [vmem:[%s6970_s9 + $0x80] sm:$0xf0]  ;;  %v4246_v37 = vor.u32 %v4615_v2, %v4245_v31  ;;  %v4415_v2 = vld [vmem:[%s6970_s9 + $0xa8] sm:$0xf] }
 0x947   :  { %4800 = vrcp.f32 %v2625_v44  ;;  %v2637_v57 = vand.u32 2147483648, %v2625_v44  ;;  %v2635_v51 = vand.u32 2147483647, %v2625_v44  ;;  %vm2631_vm6 = vweird.f32 %v2625_v44  ;;  %3098 = vmatpush.bf16.msrb.mxu1 %v4310_v4  ;;  %v4247_v4 = vld [vmem:[%s6970_s9 + $0x24] sm:$0xf0] }
 0x948   :  { %4802 = vrcp.f32 %v2645_v41  ;;  %v2657_v58 = vand.u32 2147483648, %v2645_v41  ;;  %vm2651_vm10 = vweird.f32 %v2645_v41  ;;  %v2655_v10 = vand.u32 2147483647, %v2645_v41 }
 0x949   :  { %v2638_v19 = vor.u32 1.1754944e-38, %v2637_v57  ;;  %vm2636_vm8 = vcmp.eq.f32.partialorder %v2635_v51, 8.507059e+37  ;;  %3110 = vmatpush.bf16.msra.mxu2 %v4326_v56  ;;  %v4281_v57 = vld [vmem:[%s6970_s9 + $0x60] sm:$0xf] }
 0x94a   :  { %v2658_v49 = vor.u32 1.1754944e-38, %v2657_v58  ;;  %vm2656_vm12 = vcmp.eq.f32.partialorder %v2655_v10, 8.507059e+37  ;;  %v4621_v58 = vld [vmem:[%s6970_s9 + $0x50] sm:$0xf0]  ;;  %v4620_v10 = vld [vmem:[%s6970_s9 + $0x4c] sm:$0xf] }
 0x94d   :  { %v4801_v23 = vpop.eup %4800  ;;  %3111 = vmatpush.bf16.msra.mxu2 %v4314_v46  ;;  %v4253_v46 = vld [vmem:[%s6970_s9 + $0x20] sm:$0xf] }
 0x94e   :  { %v4803_v61 = vpop.eup %4802  ;;  %v2627_v1 = vmul.f32 %v4801_v23, %v2625_v44  ;;  %vm2632_vm5 = vweird.f32 %v4801_v23  ;;  %v4626_v44 = vld [vmem:[%s6970_s9 + $0x7c] sm:$0xf] }
 0x94f   :  { %v2647_v62 = vmul.f32 %v4803_v61, %v2645_v41  ;;  %vm2633_vm7 = vmor %vm2631_vm6, %vm2632_vm5  ;;  %vm2652_vm9 = vweird.f32 %v4803_v61  ;;  %v4294_v41 = vor.u32 %v4627_v12, %v4293_v22  ;;  %v4616_v22 = vld [vmem:[%s6970_s9 + $0x28] sm:$0xf0] }
 0x950   :  { %v2628_v28 = vsub.f32 1.0, %v2627_v1  ;;  %vm2653_vm11 = vmor %vm2651_vm10, %vm2652_vm9  ;;  %v4628_v1 = vld [vmem:[%s6970_s9 + $0x88] sm:$0xf0] }
 0x951   :  { %v2648_v14 = vsub.f32 1.0, %v2647_v62 }
 0x952   :  { %v2629_v39 = vmul.f32 %v4801_v23, %v2628_v28 }
 0x953   :  { %v2649_v27 = vmul.f32 %v4803_v61, %v2648_v14  ;;  %v4624_v14 = vld [vmem:[%s6970_s9 + $0x68] sm:$0xf0] }
 0x954   :  { %v2630_v24 = vadd.f32 %v4801_v23, %v2629_v39  ;;  %v4623_v39 = vld [vmem:[%s6970_s9 + $0x64] sm:$0xf]  ;;  %v4282_v51 = vor.u32 %v4624_v14, %v4281_v57  ;;  %v4235_v57 = vld [vmem:[%s6970_s9 + $0xc] sm:$0xf0]  ;;  %v4241_v14 = vld [vmem:[%s6970_s9 + $0x8] sm:$0xf] }
 0x955   :  { %v2650_v63 = vadd.f32 %v4803_v61, %v2649_v27  ;;  %v4283_v27 = vld [vmem:[%s6970_s9 + $0x6c] sm:$0xf0] }
 0x956   :  { %v2634_v52 = vsel %vm2633_vm7, %v4801_v23, %v2630_v24  ;;  %v4295_v23 = vld [vmem:[%s6970_s9 + $0x84] sm:$0xf0] }
 0x957   :  { %v2639_v43 = vsel %vm2636_vm8, %v2638_v19, %v2634_v52  ;;  %v2654_v30 = vsel %vm2653_vm11, %v4803_v61, %v2650_v63  ;;  %v4301_v61 = vld [vmem:[%s6970_s9 + $0x80] sm:$0xf]  ;;  %v4298_v62 = vor.u32 %v4626_v44, %v4295_v23  ;;  %v4289_v24 = vld [vmem:[%s6970_s9 + $0x68] sm:$0xf]  ;;  %v4625_v19 = vld [vmem:[%s6970_s9 + $0x70] sm:$0xf0]  ;;  %v4250_v44 = vor.u32 %v4614_v20, %v4247_v4 }
 0x958   :  { %v2661_v26 = vmul.f32 %v2639_v43, %v2618_v9  ;;  %v2659_v33 = vsel %vm2656_vm12, %v2658_v49, %v2654_v30  ;;  %v4302_v28 = vor.u32 %v4628_v1, %v4301_v61  ;;  %v4286_v9 = vor.u32 %v4623_v39, %v4283_v27  ;;  %v4271_v30 = vld [vmem:[%s6970_s9 + $0x54] sm:$0xf0]  ;;  %v4277_v49 = vld [vmem:[%s6970_s9 + $0x50] sm:$0xf]  ;;  %v4233_v23 = vld [vmem:[%s6970_s9] sm:$0xf] }
 0x959   :  { %v2664_v25 = vsub.f32 1.0, %v2659_v33  ;;  %v2666_v11 = vmul.f32 %v2659_v33, %v6465_v34  ;;  %v4633_v34 = vld [vmem:[%s6970_s9 + $0xb0] sm:$0xf0]  ;;  %3099 = vmatpush.bf16.msrb.mxu1 %v4298_v62  ;;  %v4290_v52 = vor.u32 %v4625_v19, %v4289_v24  ;;  %v4622_v33 = vld [vmem:[%s6970_s9 + $0x58] sm:$0xf0] }
 0x95a   :  { %v2662_v21 = vadd.f32 %v2661_v26, %v6124_v29  ;;  %v4318_v5 = vor.u32 %v4633_v34, %v4317_v53  ;;  %3112 = vmatpush.bf16.msra.mxu2 %v4302_v28  ;;  %v4269_v26 = vld [vmem:[%s6970_s9 + $0x48] sm:$0xf]  ;;  %v4618_v53 = vld [vmem:[%s6970_s9 + $0x38] sm:$0xf0]  ;;  %v4612_v61 = vld [vmem:[%s6970_s9 + $0x8] sm:$0xf0] }
 0x95b   :  { %v4611_v1 = vld [vmem:[%s6970_s9 + $0x4] sm:$0xf]  ;;  %v4234_v28 = vor.u32 %v4612_v61, %v4233_v23  ;;  %v4613_v39 = vld [vmem:[%s6970_s9 + $0x10] sm:$0xf0]  ;;  %v4656_v20 = vld [vmem:[%s6970_s9 + $0xac] sm:$0xf] }
 0x95c   :  { %4804 = vtanh.f32 %v2662_v21  ;;  %3084 = vmatpush.bf16.msrb.mxu0 %v4318_v5  ;;  %v4270_v21 = vor.u32 %v4621_v58, %v4269_v26  ;;  %v4259_v5 = vld [vmem:[%s6970_s9 + $0x3c] sm:$0xf0]  ;;  %v4238_v24 = vor.u32 %v4611_v1, %v4235_v57  ;;  %v4242_v19 = vor.u32 %v4613_v39, %v4241_v14  ;;  %v4417_v4 = vld [vmem:[%s6970_s9 + $0xb4] sm:$0xf0]  ;;  %v4654_v23 = vld [vmem:[%s6970_s9 + $0x98] sm:$0xf0] }
 0x95d   :  { %3100 = vmatpush.bf16.msrb.mxu1 %v4286_v9  ;;  %v4653_v61 = vld [vmem:[%s6970_s9 + $0x94] sm:$0xf]  ;;  %v4655_v57 = vld [vmem:[%s6970_s9 + $0xa0] sm:$0xf0] }
 0x95e   :  { %3113 = vmatpush.bf16.msra.mxu2 %v4290_v52 }
 0x960   :  { %3085 = vmatpush.bf16.msrb.mxu0 %v4306_v15 }
 0x962   :  { %v4805_v17 = vpop.eup %4804 }
 0x963   :  { %v2665_v45 = vmul.f32 %v4805_v17, %v2664_v25  ;;  %v4274_v17 = vor.u32 %v4620_v10, %v4271_v30 }
 0x964   :  { %3086 = vmatpush.bf16.msrb.mxu0 %v4294_v41  ;;  %v4254_v41 = vor.u32 %v4616_v22, %v4253_v46  ;;  %v4423_v46 = vld [vmem:[%s6970_s9 + $0xb0] sm:$0xf]  ;;  %v4658_v22 = vld [vmem:[%s6970_s9 + $0xb8] sm:$0xf0] }
 0x965   :  { %v6628_v42 = vadd.f32 %v2666_v11, %v2665_v45  ;;  %v4278_v45 = vor.u32 %v4622_v33, %v4277_v49  ;;  %3101 = vmatpush.bf16.msrb.mxu1 %v4274_v17 }
 0x967   :  { %2668 = vst [vmem:[%s6974_s13 + $0x18] sm:$0xff] %v6628_v42  ;;  %v2704_v29 = vpack.c.bf16 %v6628_v42, %v6628_v42  ;;  %3114 = vmatpush.bf16.msra.mxu2 %v4278_v45 }
 0x968   :  { %3087 = vmatpush.bf16.msrb.mxu0 %v4282_v51 }
 0x969   :  { %2841 = vmatmul.bf16.vlgmr.msra.gmra.mxu1 %v2704_v29  ;;  %2854 = vmatmul.bf16.vlgmr.msrb.gmra.mxu2 %v2704_v29 }
 0x96a   :  { %2867 = vmatmul.bf16.vlgmr.msrb.gmra.mxu3 %v2704_v29  ;;  %v4257_v29 = vld [vmem:[%s6970_s9 + $0x30] sm:$0xf] }
 0x96b   :  { %v4258_v60 = vor.u32 %v4618_v53, %v4257_v29  ;;  %3115 = vmatpush.bf16.msra.mxu2 %v4266_v3 }
 0x96c   :  { %3088 = vmatpush.bf16.msrb.mxu0 %v4270_v21 }
 0x96f   :  { %3116 = vmatpush.bf16.msra.mxu2 %v4254_v41  ;;  %v4403_v41 = vld [vmem:[%s6970_s9 + $0x90] sm:$0xf] }
 0x970   :  { %3089 = vmatpush.bf16.msrb.mxu0 %v4258_v60  ;;  %v4404_v1 = vor.u32 %v4654_v23, %v4403_v41 }
 0x973   :  { %3117 = vmatpush.bf16.msra.mxu2 %v4242_v19 }
 0x974   :  { %3090 = vmatpush.bf16.msrb.mxu0 %v4246_v37 }
 0x978   :  { %3091 = vmatpush.bf16.msrb.mxu0 %v4234_v28  ;;  %v4411_v28 = vld [vmem:[%s6970_s9 + $0x98] sm:$0xf] }
 0x979   :  { %v4412_v39 = vor.u32 %v4655_v57, %v4411_v28  ;;  %v4345_v57 = vld [vmem:[%s6970_s9 + $0x24] sm:$0xf0] }
 0x9e6   :  { %v2842_v43 = vpop.f32.mrf.mxu1 }
 0x9e7   :  { %v2843_v63 = vadd.f32 %v2842_v43, %v5952_v13 }
 0x9e9   :  { %v2872_v25 = vadd.f32 %v2843_v63, %v5989_v18  ;;  %v4617_v18 = vld [vmem:[%s6970_s9 + $0x34] sm:$0xf] }
 0x9ea   :  { %v4262_v56 = vor.u32 %v4617_v18, %v4259_v5 }
 0x9eb   :  { %v4229_v11 = vmul.f32 -1.442695, %v2872_v25 }
 0x9ec   :  { %v2855_v34 = vpop.f32.mrf.mxu2  ;;  %3102 = vmatpush.bf16.msrb.mxu1 %v4262_v56 }
 0x9ed   :  { %4806 = vpow2.f32 %v4229_v11  ;;  %v2856_v55 = vadd.f32 %v2855_v34, %v6067_v59  ;;  %v2868_v35 = vpop.f32.mrf.mxu3 }
 0x9ee   :  { %v2844_v8 = vpop.f32.mrf.mxu1  ;;  %v2869_v11 = vadd.f32 %v2868_v35, %v6114_v38 }
 0x9ef   :  { %v2892_v15 = vadd.f32 %v2856_v55, %v1600_v40 }
 0x9f0   :  { %3103 = vmatpush.bf16.msrb.mxu1 %v4250_v44  ;;  %v4424_v44 = vor.u32 %v4658_v22, %v4423_v46  ;;  %v4363_v22 = vld [vmem:[%s6970_s9 + $0x38] sm:$0xf] }
 0x9f1   :  { %v4230_v12 = vmul.f32 -1.442695, %v2892_v15 }
 0x9f3   :  { %v4807_v62 = vpop.eup %4806  ;;  %4808 = vpow2.f32 %v4230_v12  ;;  %v4420_v12 = vor.u32 %v4656_v20, %v4417_v4  ;;  %v4357_v20 = vld [vmem:[%s6970_s9 + $0x3c] sm:$0xf0] }
 0x9f4   :  { %v2876_v51 = vadd.f32 1.0, %v4807_v62  ;;  %v2857_v27 = vpop.f32.mrf.mxu2  ;;  %3104 = vmatpush.bf16.msrb.mxu1 %v4238_v24  ;;  %v4405_v62 = vld [vmem:[%s6970_s9 + $0x9c] sm:$0xf0]  ;;  %v4650_v24 = vld [vmem:[%s6970_s9 + $0x7c] sm:$0xf] }
 0x9f5   :  { %v2870_v9 = vpop.f32.mrf.mxu3  ;;  %3348 = vmatpush.bf16.msra.mxu0 %v4420_v12  ;;  %v4408_v14 = vor.u32 %v4653_v61, %v4405_v62  ;;  %v4651_v27 = vld [vmem:[%s6970_s9 + $0x80] sm:$0xf0]  ;;  %v4343_v61 = vld [vmem:[%s6970_s9 + $0x18] sm:$0xf]  ;;  %v4638_v62 = vld [vmem:[%s6970_s9 + $0x1c] sm:$0xf] }
 0x9f6   :  { %4810 = vrcp.f32 %v2876_v51  ;;  %v2888_v10 = vand.u32 2147483648, %v2876_v51  ;;  %v2886_v30 = vand.u32 2147483647, %v2876_v51  ;;  %vm2882_vm13 = vweird.f32 %v2876_v51  ;;  %v4393_v9 = vld [vmem:[%s6970_s9 + $0x84] sm:$0xf0] }
 0x9f7   :  { %v4643_v12 = vld [vmem:[%s6970_s9 + $0x40] sm:$0xf0] }
 0x9f8   :  { %v2889_v17 = vor.u32 1.1754944e-38, %v2888_v10  ;;  %vm2887_vm15 = vcmp.eq.f32.partialorder %v2886_v30, 8.507059e+37  ;;  %3361 = vmatpush.bf16.msra.mxu1 %v4424_v44  ;;  %v4648_v10 = vld [vmem:[%s6970_s9 + $0x68] sm:$0xf0]  ;;  %v4364_v23 = vor.u32 %v4643_v12, %v4363_v22 }
 0x9f9   :  { %v4809_v52 = vpop.eup %4808  ;;  %3349 = vmatpush.bf16.msra.mxu0 %v4408_v14  ;;  %v4351_v14 = vld [vmem:[%s6970_s9 + $0x20] sm:$0xf] }
 0x9fa   :  { %v2896_v43 = vadd.f32 1.0, %v4809_v52  ;;  %v4399_v52 = vld [vmem:[%s6970_s9 + $0x80] sm:$0xf] }
 0x9fc   :  { %v4811_v63 = vpop.eup %4810  ;;  %4812 = vrcp.f32 %v2896_v43  ;;  %v2908_v60 = vand.u32 2147483648, %v2896_v43  ;;  %v2906_v5 = vand.u32 2147483647, %v2896_v43  ;;  %vm2902_vm2 = vweird.f32 %v2896_v43  ;;  %3362 = vmatpush.bf16.msra.mxu1 %v4412_v39  ;;  %v4640_v39 = vld [vmem:[%s6970_s9 + $0x28] sm:$0xf0] }
 0x9fd   :  { %v2878_v26 = vmul.f32 %v4811_v63, %v2876_v51  ;;  %vm2883_vm0 = vweird.f32 %v4811_v63  ;;  %v4391_v51 = vld [vmem:[%s6970_s9 + $0x78] sm:$0xf] }
 0x9fe   :  { %vm2884_vm14 = vmor %vm2882_vm13, %vm2883_vm0  ;;  %v2909_v55 = vor.u32 1.1754944e-38, %v2908_v60  ;;  %vm2907_vm4 = vcmp.eq.f32.partialorder %v2906_v5, 8.507059e+37  ;;  %v4392_v19 = vor.u32 %v4651_v27, %v4391_v51  ;;  %v4645_v5 = vld [vmem:[%s6970_s9 + $0x50] sm:$0xf0]  ;;  %v4348_v51 = vor.u32 %v4638_v62, %v4345_v57 }
 0x9ff   :  { %v2879_v58 = vsub.f32 1.0, %v2878_v26  ;;  %v4352_v27 = vor.u32 %v4640_v39, %v4351_v14 }
 0xa01   :  { %v2880_v21 = vmul.f32 %v4811_v63, %v2879_v58  ;;  %v4379_v58 = vld [vmem:[%s6970_s9 + $0x60] sm:$0xf] }
 0xa02   :  { %v4813_v49 = vpop.eup %4812  ;;  %v4380_v30 = vor.u32 %v4648_v10, %v4379_v58  ;;  %v4637_v58 = vld [vmem:[%s6970_s9 + $0x10] sm:$0xf0] }
 0xa03   :  { %v2898_v33 = vmul.f32 %v4813_v49, %v2896_v43  ;;  %v2881_v25 = vadd.f32 %v4811_v63, %v2880_v21  ;;  %vm2903_vm1 = vweird.f32 %v4813_v49  ;;  %v4652_v43 = vld [vmem:[%s6970_s9 + $0x88] sm:$0xf0]  ;;  %v4647_v21 = vld [vmem:[%s6970_s9 + $0x64] sm:$0xf] }
 0xa04   :  { %vm2904_vm3 = vmor %vm2902_vm2, %vm2903_vm1  ;;  %v4400_v26 = vor.u32 %v4652_v43, %v4399_v52 }
 0xa05   :  { %v2899_v45 = vsub.f32 1.0, %v2898_v33  ;;  %v2885_v29 = vsel %vm2884_vm14, %v4811_v63, %v2881_v25  ;;  %v4396_v63 = vor.u32 %v4650_v24, %v4393_v9  ;;  %v4387_v33 = vld [vmem:[%s6970_s9 + $0x68] sm:$0xf]  ;;  %v4649_v25 = vld [vmem:[%s6970_s9 + $0x70] sm:$0xf0] }
 0xa06   :  { %v2890_v53 = vsel %vm2887_vm15, %v2889_v17, %v2885_v29  ;;  %3363 = vmatpush.bf16.msra.mxu1 %v4400_v26  ;;  %v4331_v24 = vld [vmem:[%s6970_s9] sm:$0xf]  ;;  %v4635_v9 = vld [vmem:[%s6970_s9 + $0x4] sm:$0xf]  ;;  %v4339_v26 = vld [vmem:[%s6970_s9 + $0x8] sm:$0xf] }
 0xa07   :  { %v2900_v34 = vmul.f32 %v4813_v49, %v2899_v45  ;;  %v2912_v18 = vmul.f32 %v2890_v53, %v2869_v11  ;;  %3350 = vmatpush.bf16.msra.mxu0 %v4396_v63  ;;  %v4388_v45 = vor.u32 %v4649_v25, %v4387_v33  ;;  %v1602_v53 = vadd.f32 %v6131_v48, %v6034_v16  ;;  %v4369_v48 = vld [vmem:[%s6970_s9 + $0x54] sm:$0xf0]  ;;  %v4333_v63 = vld [vmem:[%s6970_s9 + $0xc] sm:$0xf0] }
 0xa09   :  { %v2901_v32 = vadd.f32 %v4813_v49, %v2900_v34  ;;  %v2913_v40 = vadd.f32 %v2912_v18, %v6129_v6  ;;  %v4367_v18 = vld [vmem:[%s6970_s9 + $0x48] sm:$0xf] }
 0xa0a   :  { %3364 = vmatpush.bf16.msra.mxu1 %v4388_v45 }
 0xa0b   :  { %v2905_v56 = vsel %vm2904_vm3, %v4813_v49, %v2901_v32  ;;  %4814 = vtanh.f32 %v2913_v40  ;;  %v4381_v49 = vld [vmem:[%s6970_s9 + $0x6c] sm:$0xf0]  ;;  %v4644_v32 = vld [vmem:[%s6970_s9 + $0x4c] sm:$0xf]  ;;  %v4368_v40 = vor.u32 %v4645_v5, %v4367_v18 }
 0xa0c   :  { %v2910_v36 = vsel %vm2907_vm4, %v2909_v55, %v2905_v56  ;;  %v4384_v17 = vor.u32 %v4647_v21, %v4381_v49  ;;  %v4375_v55 = vld [vmem:[%s6970_s9 + $0x50] sm:$0xf]  ;;  %v4646_v56 = vld [vmem:[%s6970_s9 + $0x58] sm:$0xf0]  ;;  %v4340_v49 = vor.u32 %v4637_v58, %v4339_v26 }
 0xa0d   :  { %v2915_v8 = vsub.f32 1.0, %v2910_v36  ;;  %v2917_v15 = vmul.f32 %v2910_v36, %v6628_v42  ;;  %v4657_v42 = vld [vmem:[%s6970_s9 + $0xb0] sm:$0xf0] }
 0xa0e   :  { %v4416_v37 = vor.u32 %v4657_v42, %v4415_v2  ;;  %3351 = vmatpush.bf16.msra.mxu0 %v4384_v17  ;;  %v4355_v2 = vld [vmem:[%s6970_s9 + $0x30] sm:$0xf]  ;;  %v4642_v42 = vld [vmem:[%s6970_s9 + $0x38] sm:$0xf0] }
 0xa0f   :  { %v4356_v4 = vor.u32 %v4642_v42, %v4355_v2 }
 0xa10   :  { %3335 = vmatpush.bf16.msra.mxu3 %v4416_v37 }
 0xa11   :  { %v4815_v35 = vpop.eup %4814 }
 0xa12   :  { %v2916_v3 = vmul.f32 %v4815_v35, %v2915_v8  ;;  %v4372_v35 = vor.u32 %v4644_v32, %v4369_v48 }
 0xa14   :  { %v6788_v31 = vadd.f32 %v2917_v15, %v2916_v3  ;;  %3336 = vmatpush.bf16.msra.mxu3 %v4404_v1  ;;  %v4376_v3 = vor.u32 %v4646_v56, %v4375_v55  ;;  %3352 = vmatpush.bf16.msra.mxu0 %v4372_v35  ;;  %v4639_v1 = vld [vmem:[%s6970_s9 + $0x20] sm:$0xf0] }
 0xa15   :  { %v4344_v28 = vor.u32 %v4639_v1, %v4343_v61 }
 0xa16   :  { %2919 = vst [vmem:[%s6974_s13 + $0x20] sm:$0xff] %v6788_v31  ;;  %v2955_v6 = vpack.c.bf16 %v6788_v31, %v6788_v31  ;;  %3365 = vmatpush.bf16.msra.mxu1 %v4376_v3 }
 0xa18   :  { %3092 = vmatmul.bf16.vlgmr.msrb.gmra.mxu0 %v2955_v6  ;;  %3105 = vmatmul.bf16.vlgmr.msrb.gmra.mxu1 %v2955_v6 }
 0xa19   :  { %3118 = vmatmul.bf16.vlgmr.msra.gmra.mxu2 %v2955_v6  ;;  %3337 = vmatpush.bf16.msra.mxu3 %v4392_v19  ;;  %v4636_v19 = vld [vmem:[%s6970_s9 + $0x8] sm:$0xf0] }
 0xa1a   :  { %3366 = vmatpush.bf16.msra.mxu1 %v4364_v23  ;;  %v4332_v43 = vor.u32 %v4636_v19, %v4331_v24 }
 0xa1d   :  { %3338 = vmatpush.bf16.msra.mxu3 %v4380_v30  ;;  %v4336_v30 = vor.u32 %v4635_v9, %v4333_v63 }
 0xa1e   :  { %3367 = vmatpush.bf16.msra.mxu1 %v4352_v27 }
 0xa21   :  { %3339 = vmatpush.bf16.msra.mxu3 %v4368_v40 }
 0xa22   :  { %3368 = vmatpush.bf16.msra.mxu1 %v4340_v49 }
 0xa25   :  { %3340 = vmatpush.bf16.msra.mxu3 %v4356_v4 }
 0xa29   :  { %3341 = vmatpush.bf16.msra.mxu3 %v4344_v28 }
 0xa2d   :  { %3342 = vmatpush.bf16.msra.mxu3 %v4332_v43 }
 0xa95   :  { %v3093_v11 = vpop.f32.mrf.mxu0  ;;  %v3106_v29 = vpop.f32.mrf.mxu1 }
 0xa96   :  { %v3094_v34 = vadd.f32 %v3093_v11, %v5952_v13  ;;  %v3107_v60 = vadd.f32 %v3106_v29, %v6067_v59 }
 0xa98   :  { %v3123_v36 = vadd.f32 %v3094_v34, %v6055_v54  ;;  %v3143_v8 = vadd.f32 %v3107_v60, %v1602_v53  ;;  %v4641_v54 = vld [vmem:[%s6970_s9 + $0x34] sm:$0xf] }
 0xa99   :  { %v4360_v46 = vor.u32 %v4641_v54, %v4357_v20 }
 0xa9a   :  { %v4327_v15 = vmul.f32 -1.442695, %v3123_v36  ;;  %v4328_v6 = vmul.f32 -1.442695, %v3143_v8 }
 0xa9b   :  { %3353 = vmatpush.bf16.msra.mxu0 %v4360_v46 }
 0xa9c   :  { %4816 = vpow2.f32 %v4327_v15  ;;  %v3119_v37 = vpop.f32.mrf.mxu2 }
 0xa9d   :  { %4818 = vpow2.f32 %v4328_v6  ;;  %v3095_v44 = vpop.f32.mrf.mxu0  ;;  %v3108_v41 = vpop.f32.mrf.mxu1  ;;  %v3120_v55 = vadd.f32 %v3119_v37, %v6114_v38 }
 0xa9e   :  { %v1605_v44 = vadd.f32 %v6145_v47, %v6034_v16 }
 0xa9f   :  { %3354 = vmatpush.bf16.msra.mxu0 %v4348_v51 }
 0xaa2   :  { %v4817_v52 = vpop.eup %4816 }
 0xaa3   :  { %v4819_v10 = vpop.eup %4818  ;;  %v3127_v21 = vadd.f32 1.0, %v4817_v52  ;;  %3355 = vmatpush.bf16.msra.mxu0 %v4336_v30 }
 0xaa4   :  { %v3147_v33 = vadd.f32 1.0, %v4819_v10  ;;  %v3121_v25 = vpop.f32.mrf.mxu2 }
 0xaa5   :  { %4820 = vrcp.f32 %v3127_v21  ;;  %v3139_v60 = vand.u32 2147483648, %v3127_v21  ;;  %v3137_v5 = vand.u32 2147483647, %v3127_v21  ;;  %vm3133_vm6 = vweird.f32 %v3127_v21 }
 0xaa6   :  { %4822 = vrcp.f32 %v3147_v33  ;;  %v3159_v35 = vand.u32 2147483648, %v3147_v33  ;;  %vm3153_vm10 = vweird.f32 %v3147_v33  ;;  %v3157_v15 = vand.u32 2147483647, %v3147_v33 }
 0xaa7   :  { %v3140_v48 = vor.u32 1.1754944e-38, %v3139_v60  ;;  %vm3138_vm8 = vcmp.eq.f32.partialorder %v3137_v5, 8.507059e+37 }
 0xaa8   :  { %v3160_v42 = vor.u32 1.1754944e-38, %v3159_v35  ;;  %vm3158_vm12 = vcmp.eq.f32.partialorder %v3157_v15, 8.507059e+37 }
 0xaab   :  { %v4821_v17 = vpop.eup %4820 }
 0xaac   :  { %v4823_v45 = vpop.eup %4822  ;;  %v3129_v11 = vmul.f32 %v4821_v17, %v3127_v21  ;;  %vm3134_vm5 = vweird.f32 %v4821_v17 }
 0xaad   :  { %v3149_v29 = vmul.f32 %v4823_v45, %v3147_v33  ;;  %vm3135_vm7 = vmor %vm3133_vm6, %vm3134_vm5  ;;  %vm3154_vm9 = vweird.f32 %v4823_v45 }
 0xaae   :  { %v3130_v53 = vsub.f32 1.0, %v3129_v11  ;;  %vm3155_vm11 = vmor %vm3153_vm10, %vm3154_vm9 }
 0xaaf   :  { %v3150_v34 = vsub.f32 1.0, %v3149_v29 }
 0xab0   :  { %v3131_v18 = vmul.f32 %v4821_v17, %v3130_v53 }
 0xab1   :  { %v3151_v32 = vmul.f32 %v4823_v45, %v3150_v34 }
 0xab2   :  { %v3132_v40 = vadd.f32 %v4821_v17, %v3131_v18 }
 0xab3   :  { %v3152_v8 = vadd.f32 %v4823_v45, %v3151_v32 }
 0xab4   :  { %v3136_v56 = vsel %vm3135_vm7, %v4821_v17, %v3132_v40 }
 0xab5   :  { %v3141_v36 = vsel %vm3138_vm8, %v3140_v48, %v3136_v56  ;;  %v3156_v2 = vsel %vm3155_vm11, %v4823_v45, %v3152_v8 }
 0xab6   :  { %v3163_v3 = vmul.f32 %v3141_v36, %v3120_v55  ;;  %v3161_v54 = vsel %vm3158_vm12, %v3160_v42, %v3156_v2 }
 0xab7   :  { %v3166_v20 = vsub.f32 1.0, %v3161_v54  ;;  %v3168_v46 = vmul.f32 %v3161_v54, %v6788_v31 }
 0xab8   :  { %v3164_v6 = vadd.f32 %v3163_v3, %v6135_v7 }
 0xaba   :  { %4824 = vtanh.f32 %v3164_v6 }
 0xac0   :  { %v4825_v4 = vpop.eup %4824 }
 0xac1   :  { %v3167_v37 = vmul.f32 %v4825_v4, %v3166_v20 }
 0xac3   :  { %v3169_v22 = vadd.f32 %v3168_v46, %v3167_v37 }
 0xac5   :  { %3170 = vst [vmem:[%s6974_s13 + $0x28] sm:$0xff] %v3169_v22  ;;  %v3206_v12 = vpack.c.bf16 %v3169_v22, %v3169_v22 }
 0xac7   :  { %3343 = vmatmul.bf16.vlgmr.msra.gmra.mxu3 %v3206_v12  ;;  %3356 = vmatmul.bf16.vlgmr.msra.gmra.mxu0 %v3206_v12 }
 0xac8   :  { %3369 = vmatmul.bf16.vlgmr.msra.gmra.mxu1 %v3206_v12 }
 0xb44   :  { %v3357_v7 = vpop.f32.mrf.mxu0 }
 0xb45   :  { %v3358_v41 = vadd.f32 %v3357_v7, %v6067_v59  ;;  %v3370_v23 = vpop.f32.mrf.mxu1 }
 0xb46   :  { %v3371_v30 = vadd.f32 %v3370_v23, %v6114_v38 }
 0xb47   :  { %v3394_v61 = vadd.f32 %v3358_v41, %v1605_v44 }
 0xb49   :  { %v4426_v1 = vmul.f32 -1.442695, %v3394_v61 }
 0xb4a   :  { %v3344_v62 = vpop.f32.mrf.mxu3 }
 0xb4b   :  { %4826 = vpow2.f32 %v4426_v1  ;;  %v3345_v31 = vadd.f32 %v3344_v62, %v5952_v13 }
 0xb4c   :  { %v3359_v28 = vpop.f32.mrf.mxu0 }
 0xb4d   :  { %v3374_v57 = vadd.f32 %v3345_v31, %v6105_v50  ;;  %v3372_v14 = vpop.f32.mrf.mxu1 }
 0xb4f   :  { %v4425_v39 = vmul.f32 -1.442695, %v3374_v57 }
 0xb51   :  { %v4827_v51 = vpop.eup %4826  ;;  %4828 = vpow2.f32 %v4425_v39 }
 0xb52   :  { %v3398_v27 = vadd.f32 1.0, %v4827_v51  ;;  %v3346_v24 = vpop.f32.mrf.mxu3 }
 0xb54   :  { %4830 = vrcp.f32 %v3398_v27  ;;  %v3410_v17 = vand.u32 2147483648, %v3398_v27  ;;  %vm3404_vm2 = vweird.f32 %v3398_v27  ;;  %v3408_v11 = vand.u32 2147483647, %v3398_v27 }
 0xb56   :  { %v3411_v34 = vor.u32 1.1754944e-38, %v3410_v17  ;;  %vm3409_vm4 = vcmp.eq.f32.partialorder %v3408_v11, 8.507059e+37 }
 0xb57   :  { %v4829_v16 = vpop.eup %4828 }
 0xb58   :  { %v3378_v47 = vadd.f32 1.0, %v4829_v16 }
 0xb5a   :  { %4832 = vrcp.f32 %v3378_v47  ;;  %v4831_v59 = vpop.eup %4830  ;;  %v3390_v13 = vand.u32 2147483648, %v3378_v47  ;;  %v3388_v50 = vand.u32 2147483647, %v3378_v47  ;;  %vm3384_vm13 = vweird.f32 %v3378_v47 }
 0xb5b   :  { %v3400_v19 = vmul.f32 %v4831_v59, %v3398_v27  ;;  %vm3405_vm1 = vweird.f32 %v4831_v59 }
 0xb5c   :  { %v3391_v21 = vor.u32 1.1754944e-38, %v3390_v13  ;;  %vm3389_vm15 = vcmp.eq.f32.partialorder %v3388_v50, 8.507059e+37  ;;  %vm3406_vm3 = vmor %vm3404_vm2, %vm3405_vm1 }
 0xb5d   :  { %v3401_v43 = vsub.f32 1.0, %v3400_v19 }
 0xb5f   :  { %v3402_v58 = vmul.f32 %v4831_v59, %v3401_v43 }
 0xb60   :  { %v4833_v9 = vpop.eup %4832 }
 0xb61   :  { %v3380_v52 = vmul.f32 %v4833_v9, %v3378_v47  ;;  %vm3385_vm0 = vweird.f32 %v4833_v9  ;;  %v3403_v33 = vadd.f32 %v4831_v59, %v3402_v58 }
 0xb62   :  { %vm3386_vm14 = vmor %vm3384_vm13, %vm3385_vm0 }
 0xb63   :  { %v3381_v63 = vsub.f32 1.0, %v3380_v52  ;;  %v3407_v53 = vsel %vm3406_vm3, %v4831_v59, %v3403_v33 }
 0xb64   :  { %v3412_v60 = vsel %vm3409_vm4, %v3411_v34, %v3407_v53 }
 0xb65   :  { %v3382_v26 = vmul.f32 %v4833_v9, %v3381_v63  ;;  %v3417_v18 = vsub.f32 1.0, %v3412_v60  ;;  %v3419_v38 = vmul.f32 %v3412_v60, %v3169_v22 }
 0xb67   :  { %v3383_v10 = vadd.f32 %v4833_v9, %v3382_v26 }
 0xb69   :  { %v3387_v49 = vsel %vm3386_vm14, %v4833_v9, %v3383_v10 }
 0xb6a   :  { %v3392_v25 = vsel %vm3389_vm15, %v3391_v21, %v3387_v49 }
 0xb6b   :  { %v3414_v45 = vmul.f32 %v3392_v25, %v3371_v30 }
 0xb6d   :  { %v3415_v29 = vadd.f32 %v3414_v45, %v6148_v0 }
 0xb6f   :  { %4834 = vtanh.f32 %v3415_v29 }
 0xb75   :  { %v4835_v5 = vpop.eup %4834 }
 0xb76   :  { %v3418_v32 = vmul.f32 %v4835_v5, %v3417_v18 }
 0xb78   :  { %v3420_v40 = vadd.f32 %v3419_v38, %v3418_v32 }
 0xb7a   :  { %3421 = vst [vmem:[%s6974_s13 + $0x30] sm:$0xff] %v3420_v40 }
 0xb7b   :  { %3426 = vsyncmov [#allocation5] }
 0xb7e   :  { %s3427_s23 = vpop.sfrf %3426 }
 0xb7f   :  { %p4427_p0 = scmp.ne.s32.totalorder %s3427_s23, 0 }
 0xb81   :  { %3431 = shalt.err (%p4427_p0)  }

</bundles_post_ra>
